<compile_context>
chip_gen: v7x
topology: tpu7x:2x2x1
jax: 0.10.0
libtpu: 0.0.40
codegen_flags: <defaults>
</compile_context>

<pallas_src>
import functools

import jax
import jax.numpy as jnp
from jax.experimental import pallas as pl
from jax.experimental.pallas import tpu as pltpu

HIDDEN = 1920          # fixed by the module definition
BN_EPS = 1e-5


def _enhanced_net_kernel(
    x_ref,      # (TB, F)     f32   batch block
    w1_ref,     # (F, H)      f32   full (tiny)
    s1_ref,     # (1, H)      f32   bn1 scale
    t1_ref,     # (1, H)      f32   bn1 shift (fc1 bias folded in)
    w2_ref,     # (H, TN)     bf16  fc2 column block
    s2_ref,     # (1, TN)     f32   bn2 scale block
    t2_ref,     # (1, TN)     f32   bn2 shift block (fc2 bias folded in)
    w3_ref,     # (TN, Cp)    bf16  fc3 row block (contraction rows)
    b3_ref,     # (1, Cp)     f32   fc3 bias (padded)
    out_ref,    # (TB, Cp)    f32   resident across j -> fc3 accumulator
    h1_ref,     # (TB, H)     bf16  VMEM scratch, computed once per batch block
):
    j = pl.program_id(1)

    @pl.when(j == 0)
    def _init():
        # fc1 + bn1 + relu, computed once per batch block and kept resident in VMEM (bf16).
        h1 = jnp.dot(x_ref[...], w1_ref[...], preferred_element_type=jnp.float32)
        h1 = h1 * s1_ref[...] + t1_ref[...]
        h1_ref[...] = jnp.maximum(h1, 0.0).astype(h1_ref.dtype)
        # Initialize the fc3 accumulator with the bias (no separate scratch / final copy).
        out_ref[...] = jnp.broadcast_to(b3_ref[...], out_ref.shape)

    # fc2 (one 640-wide column block of the hidden layer) + bn2 + relu, math in f32.
    h2 = jnp.dot(h1_ref[...], w2_ref[...], preferred_element_type=jnp.float32)
    h2 = h2 * s2_ref[...] + t2_ref[...]
    h2 = jnp.maximum(h2, 0.0)

    # Partial fc3: this column block contributes rows [j*TN, (j+1)*TN) of the contraction.
    out_ref[...] += jnp.dot(h2.astype(w3_ref.dtype), w3_ref[...],
                            preferred_element_type=jnp.float32)


@functools.partial(jax.jit, static_argnames=("num_classes", "tn", "tb"))
def enhanced_net_forward(x, params, num_classes, *, tn=640, tb=None):
    """Fused forward pass. x: (B, F) float32. Returns (B, num_classes) float32."""
    (w1, s1, t1, w2, s2, t2, w3, b3) = params
    B, F = x.shape
    Cp = w3.shape[1]                      # lane-padded class dim (multiple of 128)

    if tb is None:
        tb = B if B <= 256 else 256       # batch tile; one block at small B
    assert B % tb == 0, "batch must be divisible by the batch tile"
    assert HIDDEN % tn == 0 and tn % 128 == 0, "fc2 tile must be a 128-aligned divisor"
    nb = B // tb
    nj = HIDDEN // tn

    grid_spec = pltpu.PrefetchScalarGridSpec(
        num_scalar_prefetch=0,
        grid=(nb, nj),                                         # (batch, fc2 columns)
        in_specs=[
            pl.BlockSpec((tb, F), lambda i, j: (i, 0)),        # x batch block
            pl.BlockSpec((F, HIDDEN), lambda i, j: (0, 0)),    # w1 (grid-invariant)
            pl.BlockSpec((1, HIDDEN), lambda i, j: (0, 0)),    # s1
            pl.BlockSpec((1, HIDDEN), lambda i, j: (0, 0)),    # t1
            pl.BlockSpec((HIDDEN, tn), lambda i, j: (0, j)),   # w2 column block (bf16)
            pl.BlockSpec((1, tn), lambda i, j: (0, j)),        # s2 block
            pl.BlockSpec((1, tn), lambda i, j: (0, j)),        # t2 block
            pl.BlockSpec((tn, Cp), lambda i, j: (j, 0)),       # w3 row block (bf16)
            pl.BlockSpec((1, Cp), lambda i, j: (0, 0)),        # b3 (padded)
        ],
        out_specs=pl.BlockSpec((tb, Cp), lambda i, j: (i, 0)), # resident across j
        scratch_shapes=[
            pltpu.VMEM((tb, HIDDEN), jnp.bfloat16),            # resident h1 activations
        ],
    )

    out = pl.pallas_call(
        _enhanced_net_kernel,
        out_shape=jax.ShapeDtypeStruct((B, Cp), jnp.float32),
        grid_spec=grid_spec,
        compiler_params=pltpu.CompilerParams(
            dimension_semantics=("parallel", "arbitrary"),
        ),
    )(x, w1, s1, t1, w2, s2, t2, w3, b3)

    return out[:, :num_classes]


def make_raw_params(key, num_features, num_classes):
    """Deterministic synthetic f32 parameters with the shapes of EnhancedNet.__init__."""
    ks = jax.random.split(key, 16)
    f32 = jnp.float32

    def lin(kw, kb, fan_in, fan_out):
        lim = 1.0 / jnp.sqrt(fan_in)
        w = jax.random.uniform(kw, (fan_in, fan_out), f32, -lim, lim)
        b = jax.random.uniform(kb, (fan_out,), f32, -lim, lim)
        return w, b

    def bn(kg, kb, km, kv, n):
        gamma = 1.0 + 0.1 * jax.random.normal(kg, (n,), f32)
        beta = 0.1 * jax.random.normal(kb, (n,), f32)
        mean = 0.1 * jax.random.normal(km, (n,), f32)
        var = 1.0 + 0.1 * jnp.abs(jax.random.normal(kv, (n,), f32))
        return gamma, beta, mean, var

    w1, b1 = lin(ks[0], ks[1], num_features, HIDDEN)
    g1, be1, m1, v1 = bn(ks[2], ks[3], ks[4], ks[5], HIDDEN)
    w2, b2 = lin(ks[6], ks[7], HIDDEN, HIDDEN)
    g2, be2, m2, v2 = bn(ks[8], ks[9], ks[10], ks[11], HIDDEN)
    w3, b3 = lin(ks[12], ks[13], HIDDEN, num_classes)
    return (w1, b1, g1, be1, m1, v1, w2, b2, g2, be2, m2, v2, w3, b3)


def prepare_params(raw):
    """Fold eval-mode BN + linear bias into (scale, shift), cast the big weights to bf16,
    and pad the fc3 output columns up to a lane-dense multiple of 128."""
    (w1, b1, g1, be1, m1, v1, w2, b2, g2, be2, m2, v2, w3, b3) = raw
    C = w3.shape[1]
    Cp = ((C + 127) // 128) * 128

    def fuse(gamma, beta, mean, var, bias):
        scale = gamma / jnp.sqrt(var + BN_EPS)
        shift = beta - mean * scale + bias * scale       # fold the Linear bias into the shift
        return scale.reshape(1, -1), shift.reshape(1, -1)

    s1, t1 = fuse(g1, be1, m1, v1, b1)
    s2, t2 = fuse(g2, be2, m2, v2, b2)

    w2_bf = w2.astype(jnp.bfloat16)
    w3_bf = jnp.pad(w3, ((0, 0), (0, Cp - C))).astype(jnp.bfloat16)
    b3_p = jnp.pad(b3, (0, Cp - C)).reshape(1, Cp)
    return (w1, s1, t1, w2_bf, s2, t2, w3_bf, b3_p)


def reference_forward(x, raw):
    """Plain-JAX f32 reference of the eval-mode PyTorch forward."""
    (w1, b1, g1, be1, m1, v1, w2, b2, g2, be2, m2, v2, w3, b3) = raw
    h = x @ w1 + b1
    h = (h - m1) / jnp.sqrt(v1 + BN_EPS) * g1 + be1
    h = jnp.maximum(h, 0.0)
    h = h @ w2 + b2
    h = (h - m2) / jnp.sqrt(v2 + BN_EPS) * g2 + be2
    h = jnp.maximum(h, 0.0)
    return h @ w3 + b3


if __name__ == "__main__":
    key = jax.random.PRNGKey(0)
    B, num_features, num_classes = 8, 32, 10   # small shapes consistent with the module

    k_x, k_p = jax.random.split(key)
    x = jax.random.normal(k_x, (B, num_features), jnp.float32)
    raw = make_raw_params(k_p, num_features, num_classes)
    kparams = prepare_params(raw)

    out = enhanced_net_forward(x, kparams, num_classes)
    out = jax.block_until_ready(out)

    ref = reference_forward(x, raw)
    assert out.shape == (B, num_classes)
    # bf16 weight / hidden-activation storage -> loosened tolerance vs. the pure-f32 reference.
    assert jnp.allclose(out, ref, atol=1e-2, rtol=1e-2), "mismatch vs. reference"

    print("KERNEL_OK")
</pallas_src>

<mosaic_0001>
module attributes {stable_mosaic.version = 11 : i64} {
  func.func @_enhanced_net_kernel(%arg0: i32, %arg1: i32, %arg2: memref<8x32xf32, #tpu.memory_space<vmem>>, %arg3: memref<32x1920xf32, #tpu.memory_space<vmem>>, %arg4: memref<1x1920xf32, #tpu.memory_space<vmem>>, %arg5: memref<1x1920xf32, #tpu.memory_space<vmem>>, %arg6: memref<1920x640xbf16, #tpu.memory_space<vmem>>, %arg7: memref<1x640xf32, #tpu.memory_space<vmem>>, %arg8: memref<1x640xf32, #tpu.memory_space<vmem>>, %arg9: memref<640x128xbf16, #tpu.memory_space<vmem>>, %arg10: memref<1x128xf32, #tpu.memory_space<vmem>>, %arg11: memref<8x128xf32, #tpu.memory_space<vmem>>, %arg12: memref<8x1920xbf16, #tpu.memory_space<vmem>>) attributes {dimension_semantics = [#tpu.dimension_semantics<parallel>, #tpu.dimension_semantics<arbitrary>], iteration_bounds = array<i64: 1, 3>, scalar_prefetch = 0 : i64, scratch_operands = 1 : i64, tpu.core_type = #tpu.core_type<tc>, window_params = [{transform_indices = @transform_0, window_bounds = array<i64: 8, 32>}, {pipeline_mode = #tpu.pipeline_mode<synchronous>, transform_indices = @transform_1, window_bounds = array<i64: 32, 1920>}, {pipeline_mode = #tpu.pipeline_mode<synchronous>, transform_indices = @transform_2, window_bounds = array<i64: 1, 1920>}, {pipeline_mode = #tpu.pipeline_mode<synchronous>, transform_indices = @transform_3, window_bounds = array<i64: 1, 1920>}, {transform_indices = @transform_4, window_bounds = array<i64: 1920, 640>}, {transform_indices = @transform_5, window_bounds = array<i64: 1, 640>}, {transform_indices = @transform_6, window_bounds = array<i64: 1, 640>}, {transform_indices = @transform_7, window_bounds = array<i64: 640, 128>}, {pipeline_mode = #tpu.pipeline_mode<synchronous>, transform_indices = @transform_8, window_bounds = array<i64: 1, 128>}, {transform_indices = @transform_9, window_bounds = array<i64: 8, 128>}]} {
    %c0_i32 = arith.constant 0 : i32
    %0 = arith.cmpi eq, %arg1, %c0_i32 : i32
    %1 = arith.extui %0 : i1 to i32
    %c0_i32_0 = arith.constant 0 : i32
    %2 = arith.cmpi ne, %1, %c0_i32_0 : i32
    scf.if %2 {
      %c0_16 = arith.constant 0 : index
      %c0_17 = arith.constant 0 : index
      %20 = vector.load %arg2[%c0_16, %c0_17] : memref<8x32xf32, #tpu.memory_space<vmem>>, vector<8x32xf32>
      %c0_18 = arith.constant 0 : index
      %c0_19 = arith.constant 0 : index
      %21 = vector.load %arg3[%c0_18, %c0_19] : memref<32x1920xf32, #tpu.memory_space<vmem>>, vector<32x1920xf32>
      %cst_20 = arith.constant dense<0.000000e+00> : vector<8x1920xf32>
      %22 = tpu.matmul %20, %21, %cst_20 {dimension_numbers = #tpu.dot_dimension_numbers<[1], [0], [0], [1], [0, 0, 1, 1], [], []>} : vector<8x32xf32>, vector<32x1920xf32>, vector<8x1920xf32> -> vector<8x1920xf32>
      %c0_21 = arith.constant 0 : index
      %c0_22 = arith.constant 0 : index
      %23 = vector.load %arg4[%c0_21, %c0_22] : memref<1x1920xf32, #tpu.memory_space<vmem>>, vector<1x1920xf32>
      %24 = vector.broadcast %23 : vector<1x1920xf32> to vector<8x1920xf32>
      %25 = arith.mulf %22, %24 : vector<8x1920xf32>
      %c0_23 = arith.constant 0 : index
      %c0_24 = arith.constant 0 : index
      %26 = vector.load %arg5[%c0_23, %c0_24] : memref<1x1920xf32, #tpu.memory_space<vmem>>, vector<1x1920xf32>
      %27 = vector.broadcast %26 : vector<1x1920xf32> to vector<8x1920xf32>
      %28 = arith.addf %25, %27 : vector<8x1920xf32>
      %cst_25 = arith.constant 0.000000e+00 : f32
      %29 = vector.broadcast %cst_25 : f32 to vector<8x1920xf32>
      %30 = arith.maximumf %28, %29 : vector<8x1920xf32>
      %31 = arith.truncf %30 : vector<8x1920xf32> to vector<8x1920xbf16>
      %c0_26 = arith.constant 0 : index
      %c0_27 = arith.constant 0 : index
      %32 = vector.load %arg12[%c0_26, %c0_27] : memref<8x1920xbf16, #tpu.memory_space<vmem>>, vector<8x1920xbf16>
      tpu.vector_store %arg12[%c0_26, %c0_27], %31 {strides = array<i32>} : memref<8x1920xbf16, #tpu.memory_space<vmem>>, vector<8x1920xbf16>,
      %c0_28 = arith.constant 0 : index
      %c0_29 = arith.constant 0 : index
      %33 = vector.load %arg10[%c0_28, %c0_29] : memref<1x128xf32, #tpu.memory_space<vmem>>, vector<1x128xf32>
      %34 = vector.shape_cast %33 : vector<1x128xf32> to vector<1x128xf32>
      %35 = vector.broadcast %34 : vector<1x128xf32> to vector<8x128xf32>
      %c0_30 = arith.constant 0 : index
      %c0_31 = arith.constant 0 : index
      %36 = vector.load %arg11[%c0_30, %c0_31] : memref<8x128xf32, #tpu.memory_space<vmem>>, vector<8x128xf32>
      tpu.vector_store %arg11[%c0_30, %c0_31], %35 {strides = array<i32>} : memref<8x128xf32, #tpu.memory_space<vmem>>, vector<8x128xf32>,
    } else {
    }
    %c0 = arith.constant 0 : index
    %c0_1 = arith.constant 0 : index
    %3 = vector.load %arg12[%c0, %c0_1] : memref<8x1920xbf16, #tpu.memory_space<vmem>>, vector<8x1920xbf16>
    %c0_2 = arith.constant 0 : index
    %c0_3 = arith.constant 0 : index
    %4 = vector.load %arg6[%c0_2, %c0_3] : memref<1920x640xbf16, #tpu.memory_space<vmem>>, vector<1920x640xbf16>
    %cst = arith.constant dense<0.000000e+00> : vector<8x640xf32>
    %5 = tpu.matmul %3, %4, %cst {dimension_numbers = #tpu.dot_dimension_numbers<[1], [0], [0], [1], [0, 0, 1, 1], [], []>} : vector<8x1920xbf16>, vector<1920x640xbf16>, vector<8x640xf32> -> vector<8x640xf32>
    %c0_4 = arith.constant 0 : index
    %c0_5 = arith.constant 0 : index
    %6 = vector.load %arg7[%c0_4, %c0_5] : memref<1x640xf32, #tpu.memory_space<vmem>>, vector<1x640xf32>
    %7 = vector.broadcast %6 : vector<1x640xf32> to vector<8x640xf32>
    %8 = arith.mulf %5, %7 : vector<8x640xf32>
    %c0_6 = arith.constant 0 : index
    %c0_7 = arith.constant 0 : index
    %9 = vector.load %arg8[%c0_6, %c0_7] : memref<1x640xf32, #tpu.memory_space<vmem>>, vector<1x640xf32>
    %10 = vector.broadcast %9 : vector<1x640xf32> to vector<8x640xf32>
    %11 = arith.addf %8, %10 : vector<8x640xf32>
    %cst_8 = arith.constant 0.000000e+00 : f32
    %12 = vector.broadcast %cst_8 : f32 to vector<8x640xf32>
    %13 = arith.maximumf %11, %12 : vector<8x640xf32>
    %c0_9 = arith.constant 0 : index
    %c0_10 = arith.constant 0 : index
    %14 = vector.load %arg11[%c0_9, %c0_10] : memref<8x128xf32, #tpu.memory_space<vmem>>, vector<8x128xf32>
    %15 = arith.truncf %13 : vector<8x640xf32> to vector<8x640xbf16>
    %c0_11 = arith.constant 0 : index
    %c0_12 = arith.constant 0 : index
    %16 = vector.load %arg9[%c0_11, %c0_12] : memref<640x128xbf16, #tpu.memory_space<vmem>>, vector<640x128xbf16>
    %cst_13 = arith.constant dense<0.000000e+00> : vector<8x128xf32>
    %17 = tpu.matmul %15, %16, %cst_13 {dimension_numbers = #tpu.dot_dimension_numbers<[1], [0], [0], [1], [0, 0, 1, 1], [], []>} : vector<8x640xbf16>, vector<640x128xbf16>, vector<8x128xf32> -> vector<8x128xf32>
    %18 = arith.addf %14, %17 : vector<8x128xf32>
    %c0_14 = arith.constant 0 : index
    %c0_15 = arith.constant 0 : index
    %19 = vector.load %arg11[%c0_14, %c0_15] : memref<8x128xf32, #tpu.memory_space<vmem>>, vector<8x128xf32>
    tpu.vector_store %arg11[%c0_14, %c0_15], %18 {strides = array<i32>} : memref<8x128xf32, #tpu.memory_space<vmem>>, vector<8x128xf32>,
    return
  }
  func.func @transform_0(%arg0: i32, %arg1: i32) -> (i32, i32) {
    %c0_i32 = arith.constant 0 : i32
    %c0_i32_0 = arith.constant 0 : i32
    return %arg0, %c0_i32 : i32, i32
  }
  func.func @transform_1(%arg0: i32, %arg1: i32) -> (i32, i32) {
    %c0_i32 = arith.constant 0 : i32
    %c0_i32_0 = arith.constant 0 : i32
    %c0_i32_1 = arith.constant 0 : i32
    return %c0_i32, %c0_i32_0 : i32, i32
  }
  func.func @transform_2(%arg0: i32, %arg1: i32) -> (i32, i32) {
    %c0_i32 = arith.constant 0 : i32
    %c0_i32_0 = arith.constant 0 : i32
    %c0_i32_1 = arith.constant 0 : i32
    return %c0_i32, %c0_i32_0 : i32, i32
  }
  func.func @transform_3(%arg0: i32, %arg1: i32) -> (i32, i32) {
    %c0_i32 = arith.constant 0 : i32
    %c0_i32_0 = arith.constant 0 : i32
    %c0_i32_1 = arith.constant 0 : i32
    return %c0_i32, %c0_i32_0 : i32, i32
  }
  func.func @transform_4(%arg0: i32, %arg1: i32) -> (i32, i32) {
    %c0_i32 = arith.constant 0 : i32
    %c0_i32_0 = arith.constant 0 : i32
    return %c0_i32, %arg1 : i32, i32
  }
  func.func @transform_5(%arg0: i32, %arg1: i32) -> (i32, i32) {
    %c0_i32 = arith.constant 0 : i32
    %c0_i32_0 = arith.constant 0 : i32
    return %c0_i32, %arg1 : i32, i32
  }
  func.func @transform_6(%arg0: i32, %arg1: i32) -> (i32, i32) {
    %c0_i32 = arith.constant 0 : i32
    %c0_i32_0 = arith.constant 0 : i32
    return %c0_i32, %arg1 : i32, i32
  }
  func.func @transform_7(%arg0: i32, %arg1: i32) -> (i32, i32) {
    %c0_i32 = arith.constant 0 : i32
    %c0_i32_0 = arith.constant 0 : i32
    return %arg1, %c0_i32 : i32, i32
  }
  func.func @transform_8(%arg0: i32, %arg1: i32) -> (i32, i32) {
    %c0_i32 = arith.constant 0 : i32
    %c0_i32_0 = arith.constant 0 : i32
    %c0_i32_1 = arith.constant 0 : i32
    return %c0_i32, %c0_i32_0 : i32, i32
  }
  func.func @transform_9(%arg0: i32, %arg1: i32) -> (i32, i32) {
    %c0_i32 = arith.constant 0 : i32
    %c0_i32_0 = arith.constant 0 : i32
    return %arg0, %c0_i32 : i32, i32
  }
}

</mosaic_0001>

<bundles_post_ra>
// kernel: enhanced_net_forward.1
= control target key start
LH: loop header
LB: loop body
LE: loop exit
PB: predicated region body
PF: predicated region fallthrough
CT: control target
= control target key end

     0   :  { %s10836_s0 = inlined_call_operand.hbm [shape: f32[8,32], index: 0, kind: input, shape index: {}]   ;;  %s10837_s1 = inlined_call_operand.hbm [shape: f32[32,1920], index: 1, kind: input, shape index: {}]   ;;  %s10838_s2 = inlined_call_operand.hbm [shape: f32[1,1920], index: 2, kind: input, shape index: {}]   ;;  %s10839_s3 = inlined_call_operand.hbm [shape: f32[1,1920], index: 3, kind: input, shape index: {}]   ;;  %s10840_s4 = inlined_call_operand.hbm [shape: bf16[1920,1920], index: 4, kind: input, shape index: {}]   ;;  %s10841_s5 = inlined_call_operand.hbm [shape: f32[1,1920], index: 5, kind: input, shape index: {}]   ;;  %s10842_s6 = inlined_call_operand.hbm [shape: f32[1,1920], index: 6, kind: input, shape index: {}]   ;;  %s10843_s7 = inlined_call_operand.hbm [shape: bf16[1920,128], index: 7, kind: input, shape index: {}]   ;;  %s10844_s8 = inlined_call_operand.hbm [shape: f32[1,128], index: 8, kind: input, shape index: {}]   ;;  %s10845_s9 = inlined_call_operand.hbm [shape: f32[8,128], index: 9, kind: output, shape index: {}]  }
   0x1   :  { %10865 = sst [smem:[#allocation30_spill]] %s10836_s0 }
   0x2   :  { %10866 = sst [smem:[#allocation31_spill]] %s10840_s4 }
   0x3   :  { %10867 = sst [smem:[#allocation32_spill]] %s10845_s9 }
   0x4   :  { %14 = vsyncpa [#allocation4], 0 }
   0x5   :  { %15 = vsyncpa [#allocation7], 0 }
   0x6   :  { %16 = vsyncpa [#allocation10], 0 }
   0x7   :  { %17 = vsyncpa [#allocation5], 0  ;;  %s9597_s30 = smov 0   ;;  %s9599_s10 = smov 0  }
   0x8   :  { %s9601_s11 = smov 0   ;;  %s9603_s12 = smov 0  }
   0x9   :  { %s9605_s13 = smov 0   ;;  %s9607_s14 = smov 0  }
   0xa LB: > { %10868 = sst [smem:[#allocation23_spill]] %s9506_s10  ;;  %s9626_s15 = sadd.s32 4294967295, %s9522_s14   ;;  %s9522_s14 = sphi %s9607_s14, %s23_s14   ;;  %s9518_s13 = sphi %s9605_s13, %s10914_s13   ;;  %s9514_s12 = sphi %s9603_s12, %s10913_s12   ;;  %s9510_s11 = sphi %s9601_s11, %s10911_s11   ;;  %s9506_s10 = sphi %s9599_s10, %s10910_s10   ;;  %s9502_s30 = sphi %s9597_s30, %s10909_s30  }
   0xb   : > { %10869 = sst [smem:[#allocation24_spill]] %s9510_s11  ;;  %p144_p0 = scmp.ne.s32.totalorder %s9506_s10, %s9502_s30 }
   0xc   : > { %10870 = sst [smem:[#allocation25_spill]] %s9514_s12  ;;  %p10846_p1 = scmp.eq.s32.totalorder %s9626_s15, 0 }
   0xd   : > { %10871 = sst [smem:[#allocation26_spill]] %s9522_s14  ;;  %p7027_p2 = scmp.ge.s32.totalorder %s9522_s14, 1 }
   0xe   : > { %p280_p3 = scmp.lt.s32.totalorder %s9522_s14, 4  ;;  %p9634_p4 = por %p10846_p1, %p144_p0 }
   0xf   : > { %s9524_s18 = smov [#allocation3]   ;;  %s32_s21 = sadd.s32 1, %s9518_s13 }
  0x10   : > { %s10872_s16 = scalar_select %p9634_p4, 1, 0 }
  0x11   : > { %p9638_p5 = pnand %p7027_p2, %p280_p3  ;;  %s295_s19 = sshll.u32 %s9524_s18, 4  ;;  %s296_s19 = int_to_ptr.vmem [resolvable:$true] %s295_s19 }
  0x12   : > { %10873 = sst [smem:[#allocation27_spill]] %s10872_s16  ;;  %s131_s22 = sadd.s32 1, %s9510_s11 }
  0x13   : > { %s10874_s17 = scalar_select %p9638_p5, 1, 0 }
  0x14   : > { %p8162_p6 = pneg %p9638_p5  ;;  %p9652_p8 = scmp.ge.s32.totalorder %s32_s21, 3 }
  0x15   : > { %s10877_s0 = sld [smem:[#allocation30_spill]] }
  0x16   : > { %p9646_p7 = pnand %p8162_p6, %p10846_p1 }
  0x17   : > { %s10876_s23 = scalar_select %p9652_p8, 1, 0 }
  0x18   : > { %s10875_s20 = scalar_select %p9646_p7, 1, 0 }
  0x19   : > { %p9664_p10 = pneg %p9646_p7 }
  0x1b   : > { %s9166_s26 = scalar_lea.hbm %s10877_s0, 128 }
  0x1c   : > { %p9167_p9 = scmp.ne.s32.totalorder %s10877_s0, %s9166_s26  ;;  %p9173_p13 = scmp.lt.u32.totalorder %s9166_s26, %s10877_s0 }
  0x1d   : > { %s10878_s29 = scalar_select %p9664_p10, 1, 0 }
  0x1e   : > { %p9169_p11 = pnand %p9664_p10, %p9167_p9 }
  0x20   : > { %p9170_p12 = pneg %p9169_p11 }
  0x22   : > { %p9175_p0 = pnand %p9173_p13, %p9170_p12 }
  0x24   : > { %9178 = shalt.err (!%p9175_p0)
}
  0x25   : > { %s9179_s24 = scalar_lea.vmem %s296_s19, 128  ;;  %p9187_p1 = scmp.lt.s32.totalorder %s296_s19, %s296_s19 }
  0x26   : > { %p9180_p2 = scmp.ne.s32.totalorder %s296_s19, %s9179_s24  ;;  %p9188_p4 = scmp.lt.s32.totalorder %s9179_s24, %s9179_s24 }
  0x28   : > { %p9182_p3 = pnand %p9180_p2, %p9664_p10  ;;  %p9189_p5 = por %p9188_p4, %p9187_p1 }
  0x2a   : > { %p9183_p6 = pneg %p9182_p3 }
  0x2c   : > { %p9190_p8 = pnand %p9189_p5, %p9183_p6 }
  0x2e   : > { %9193 = shalt.err (!%p9190_p8)
}
  0x2f   : > { %8165 = dma.hbm_to_vmem [thread:$0]  (!%p9646_p7), %s10877_s0, 128, %s296_s19, [#allocation4]  }
  0x30   : > { %p10879_p1 = scmp.ne.s32.totalorder %s10876_s23, 0  ;;  %p138_p4 = scmp.ne.s32.totalorder %s9510_s11, %s9506_s10 }
  0x31   : > { %p139_p5 = scmp.eq.s32.totalorder %s9522_s14, 0  ;;  %p8196_p8 = scmp.lt.s32.totalorder %s9522_s14, 3 }
  0x32   : > { %s10916_s21 = smov (%p10879_p1, %s32_s21), 0  ;;  %s352_s28 = sand.u32 1, %s9522_s14  }
  0x33   : > { %10880 = sst [smem:[#allocation28_spill]] %s10916_s21  ;;  %s128_s26 = ssub.s32 %s9518_s13, %s10916_s21 }
  0x34   : > { %p129_p9 = scmp.eq.s32.totalorder %s128_s26, 0  ;;  %p140_p11 = por %p139_p5, %p138_p4 }
  0x35   : > { %s9692_s30 = sand.u32 1, %s9510_s11   ;;  %s7721_s25 = smul.u32 320, %s9518_s13 }
  0x36   : > { %s9697_s18 = scalar_select %p129_p9, %s9510_s11, %s131_s22  }
  0x37   : > { %s8123_s24 = smul.u32 4800, %s9692_s30  ;;  %p9701_p12 = pnand %p8196_p8, %p140_p11 }
  0x38   : > { %10881 = sst [smem:[#allocation29_spill]] %s9697_s18  ;;  %s10883_s4 = sld [smem:[#allocation31_spill]] }
  0x39   : > { %s10882_s19 = scalar_select %p9701_p12, 1, 0 }
  0x3a   : > { %s356_s26 = scalar_lea.vmem [#allocation11], %s8123_s24  ;;  %s9712_s22 = scalar_lea.sflag [#allocation4], %s352_s28 }
  0x3b   : > { %s363_s21 = sshll.u32 %s356_s26, 4  ;;  %p9718_p0 = pneg %p9701_p12  ;;  %s9710_s21 = int_to_ptr.vmem [resolvable:$true] %s363_s21 }
  0x3d   : > { %s10884_s11 = scalar_select %p9718_p0, 1, 0 }
  0x3e   : > { %s9708_s0 = scalar_lea.hbm %s10883_s4, %s7721_s25  ;;  %s9199_s24 = scalar_lea.hbm %s10883_s4, 230400 }
  0x3f   : > { %s9194_s18 = scalar_lea.hbm %s9708_s0, 76800  ;;  %p9200_p6 = scmp.lt.u32.totalorder %s9708_s0, %s10883_s4 }
  0x40   : > { %p9195_p13 = scmp.ne.s32.totalorder %s9708_s0, %s9194_s18  ;;  %p9201_p1 = scmp.lt.u32.totalorder %s9199_s24, %s9194_s18 }
  0x41   : > { %p9203_p5 = scmp.lt.u32.totalorder %s9194_s18, %s9708_s0 }
  0x42   : > { %p9197_p2 = pnand %p9718_p0, %p9195_p13  ;;  %p9202_p4 = por %p9201_p1, %p9200_p6 }
  0x44   : > { %p9198_p3 = pneg %p9197_p2  ;;  %p9204_p8 = por %p9203_p5, %p9202_p4 }
  0x46   : > { %p9205_p9 = pnand %p9204_p8, %p9198_p3 }
  0x48   : > { %9208 = shalt.err (!%p9205_p9)
}
  0x49   : > { %s9209_s28 = scalar_lea.vmem %s9710_s21, 76800  ;;  %s9525_s25 = smov [#allocation11]  }
  0x4a   : > { %p9210_p11 = scmp.ne.s32.totalorder %s9710_s21, %s9209_s28  ;;  %s9214_s23 = sshll.u32 %s9525_s25, 4  ;;  %s9215_s23 = int_to_ptr.vmem [resolvable:$false] %s9214_s23 }
  0x4b   : > { %s9216_s27 = scalar_lea.vmem %s9215_s23, 153600  ;;  %p9217_p7 = scmp.lt.s32.totalorder %s9710_s21, %s9215_s23 }
  0x4c   : > { %p9212_p13 = pnand %p9210_p11, %p9718_p0  ;;  %p9218_p10 = scmp.lt.s32.totalorder %s9216_s27, %s9209_s28 }
  0x4e   : > { %p9213_p2 = pneg %p9212_p13  ;;  %p9219_p6 = por %p9218_p10, %p9217_p7 }
  0x50   : > { %p9220_p1 = pnand %p9219_p6, %p9213_p2 }
  0x52   : > { %9223 = shalt.err (!%p9220_p1)
}
  0x53   : > { %s9526_s18 = smov 960   ;;  %s9527_s24 = smov 320  }
  0x54   : > { %s9528_s26 = smov 20   ;;  %s9529_s4 = smov [#allocation6]  }
  0x55   : > { %8181 = dma.hbm_to_vmem [thread:$0]  (!%p9701_p12), %s9708_s0, 76800, %s9710_s21, %s9712_s22, %s9526_s18, %s9527_s24, %s9528_s26  }
  0x56   : > { %s305_s25 = sshll.u32 %s9529_s4, 4  ;;  %s8124_s14 = smul.u32 5, %s9692_s30  ;;  %s306_s25 = int_to_ptr.vmem [resolvable:$true] %s305_s25 }
  0x57   : > { %s9224_s27 = scalar_lea.hbm %s10837_s1, 7680  ;;  %p10885_p10 = scmp.ne.s32.totalorder %s10878_s29, 0 }
  0x58   : > { %p9225_p7 = scmp.ne.s32.totalorder %s10837_s1, %s9224_s27  ;;  %p9231_p5 = scmp.lt.u32.totalorder %s9224_s27, %s10837_s1 }
  0x5a   : > { %p9227_p3 = pnand %p9225_p7, %p10885_p10 }
  0x5c   : > { %p9228_p4 = pneg %p9227_p3 }
  0x5e   : > { %p9233_p8 = pnand %p9231_p5, %p9228_p4 }
  0x60   : > { %9236 = shalt.err (!%p9233_p8)
}
  0x61   : > { %s9237_s0 = scalar_lea.vmem %s306_s25, 7680  ;;  %p9245_p2 = scmp.lt.s32.totalorder %s306_s25, %s306_s25 }
  0x62   : > { %p9238_p9 = scmp.ne.s32.totalorder %s306_s25, %s9237_s0  ;;  %p9246_p6 = scmp.lt.s32.totalorder %s9237_s0, %s9237_s0 }
  0x64   : > { %p9240_p11 = pnand %p9238_p9, %p10885_p10  ;;  %p9247_p1 = por %p9246_p6, %p9245_p2 }
  0x66   : > { %p9241_p13 = pneg %p9240_p11 }
  0x68   : > { %p9248_p12 = pnand %p9247_p1, %p9241_p13 }
  0x6a   : > { %9251 = shalt.err (!%p9248_p12)
}
  0x6b   : > { %s9530_s4 = smov 1920   ;;  %s9531_s9 = smov 120  }
  0x6c   : > { %p10886_p7 = scmp.ne.s32.totalorder %s10875_s20, 0  ;;  %s7722_s16 = smul.u32 80, %s9518_s13 }
  0x6d   : > { %s377_s21 = scalar_lea.vmem [#allocation12], %s8124_s14  ;;  %s9257_s10 = scalar_lea.hbm %s10841_s5, 240 }
  0x6e   : > { %8168 = dma.hbm_to_vmem [thread:$0]  (!%p10886_p7), %s10837_s1, 7680, %s306_s25, [#allocation7], %s9530_s4, %s9530_s4, %s9531_s9  }
  0x6f   : > { %s385_s18 = sshll.u32 %s377_s21, 4  ;;  %s383_s23 = scalar_lea.hbm %s10841_s5, %s7722_s16  ;;  %s386_s18 = int_to_ptr.vmem [resolvable:$true] %s385_s18 }
  0x70   : > { %s9252_s28 = scalar_lea.hbm %s383_s23, 80  ;;  %p9258_p5 = scmp.lt.u32.totalorder %s383_s23, %s10841_s5 }
  0x71   : > { %p9253_p12 = scmp.ne.s32.totalorder %s383_s23, %s9252_s28  ;;  %p9259_p8 = scmp.lt.u32.totalorder %s9257_s10, %s9252_s28 }
  0x72   : > { %p9261_p11 = scmp.lt.u32.totalorder %s9252_s28, %s383_s23 }
  0x73   : > { %p9255_p3 = pnand %p9253_p12, %p9718_p0  ;;  %p9260_p9 = por %p9259_p8, %p9258_p5 }
  0x75   : > { %p9256_p4 = pneg %p9255_p3  ;;  %p9262_p13 = por %p9261_p11, %p9260_p9 }
  0x77   : > { %p9263_p2 = pnand %p9262_p13, %p9256_p4 }
  0x79   : > { %9266 = shalt.err (!%p9263_p2)
}
  0x7a   : > { %s9267_s9 = scalar_lea.vmem %s386_s18, 80  ;;  %s9532_s12 = smov [#allocation12]  }
  0x7b   : > { %p9268_p6 = scmp.ne.s32.totalorder %s386_s18, %s9267_s9  ;;  %s9272_s21 = sshll.u32 %s9532_s12, 4  ;;  %s9273_s21 = int_to_ptr.vmem [resolvable:$false] %s9272_s21 }
  0x7c   : > { %s9274_s24 = scalar_lea.vmem %s9273_s21, 160  ;;  %p9275_p3 = scmp.lt.s32.totalorder %s386_s18, %s9273_s21 }
  0x7d   : > { %p9270_p1 = pnand %p9268_p6, %p9718_p0  ;;  %p9276_p7 = scmp.lt.s32.totalorder %s9274_s24, %s9267_s9 }
  0x7f   : > { %p9271_p12 = pneg %p9270_p1  ;;  %p9277_p10 = por %p9276_p7, %p9275_p3 }
  0x81   : > { %p9278_p5 = pnand %p9277_p10, %p9271_p12 }
  0x83   : > { %9281 = shalt.err (!%p9278_p5)
}
  0x84   : > { %p10887_p8 = scmp.ne.s32.totalorder %s10882_s19, 0  ;;  %s9533_s26 = smov [#allocation8]  }
  0x85   : > { %s319_s28 = sshll.u32 %s9533_s26, 4  ;;  %s9787_s10 = scalar_lea.hbm %s10842_s6, %s7722_s16  ;;  %s320_s28 = int_to_ptr.vmem [resolvable:$true] %s319_s28 }
  0x86   : > { %8184 = dma.hbm_to_vmem [thread:$0]  (!%p10887_p8), %s383_s23, 80, %s386_s18, %s9712_s22  }
  0x87   : > { %s9282_s9 = scalar_lea.hbm %s10838_s2, 240  ;;  %p10888_p7 = scmp.ne.s32.totalorder %s10878_s29, 0 }
  0x88   : > { %p9283_p10 = scmp.ne.s32.totalorder %s10838_s2, %s9282_s9  ;;  %p9289_p11 = scmp.lt.u32.totalorder %s9282_s9, %s10838_s2 }
  0x8a   : > { %p9285_p4 = pnand %p9283_p10, %p10888_p7 }
  0x8c   : > { %p9286_p9 = pneg %p9285_p4 }
  0x8e   : > { %p9291_p13 = pnand %p9289_p11, %p9286_p9 }
  0x90   : > { %9294 = shalt.err (!%p9291_p13)
}
  0x91   : > { %s9295_s24 = scalar_lea.vmem %s320_s28, 240  ;;  %s9302_s16 = scalar_lea.vmem %s320_s28, 256 }
  0x92   : > { %p9296_p2 = scmp.ne.s32.totalorder %s320_s28, %s9295_s24  ;;  %p9303_p12 = scmp.lt.s32.totalorder %s320_s28, %s320_s28 }
  0x93   : > { %p9304_p3 = scmp.lt.s32.totalorder %s9302_s16, %s9295_s24 }
  0x94   : > { %p9298_p6 = pnand %p9296_p2, %p10888_p7 }
  0x95   : > { %p9305_p5 = por %p9304_p3, %p9303_p12 }
  0x96   : > { %p9299_p1 = pneg %p9298_p6 }
  0x98   : > { %p9306_p8 = pnand %p9305_p5, %p9299_p1 }
  0x9a   : > { %9309 = shalt.err (!%p9306_p8)
}
  0x9b   : > { %p10889_p10 = scmp.ne.s32.totalorder %s10875_s20, 0  ;;  %s396_s0 = scalar_lea.vmem [#allocation13], %s8124_s14 }
  0x9c   : > { %s404_s25 = sshll.u32 %s396_s0, 4  ;;  %s9534_s4 = smov [#allocation9]   ;;  %s9809_s25 = int_to_ptr.vmem [resolvable:$true] %s404_s25 }
  0x9d   : > { %8171 = dma.hbm_to_vmem [thread:$0]  (!%p10889_p10), %s10838_s2, 240, %s320_s28, [#allocation7]  }
  0x9e   : > { %s330_s9 = sshll.u32 %s9534_s4, 4  ;;  %s9310_s12 = scalar_lea.hbm %s9787_s10, 80  ;;  %s331_s9 = int_to_ptr.vmem [resolvable:$true] %s330_s9 }
  0x9f   : > { %p9311_p8 = scmp.ne.s32.totalorder %s9787_s10, %s9310_s12  ;;  %s9315_s23 = scalar_lea.hbm %s10842_s6, 240 }
  0xa0   : > { %p9316_p11 = scmp.lt.u32.totalorder %s9787_s10, %s10842_s6  ;;  %p9317_p13 = scmp.lt.u32.totalorder %s9315_s23, %s9310_s12 }
  0xa1   : > { %p9313_p4 = pnand %p9311_p8, %p9718_p0  ;;  %p9319_p6 = scmp.lt.u32.totalorder %s9310_s12, %s9787_s10 }
  0xa2   : > { %p9318_p2 = por %p9317_p13, %p9316_p11 }
  0xa3   : > { %p9314_p9 = pneg %p9313_p4 }
  0xa4   : > { %p9320_p1 = por %p9319_p6, %p9318_p2 }
  0xa6   : > { %p9321_p12 = pnand %p9320_p1, %p9314_p9 }
  0xa8   : > { %9324 = shalt.err (!%p9321_p12)
}
  0xa9   : > { %s9325_s14 = scalar_lea.vmem %s9809_s25, 80  ;;  %s9535_s28 = smov [#allocation13]  }
  0xaa   : > { %p9326_p3 = scmp.ne.s32.totalorder %s9809_s25, %s9325_s14  ;;  %s9330_s26 = sshll.u32 %s9535_s28, 4  ;;  %s9331_s26 = int_to_ptr.vmem [resolvable:$false] %s9330_s26 }
  0xab   : > { %s9332_s27 = scalar_lea.vmem %s9331_s26, 160  ;;  %p9333_p4 = scmp.lt.s32.totalorder %s9809_s25, %s9331_s26 }
  0xac   : > { %p9328_p5 = pnand %p9326_p3, %p9718_p0  ;;  %p9334_p10 = scmp.lt.s32.totalorder %s9332_s27, %s9325_s14 }
  0xae   : > { %p9329_p8 = pneg %p9328_p5  ;;  %p9335_p11 = por %p9334_p10, %p9333_p4 }
  0xb0   : > { %p9336_p13 = pnand %p9335_p11, %p9329_p8 }
  0xb2   : > { %9339 = shalt.err (!%p9336_p13)
}
  0xb3   : > { %p10890_p9 = scmp.ne.s32.totalorder %s10882_s19, 0  ;;  %s9340_s12 = scalar_lea.hbm %s10839_s3, 240 }
  0xb4   : > { %p9341_p2 = scmp.ne.s32.totalorder %s10839_s3, %s9340_s12  ;;  %p9347_p1 = scmp.lt.u32.totalorder %s9340_s12, %s10839_s3 }
  0xb5   : > { %8187 = dma.hbm_to_vmem [thread:$0]  (!%p10890_p9), %s9787_s10, 80, %s9809_s25, %s9712_s22  }
  0xb6   : > { %p9343_p10 = pnand %p9341_p2, %p10888_p7 }
  0xb8   : > { %p9344_p6 = pneg %p9343_p10 }
  0xba   : > { %p9349_p12 = pnand %p9347_p1, %p9344_p6 }
  0xbc   : > { %9352 = shalt.err (!%p9349_p12)
}
  0xbd   : > { %s9353_s16 = scalar_lea.vmem %s331_s9, 240  ;;  %s9360_s10 = scalar_lea.vmem %s331_s9, 256 }
  0xbe   : > { %p9354_p3 = scmp.ne.s32.totalorder %s331_s9, %s9353_s16  ;;  %p9361_p4 = scmp.lt.s32.totalorder %s331_s9, %s331_s9 }
  0xbf   : > { %p9362_p11 = scmp.lt.s32.totalorder %s9360_s10, %s9353_s16 }
  0xc0   : > { %p9356_p5 = pnand %p9354_p3, %p10888_p7 }
  0xc1   : > { %p9363_p13 = por %p9362_p11, %p9361_p4 }
  0xc2   : > { %p9357_p8 = pneg %p9356_p5 }
  0xc4   : > { %p9364_p9 = pnand %p9363_p13, %p9357_p8 }
  0xc6   : > { %9367 = shalt.err (!%p9364_p9)
}
  0xc7   : > { %p10891_p2 = scmp.ne.s32.totalorder %s10875_s20, 0  ;;  %s9536_s28 = smov [#allocation15]  }
  0xc8   : > { %s341_s26 = sshll.u32 %s9536_s28, 4  ;;  %s8126_s27 = smul.u32 320, %s9692_s30  ;;  %s342_s26 = int_to_ptr.vmem [resolvable:$true] %s341_s26 }
  0xc9   : > { %8174 = dma.hbm_to_vmem [thread:$0]  (!%p10891_p2), %s10839_s3, 240, %s331_s9, [#allocation10]  }
  0xca   : > { %s7724_s0 = smul.u32 5120, %s9518_s13  ;;  %s9368_s21 = scalar_lea.hbm %s10844_s8, 16 }
  0xcb   : > { %p9369_p9 = scmp.ne.s32.totalorder %s10844_s8, %s9368_s21  ;;  %p9375_p1 = scmp.lt.u32.totalorder %s9368_s21, %s10844_s8 }
  0xcd   : > { %p9371_p10 = pnand %p9369_p9, %p10888_p7 }
  0xcf   : > { %p9372_p6 = pneg %p9371_p10 }
  0xd1   : > { %p9377_p12 = pnand %p9375_p1, %p9372_p6 }
  0xd3   : > { %9380 = shalt.err (!%p9377_p12)
}
  0xd4   : > { %s9381_s30 = scalar_lea.vmem %s342_s26, 16  ;;  %s9388_s9 = scalar_lea.vmem %s342_s26, 32 }
  0xd5   : > { %p9382_p3 = scmp.ne.s32.totalorder %s342_s26, %s9381_s30  ;;  %p9389_p4 = scmp.lt.s32.totalorder %s342_s26, %s342_s26 }
  0xd6   : > { %p9390_p11 = scmp.lt.s32.totalorder %s9388_s9, %s9381_s30 }
  0xd7   : > { %p9384_p5 = pnand %p9382_p3, %p10888_p7 }
  0xd8   : > { %p9391_p13 = por %p9390_p11, %p9389_p4 }
  0xd9   : > { %p9385_p8 = pneg %p9384_p5 }
  0xdb   : > { %p9392_p0 = pnand %p9391_p13, %p9385_p8 }
  0xdd   : > { %9395 = shalt.err (!%p9392_p0)
}
  0xde   : > { %8177 = dma.hbm_to_vmem [thread:$0]  (!%p10891_p2), %s10844_s8, 16, %s342_s26, [#allocation7]  }
  0xdf   : > { %s9874_s4 = scalar_lea.hbm %s10843_s7, %s7724_s0  ;;  %s415_s29 = scalar_lea.vmem [#allocation14], %s8126_s27 }
  0xe0   : > { %s422_s12 = sshll.u32 %s415_s29, 4  ;;  %s9396_s21 = scalar_lea.hbm %s9874_s4, 5120  ;;  %s9876_s12 = int_to_ptr.vmem [resolvable:$true] %s422_s12 }
  0xe1   : > { %p9397_p0 = scmp.ne.s32.totalorder %s9874_s4, %s9396_s21  ;;  %p10892_p7 = scmp.ne.s32.totalorder %s10884_s11, 0 }
  0xe2   : > { %s9401_s18 = scalar_lea.hbm %s10843_s7, 15360  ;;  %p9402_p2 = scmp.lt.u32.totalorder %s9874_s4, %s10843_s7 }
  0xe3   : > { %p9399_p9 = pnand %p9397_p0, %p10892_p7  ;;  %p9403_p6 = scmp.lt.u32.totalorder %s9401_s18, %s9396_s21 }
  0xe4   : > { %p9405_p12 = scmp.lt.u32.totalorder %s9396_s21, %s9874_s4 }
  0xe5   : > { %p9400_p10 = pneg %p9399_p9  ;;  %p9404_p1 = por %p9403_p6, %p9402_p2 }
  0xe7   : > { %p9406_p3 = por %p9405_p12, %p9404_p1 }
  0xe9   : > { %p9407_p5 = pnand %p9406_p3, %p9400_p10 }
  0xeb   : > { %9410 = shalt.err (!%p9407_p5)
}
  0xec   : > { %s9411_s27 = scalar_lea.vmem %s9876_s12, 5120  ;;  %s9537_s24 = smov [#allocation14]  }
  0xed   : > { %p9412_p8 = scmp.ne.s32.totalorder %s9876_s12, %s9411_s27  ;;  %s9416_s16 = sshll.u32 %s9537_s24, 4  ;;  %s9417_s16 = int_to_ptr.vmem [resolvable:$false] %s9416_s16 }
  0xee   : > { %s9418_s30 = scalar_lea.vmem %s9417_s16, 10240  ;;  %p9419_p13 = scmp.lt.s32.totalorder %s9876_s12, %s9417_s16 }
  0xef   : > { %p9414_p4 = pnand %p9412_p8, %p10892_p7  ;;  %p9420_p0 = scmp.lt.s32.totalorder %s9418_s30, %s9411_s27 }
  0xf1   : > { %p9415_p11 = pneg %p9414_p4  ;;  %p9421_p9 = por %p9420_p0, %p9419_p13 }
  0xf3   : > { %p9422_p2 = pnand %p9421_p9, %p9415_p11 }
  0xf5   : > { %9425 = shalt.err (!%p9422_p2)
}
  0xf6   : > { %s9538_s9 = smov 64   ;;  %s9539_s10 = smov 4  }
  0xf7   : > { %p10893_p10 = scmp.ne.s32.totalorder %s10882_s19, 0  ;;  %p10894_p7 = scmp.ne.s32.totalorder %s10874_s17, 0 }
  0xf8   : > { %p10895_p6 = scmp.eq.s32.totalorder (!%p10894_p7), %s9626_s15, 0 }
  0xf9   : > { %8190 = dma.hbm_to_vmem [thread:$0]  (!%p10893_p10), %s9874_s4, 5120, %s9876_s12, %s9712_s22, %s9538_s9, %s9538_s9, %s9539_s10  }
  0xfa   : > { %434 = sbr.rel (%p10894_p7) target bundleno = 1618 (0x652), region = 56 }
 0x101   : > { %9477 = dma.done.wait (%p10895_p6), [#allocation4], 128   ;;  %p10896_p1 = pmov %p10895_p6 }
 0x103   : > { %9479 = vsyncadd (%p10896_p1), [#allocation4], 4294967168  ;;  %p10897_p12 = pmov %p10896_p1 }
 0x104   : > { %p10898_p3 = pmov %p10896_p1 }
 0x105   : > { %9481 = dma.done.wait (%p10897_p12), [#allocation7], 7920  }
 0x106   : > { %9483 = vsyncadd (%p10898_p3), [#allocation7], 4294959376  ;;  %p10899_p5 = pmov %p10896_p1 }
 0x107   : > { %p10900_p8 = pmov %p10896_p1 }
 0x108   : > { %9485 = dma.done.wait (%p10899_p5), [#allocation10], 240  }
 0x109   : > { %9487 = vsyncadd (%p10900_p8), [#allocation10], 4294967056  ;;  %s10901_s11 = sld [smem:[#allocation23_spill]]  ;;  %s10902_s17 = sld [smem:[#allocation27_spill]] }
 0x10a   : > { %s452_s19 = sand.u32 1, %s9626_s15  }
 0x10b   : > { %s453_s14 = scalar_lea.sflag [#allocation4], %s452_s19 }
 0x10f   : > { %s454_s22 = sand.u32 1, %s10901_s11   ;;  %p10903_p4 = scmp.ne.s32.totalorder %s10902_s17, 0 }
 0x110   : > { %s8127_s25 = smul.u32 4800, %s454_s22 }
 0x112   : > { %s9916_s28 = scalar_lea.vmem [#allocation11], %s8127_s25 }
 0x113   : > { %9489 = dma.done.wait (%p10903_p4), %s453_s14, 82080  }
 0x114   : > { %9491 = vsyncadd (%p10903_p4), %s453_s14, 4294885216  ;;  %s8128_s4 = smul.u32 5, %s454_s22  ;;  %p10904_p11 = pmov %p10896_p1 }
 0x115   : > { %s8129_s29 = smul.u32 320, %s454_s22 }
 0x116   : > { %s9922_s12 = scalar_lea.vmem [#allocation12], %s8128_s4  ;;  %s9924_s21 = scalar_lea.vmem [#allocation13], %s8128_s4 }
 0x117   : > { %s9926_s20 = scalar_lea.vmem [#allocation14], %s8129_s29 }
 0x118   : > { %9493 = dma.done.wait (%p10904_p11), [#allocation7], 16   ;;  %p10905_p13 = pmov %p10896_p1 }
 0x119   : > { %s10906_s26 = sld [smem:[#allocation25_spill]] }
 0x11a   : > { %9495 = vsyncadd (%p10905_p13), [#allocation7], 4294967280 }
 0x11f   : > { %p7044_p0 = scmp.ne.s32.totalorder %s10906_s26, 0 }
 0x120   : > { %v543_v0 = vld [vmem:[#allocation6 + $0x8] sm:$0xff] (!%p7044_p0)  ;;  %v558_v1 = vld [vmem:[#allocation6 + $0x80] sm:$0xff] (!%p7044_p0)  ;;  %v545_v2 = vld [vmem:[#allocation6 + $0x18] sm:$0xff] (!%p7044_p0)  ;;  %v9540_v7 = vmov (!%p7044_p0), 0.0   ;;  %vm602_vm0 = vcmask (!%p7044_p0), 261120   ;;  %vm9542_vm1 = vmmov (!%p7044_p0), 0  }
 0x121   : > { %540 = sbr.rel (%p7044_p0) target bundleno = 545 (0x221), region = 96  ;;  %v8005_v3 = vpack.c.bf16 (!%p7044_p0), %v558_v1, %v543_v0  ;;  %v560_v4 = vld [vmem:[#allocation6 + $0x90] sm:$0xff] (!%p7044_p0)  ;;  %v542_v5 = vld [vmem:[#allocation6] sm:$0xff] (!%p7044_p0)  ;;  %v557_v6 = vld [vmem:[#allocation6 + $0x78] sm:$0xff] (!%p7044_p0)  ;;  %670 = vmatprep.mubr.f32.mxu0 (!%p7044_p0), %v9540_v7  ;;  %741 = vmatprep.mubr.f32.mxu1 (!%p7044_p0), %v9540_v7 }
 0x122   : > { %v8013_v8 = vpack.c.bf16 (!%p7044_p0), %v560_v4, %v545_v2  ;;  %v8007_v9 = vpack.c.bf16 (!%p7044_p0), %v557_v6, %v542_v5  ;;  %v544_v10 = vld [vmem:[#allocation6 + $0x10] sm:$0xff] (!%p7044_p0)  ;;  %v559_v11 = vld [vmem:[#allocation6 + $0x88] sm:$0xff] (!%p7044_p0)  ;;  %v573_v12 = vld [vmem:[#allocation6 + $0xf8] sm:$0xff] (!%p7044_p0) }
 0x123   : > { %8006 = vmatprep.subr.bf16.mxu0 (!%p7044_p0), %v8005_v3  ;;  %v8015_v13 = vpack.c.bf16 (!%p7044_p0), %v559_v11, %v544_v10  ;;  %v588_v14 = vld [vmem:[#allocation6 + $0x170] sm:$0xff] (!%p7044_p0)  ;;  %v575_v15 = vld [vmem:[#allocation6 + $0x108] sm:$0xff] (!%p7044_p0)  ;;  %v590_v16 = vld [vmem:[#allocation6 + $0x180] sm:$0xff] (!%p7044_p0) }
 0x124   : > { %8014 = vmatprep.subr.bf16.mxu1 (!%p7044_p0), %v8013_v8  ;;  %8008 = vmatpush1.bf16.msra.mxu0 (!%p7044_p0), %v8007_v9  ;;  %v8009_v17 = vpack.c.bf16 (!%p7044_p0), %v588_v14, %v573_v12  ;;  %v8017_v18 = vpack.c.bf16 (!%p7044_p0), %v590_v16, %v575_v15  ;;  %v572_v19 = vld [vmem:[#allocation6 + $0xf0] sm:$0xff] (!%p7044_p0)  ;;  %v587_v20 = vld [vmem:[#allocation6 + $0x168] sm:$0xff] (!%p7044_p0)  ;;  %v574_v21 = vld [vmem:[#allocation6 + $0x100] sm:$0xff] (!%p7044_p0) }
 0x125   : > { %8016 = vmatpush1.bf16.msra.mxu1 (!%p7044_p0), %v8015_v13  ;;  %v8011_v22 = vpack.c.bf16 (!%p7044_p0), %v587_v20, %v572_v19  ;;  %v589_v23 = vld [vmem:[#allocation6 + $0x178] sm:$0xff] (!%p7044_p0)  ;;  %v547_v24 = vld [vmem:[#allocation6 + $0x28] sm:$0xff] (!%p7044_p0)  ;;  %v562_v27 = vld [vmem:[#allocation6 + $0xa0] sm:$0xff] (!%p7044_p0) }
 0x126   : > { %8010 = vmatprep.subr.bf16.mxu0 (!%p7044_p0), %v8009_v17  ;;  %8018 = vmatprep.subr.bf16.mxu1 (!%p7044_p0), %v8017_v18  ;;  %v8019_v25 = vpack.c.bf16 (!%p7044_p0), %v589_v23, %v574_v21  ;;  %v9935_v26 = vld [vmem:[#allocation3] sm:$0xff] (!%p7044_p0)  ;;  %v564_v29 = vld [vmem:[#allocation6 + $0xb0] sm:$0xff] (!%p7044_p0)  ;;  %v8021_v30 = vpack.c.bf16 (!%p7044_p0), %v562_v27, %v547_v24  ;;  %v546_v32 = vld [vmem:[#allocation6 + $0x20] sm:$0xff] (!%p7044_p0) }
 0x127   : > { %v549_v28 = vld [vmem:[#allocation6 + $0x38] sm:$0xff] (!%p7044_p0)  ;;  %v548_v34 = vld [vmem:[#allocation6 + $0x30] sm:$0xff] (!%p7044_p0)  ;;  %v563_v36 = vld [vmem:[#allocation6 + $0xa8] sm:$0xff] (!%p7044_p0) }
 0x128   : > { %v8029_v31 = vpack.c.bf16 %v564_v29, %v549_v28  ;;  %v561_v33 = vld [vmem:[#allocation6 + $0x98] sm:$0xff]  ;;  %8012 = vmatpush1.bf16.msra.mxu0 %v8011_v22  ;;  %v592_v38 = vld [vmem:[#allocation6 + $0x190] sm:$0xff]  ;;  %v8031_v39 = vpack.c.bf16 %v563_v36, %v548_v34  ;;  %v579_v41 = vld [vmem:[#allocation6 + $0x128] sm:$0xff] }
 0x129   : > { %v8023_v35 = vpack.c.bf16 %v561_v33, %v546_v32  ;;  %v577_v37 = vld [vmem:[#allocation6 + $0x118] sm:$0xff]  ;;  %8020 = vmatpush1.bf16.msra.mxu1 %v8019_v25  ;;  %8022 = vmatprep.subr.bf16.mxu0 %v8021_v30  ;;  %v594_v42 = vld [vmem:[#allocation6 + $0x1a0] sm:$0xff]  ;;  %v576_v43 = vld [vmem:[#allocation6 + $0x110] sm:$0xff]  ;;  %v9541_v25 = vmov 0.0|0.0   ;;  %v1177_v32 = vlaneseq }
 0x12a   : > { %v8025_v40 = vpack.c.bf16 %v592_v38, %v577_v37  ;;  %8030 = vmatprep.subr.bf16.mxu1 %v8029_v31  ;;  %v8033_v44 = vpack.c.bf16 %v594_v42, %v579_v41  ;;  %v591_v45 = vld [vmem:[#allocation6 + $0x188] sm:$0xff]  ;;  %v578_v46 = vld [vmem:[#allocation6 + $0x120] sm:$0xff]  ;;  %v593_v47 = vld [vmem:[#allocation6 + $0x198] sm:$0xff] }
 0x12b   : > { %7045 = vmatmul.mubr.msk.f32.vlgmr.msra.gmra.mrb[0].mxu0 %vm602_vm0, %v9935_v26  ;;  %v551_v48 = vld [vmem:[#allocation6 + $0x48] sm:$0xff]  ;;  %v566_v49 = vld [vmem:[#allocation6 + $0xc0] sm:$0xff]  ;;  %v553_v50 = vld [vmem:[#allocation6 + $0x58] sm:$0xff]  ;;  %v8027_v51 = vpack.c.bf16 %v591_v45, %v576_v43  ;;  %v8035_v53 = vpack.c.bf16 %v593_v47, %v578_v46  ;;  %v1178_v33 = vshrl.u32 %v1177_v32, 7 }
 0x12c   : > { %7046 = vmatmul.mubr.msk.f32.vlgmr.msra.gmra.mrb[0].mxu1 %vm602_vm0, %v9935_v26  ;;  %8024 = vmatpush1.bf16.msra.mxu0 %v8023_v35  ;;  %v568_v52 = vld [vmem:[#allocation6 + $0xd0] sm:$0xff]  ;;  %v8037_v54 = vpack.c.bf16 %v566_v49, %v551_v48  ;;  %v550_v55 = vld [vmem:[#allocation6 + $0x40] sm:$0xff]  ;;  %v565_v56 = vld [vmem:[#allocation6 + $0xb8] sm:$0xff] }
 0x12d   : > { %8032 = vmatpush1.bf16.msra.mxu1 %v8031_v39  ;;  %8026 = vmatprep.subr.bf16.mxu0 %v8025_v40  ;;  %v552_v57 = vld [vmem:[#allocation6 + $0x50] sm:$0xff]  ;;  %v8045_v58 = vpack.c.bf16 %v568_v52, %v553_v50  ;;  %v567_v59 = vld [vmem:[#allocation6 + $0xc8] sm:$0xff]  ;;  %v581_v60 = vld [vmem:[#allocation6 + $0x138] sm:$0xff]  ;;  %v8039_v0 = vpack.c.bf16 %v565_v56, %v550_v55  ;;  %v9959_v34 = vsub.s32 0, %v1178_v33  ;;  %v9961_v36 = vsub.s32 1, %v1178_v33 }
 0x12e   : > { %8034 = vmatprep.subr.bf16.mxu1 %v8033_v44  ;;  %812 = vmatprep.mubr.f32.mxu0 %v9540_v7  ;;  %v596_v61 = vld [vmem:[#allocation6 + $0x1b0] sm:$0xff]  ;;  %v583_v62 = vld [vmem:[#allocation6 + $0x148] sm:$0xff]  ;;  %v598_v63 = vld [vmem:[#allocation6 + $0x1c0] sm:$0xff]  ;;  %v8047_v1 = vpack.c.bf16 %v567_v59, %v552_v57  ;;  %v9963_v37 = vsub.s32 2, %v1178_v33  ;;  %v9975_v50 = vsub.s32 4, %v1178_v33  ;;  %v9979_v55 = vsub.s32 6, %v1178_v33 }
 0x12f   : > { %883 = vmatprep.mubr.f32.mxu1 %v9540_v7  ;;  %v8041_v2 = vpack.c.bf16 %v596_v61, %v581_v60  ;;  %v580_v3 = vld [vmem:[#allocation6 + $0x130] sm:$0xff]  ;;  %v595_v4 = vld [vmem:[#allocation6 + $0x1a8] sm:$0xff]  ;;  %v582_v5 = vld [vmem:[#allocation6 + $0x140] sm:$0xff]  ;;  %v8049_v6 = vpack.c.bf16 %v598_v63, %v583_v62 }
 0x130   : > { %8028 = vmatpush1.bf16.msra.mxu0 %v8027_v51  ;;  %v597_v8 = vld [vmem:[#allocation6 + $0x1b8] sm:$0xff]  ;;  %v555_v9 = vld [vmem:[#allocation6 + $0x68] sm:$0xff]  ;;  %v570_v10 = vld [vmem:[#allocation6 + $0xe0] sm:$0xff]  ;;  %v8043_v11 = vpack.c.bf16 %v595_v4, %v580_v3 }
 0x131   : > { %8036 = vmatpush1.bf16.msra.mxu1 %v8035_v53  ;;  %8038 = vmatprep.subr.bf16.mxu0 %v8037_v54  ;;  %v8051_v12 = vpack.c.bf16 %v597_v8, %v582_v5  ;;  %v8053_v13 = vpack.c.bf16 %v570_v10, %v555_v9  ;;  %v554_v14 = vld [vmem:[#allocation6 + $0x60] sm:$0xff]  ;;  %v569_v15 = vld [vmem:[#allocation6 + $0xd8] sm:$0xff]  ;;  %v556_v16 = vld [vmem:[#allocation6 + $0x70] sm:$0xff]  ;;  %v9977_v54 = vsub.s32 5, %v1178_v33 }
 0x132   : > { %8046 = vmatprep.subr.bf16.mxu1 %v8045_v58  ;;  %v571_v17 = vld [vmem:[#allocation6 + $0xe8] sm:$0xff]  ;;  %v585_v18 = vld [vmem:[#allocation6 + $0x158] sm:$0xff]  ;;  %v600_v19 = vld [vmem:[#allocation6 + $0x1d0] sm:$0xff]  ;;  %v8055_v20 = vpack.c.bf16 %v569_v15, %v554_v14  ;;  %v1207_v58 = vsub.s32 7, %v1178_v33 }
 0x133   : > { %7047 = vmatmul.mubr.msk.f32.vlgmr.msra.gmra.mrb[2].mxu0 %vm602_vm0, %v9935_v26  ;;  %v8062_v21 = vpack.c.bf16 %v571_v17, %v556_v16  ;;  %v8057_v22 = vpack.c.bf16 %v600_v19, %v585_v18  ;;  %v584_v23 = vld [vmem:[#allocation6 + $0x150] sm:$0xff]  ;;  %v599_v24 = vld [vmem:[#allocation6 + $0x1c8] sm:$0xff]  ;;  %v586_v27 = vld [vmem:[#allocation6 + $0x160] sm:$0xff] }
 0x134   : > { %7048 = vmatmul.mubr.msk.f32.vlgmr.msra.gmra.mrb[2].mxu1 %vm602_vm0, %v9935_v26  ;;  %8040 = vmatpush1.bf16.msra.mxu0 %v8039_v0  ;;  %v601_v28 = vld [vmem:[#allocation6 + $0x1d8] sm:$0xff]  ;;  %v8059_v29 = vpack.c.bf16 %v599_v24, %v584_v23  ;;  %v7061_v31 = vld [vmem:[#allocation15] ss:$0 sm:$0xff]  ;;  %v1173_v35 = vld [vmem:[#allocation8] sm:$0xff] }
 0x135   : > { %8048 = vmatpush1.bf16.msra.mxu1 %v8047_v1  ;;  %8042 = vmatprep.subr.bf16.mxu0 %v8041_v2  ;;  %v8065_v30 = vpack.c.bf16 %v601_v28, %v586_v27  ;;  %1452 = vst [vmem:[#allocation16] sm:$0xff] %v7061_v31  ;;  %v1267_v38 = vld [vmem:[#allocation9] sm:$0xff]  ;;  %v1180_v39 = vrot.slane %v1173_v35, %v9959_v34 }
 0x136   : > { %8050 = vmatprep.subr.bf16.mxu1 %v8049_v6  ;;  %954 = vmatprep.mubr.f32.mxu0 %v9540_v7  ;;  %v1184_v40 = vrot.slane %v1173_v35, %v9961_v36  ;;  %v1274_v41 = vrot.slane %v1267_v38, %v9959_v34  ;;  %v1278_v44 = vrot.slane %v1267_v38, %v9961_v36 }
 0x137   : > { %1025 = vmatprep.mubr.f32.mxu1 %v9540_v7  ;;  %v1282_v45 = vrot.slane %v1267_v38, %v9963_v37  ;;  %v1196_v63 = vrot.slane %v1173_v35, %v9975_v50  ;;  %v1200_v2 = vrot.slane %v1173_v35, %v9977_v54  ;;  %v1204_v3 = vrot.slane %v1173_v35, %v9979_v55 }
 0x138   : > { %8044 = vmatpush1.bf16.msra.mxu0 %v8043_v11  ;;  %v1290_v5 = vrot.slane %v1267_v38, %v9975_v50  ;;  %v1208_v6 = vrot.slane %v1173_v35, %v1207_v58  ;;  %v1294_v10 = vrot.slane %v1267_v38, %v9977_v54  ;;  %v1298_v11 = vrot.slane %v1267_v38, %v9979_v55 }
 0x139   : > { %8052 = vmatpush1.bf16.msra.mxu1 %v8051_v12  ;;  %8054 = vmatprep.subr.bf16.mxu0 %v8053_v13  ;;  %v1302_v16 = vrot.slane %v1267_v38, %v1207_v58 }
 0x13a   : > { %8061 = vmatprep.subr.bf16.mxu1 %v9541_v25 }
 0x13b   : > { %7049 = vmatmul.mubr.msk.f32.vlgmr.msra.gmra.mrb[4].mxu0 %vm602_vm0, %v9935_v26 }
 0x13c   : > { %7050 = vmatmul.mubr.msk.f32.vlgmr.msra.gmra.mrb[4].mxu1 %vm602_vm0, %v9935_v26  ;;  %8056 = vmatpush1.bf16.msra.mxu0 %v8055_v20  ;;  %v1174_v20 = vld [vmem:[#allocation8 + $0x8] sm:$0xff] }
 0x13d   : > { %8063 = vmatpush3.bf16.msra.mxu1 %v8062_v21  ;;  %8058 = vmatprep.subr.bf16.mxu0 %v8057_v22  ;;  %v1216_v32 = vrot.slane %v1174_v20, %v9961_v36 }
 0x13e   : > { %8064 = vmatprep.subr.bf16.mxu1 %v9541_v25  ;;  %1096 = vmatprep.mubr.f32.mxu0 %v9540_v7  ;;  %v1268_v25 = vld [vmem:[#allocation9 + $0x8] sm:$0xff] }
 0x13f   : > { %7962 = vmatprep.mubr.msk.f32.mxu1 %vm9542_vm1, %v9540_v7  ;;  %v9965_v7 = vsub.s32 3, %v1178_v33  ;;  %v1220_v33 = vrot.slane %v1174_v20, %v9963_v37 }
 0x140   : > { %8060 = vmatpush1.bf16.msra.mxu0 %v8059_v29  ;;  %v1212_v29 = vrot.slane %v1174_v20, %v9959_v34 }
 0x141   : > { %8066 = vmatpush3.bf16.msra.mxu1 %v8065_v30  ;;  %v1192_v42 = vrot.slane %v1173_v35, %v9965_v7  ;;  %v1286_v49 = vrot.slane %v1267_v38, %v9965_v7  ;;  %v1306_v38 = vrot.slane %v1268_v25, %v9959_v34 }
 0x143   : > { %7051 = vmatmul.mubr.msk.f32.vlgmr.msra.gmra.mrb[6].mxu0 %vm602_vm0, %v9935_v26 }
 0x144   : > { %7963 = vmatmul.mubr.msk.f32.vlgmr.msra.gmra.mrb[6].mxu1 %vm602_vm0, %v9935_v26  ;;  %v1188_v26 = vrot.slane %v1173_v35, %v9963_v37 }
 0x1fe   : > { %v672_v43 = vpop.f32.mrb[0].mxu0 }
 0x1ff   : > { %v1252_v46 = vmul.f32 %v1180_v39, %v672_v43  ;;  %v674_v47 = vpop.f32.mrb[1].mxu0  ;;  %v743_v48 = vpop.f32.mrb[0].mxu1  ;;  %v1224_v39 = vrot.slane %v1174_v20, %v9965_v7 }
 0x200   : > { %v1253_v51 = vmul.f32 %v1184_v40, %v674_v47  ;;  %v1254_v52 = vmul.f32 %v1188_v26, %v743_v48  ;;  %v745_v53 = vpop.f32.mrb[1].mxu1  ;;  %v1318_v47 = vrot.slane %v1268_v25, %v9965_v7 }
 0x201   : > { %v1346_v56 = vadd.f32 %v1274_v41, %v1252_v46  ;;  %v1255_v57 = vmul.f32 %v1192_v42, %v745_v53  ;;  %v1310_v41 = vrot.slane %v1268_v25, %v9961_v36  ;;  %v1314_v42 = vrot.slane %v1268_v25, %v9963_v37 }
 0x202   : > { %v1347_v59 = vadd.f32 %v1278_v44, %v1253_v51  ;;  %v1348_v60 = vadd.f32 %v1282_v45, %v1254_v52  ;;  %v1228_v36 = vrot.slane %v1174_v20, %v9975_v50 }
 0x203   : > { %v1361_v61 = vmax.f32 %v1346_v56, 0.0  ;;  %v1349_v62 = vadd.f32 %v1286_v49, %v1255_v57 }
 0x204   : > { %v1362_v0 = vmax.f32 %v1347_v59, 0.0  ;;  %v1363_v1 = vmax.f32 %v1348_v60, 0.0  ;;  %v1236_v60 = vrot.slane %v1174_v20, %v9979_v55 }
 0x205   : > { %v1364_v4 = vmax.f32 %v1349_v62, 0.0  ;;  %v1322_v62 = vrot.slane %v1268_v25, %v9975_v50 }
 0x206   : > { %v7725_v8 = vpack.c.bf16 %v1362_v0, %v1361_v61  ;;  %v814_v9 = vpop.f32.mrb[2].mxu0  ;;  %v1232_v61 = vrot.slane %v1174_v20, %v9977_v54 }
 0x207   : > { %v7726_v12 = vpack.c.bf16 %v1364_v4, %v1363_v1  ;;  %v1256_v13 = vmul.f32 %v1196_v63, %v814_v9  ;;  %v816_v14 = vpop.f32.mrb[3].mxu0  ;;  %v885_v15 = vpop.f32.mrb[2].mxu1  ;;  %v1330_v1 = vrot.slane %v1268_v25, %v9979_v55 }
 0x208   : > { %1437 = vst [vmem:[#allocation2] sm:$0xff] %v7725_v8  ;;  %v1257_v17 = vmul.f32 %v1200_v2, %v816_v14  ;;  %v1258_v18 = vmul.f32 %v1204_v3, %v885_v15  ;;  %v887_v19 = vpop.f32.mrb[3].mxu1  ;;  %v1326_v2 = vrot.slane %v1268_v25, %v9977_v54 }
 0x209   : > { %1438 = vst [vmem:[#allocation2 + $0x8] sm:$0xff] %v7726_v12  ;;  %v1350_v21 = vadd.f32 %v1290_v5, %v1256_v13  ;;  %v1259_v22 = vmul.f32 %v1208_v6, %v887_v19 }
 0x20a   : > { %v1351_v23 = vadd.f32 %v1294_v10, %v1257_v17  ;;  %v1352_v24 = vadd.f32 %v1298_v11, %v1258_v18 }
 0x20b   : > { %v1365_v27 = vmax.f32 %v1350_v21, 0.0  ;;  %v1353_v28 = vadd.f32 %v1302_v16, %v1259_v22 }
 0x20c   : > { %v1366_v30 = vmax.f32 %v1351_v23, 0.0  ;;  %v1367_v31 = vmax.f32 %v1352_v24, 0.0 }
 0x20d   : > { %v1368_v35 = vmax.f32 %v1353_v28, 0.0 }
 0x20e   : > { %v7727_v40 = vpack.c.bf16 %v1366_v30, %v1365_v27  ;;  %v956_v26 = vpop.f32.mrb[4].mxu0 }
 0x20f   : > { %v7728_v43 = vpack.c.bf16 %v1368_v35, %v1367_v31  ;;  %v1260_v44 = vmul.f32 %v1212_v29, %v956_v26  ;;  %v958_v45 = vpop.f32.mrb[5].mxu0  ;;  %v1027_v46 = vpop.f32.mrb[4].mxu1 }
 0x210   : > { %1439 = vst [vmem:[#allocation2 + $0x10] sm:$0xff] %v7727_v40  ;;  %v1261_v48 = vmul.f32 %v1216_v32, %v958_v45  ;;  %v1262_v49 = vmul.f32 %v1220_v33, %v1027_v46  ;;  %v1029_v51 = vpop.f32.mrb[5].mxu1 }
 0x211   : > { %1440 = vst [vmem:[#allocation2 + $0x18] sm:$0xff] %v7728_v43  ;;  %v1354_v34 = vadd.f32 %v1306_v38, %v1260_v44  ;;  %v1263_v52 = vmul.f32 %v1224_v39, %v1029_v51 }
 0x212   : > { %v1355_v53 = vadd.f32 %v1310_v41, %v1261_v48  ;;  %v1356_v56 = vadd.f32 %v1314_v42, %v1262_v49 }
 0x213   : > { %v1369_v57 = vmax.f32 %v1354_v34, 0.0  ;;  %v1357_v58 = vadd.f32 %v1318_v47, %v1263_v52 }
 0x214   : > { %v1370_v37 = vmax.f32 %v1355_v53, 0.0  ;;  %v1371_v59 = vmax.f32 %v1356_v56, 0.0 }
 0x215   : > { %v1372_v7 = vmax.f32 %v1357_v58, 0.0 }
 0x216   : > { %v7729_v63 = vpack.c.bf16 %v1370_v37, %v1369_v57  ;;  %v1098_v0 = vpop.f32.mrb[6].mxu0 }
 0x217   : > { %v7730_v3 = vpack.c.bf16 %v1372_v7, %v1371_v59  ;;  %v1264_v4 = vmul.f32 %v1228_v36, %v1098_v0  ;;  %v1169_v5 = vpop.f32.mrb[6].mxu1  ;;  %v1100_v6 = vpop.f32.mrb[7].mxu0 }
 0x218   : > { %1441 = vst [vmem:[#allocation2 + $0x20] sm:$0xff] %v7729_v63  ;;  %v1266_v8 = vmul.f32 %v1236_v60, %v1169_v5  ;;  %v1265_v9 = vmul.f32 %v1232_v61, %v1100_v6  ;;  %v7964_v10 = vpop.f32.mrb[7].mxu1 }
 0x219   : > { %1442 = vst [vmem:[#allocation2 + $0x28] sm:$0xff] %v7730_v3  ;;  %v1358_v11 = vadd.f32 %v1322_v62, %v1264_v4 }
 0x21a   : > { %v1360_v12 = vadd.f32 %v1330_v1, %v1266_v8  ;;  %v1359_v13 = vadd.f32 %v1326_v2, %v1265_v9 }
 0x21b   : > { %v1373_v14 = vmax.f32 %v1358_v11, 0.0 }
 0x21c   : > { %v1375_v50 = vmax.f32 %v1360_v12, 0.0  ;;  %v1374_v15 = vmax.f32 %v1359_v13, 0.0 }
 0x21e   : > { %v7732_v16 = vpack.c.bf16 %v1375_v50, %v1375_v50  ;;  %v7731_v17 = vpack.c.bf16 %v1374_v15, %v1373_v14 }
 0x220   : > { %1444 = vst [vmem:[#allocation2 + $0x38] sm:$0xf] %v7732_v16  ;;  %1443 = vst [vmem:[#allocation2 + $0x30] sm:$0xff] %v7731_v17 }
 0x221 PF: > { %v8271_v54 = vld [vmem:[%s9916_s28 + $0x4] ss:$20 sps:$4 sm:$0xff]   ;;  %v8273_v55 = vld [vmem:[%s9916_s28 + $0xc] ss:$20 sps:$4 sm:$0xff]   ;;  %v8276_v19 = vld [vmem:[%s9916_s28 + $0x8] ss:$20 sps:$4 sm:$0xff]  }
 0x222   : > { %5354 = vmatprep.subr.bf16.mxu0 %v8271_v54  ;;  %v8275_v18 = vld [vmem:[%s9916_s28] ss:$20 sps:$4 sm:$0xff]   ;;  %5682 = vmatprep.subr.bf16.mxu1 %v8273_v55  ;;  %v8281_v22 = vld [vmem:[%s9916_s28 + $0x28] ss:$20 sps:$4 sm:$0xff]   ;;  %v8282_v23 = vld [vmem:[%s9916_s28 + $0x30] ss:$20 sps:$4 sm:$0xff]  }
 0x223   : > { %v8277_v20 = vld [vmem:[%s9916_s28 + $0x2c] ss:$20 sps:$4 sm:$0xff]   ;;  %5355 = vmatpush1.bf16.msra.mxu0 %v8275_v18  ;;  %5683 = vmatpush1.bf16.msra.mxu1 %v8276_v19  ;;  %v8279_v21 = vld [vmem:[%s9916_s28 + $0x34] ss:$20 sps:$4 sm:$0xff]   ;;  %v8285_v25 = vld [vmem:[%s9916_s28 + $0x5c] ss:$20 sps:$4 sm:$0xff]  }
 0x224   : > { %5356 = vmatprep.subr.bf16.mxu0 %v8277_v20  ;;  %5684 = vmatprep.subr.bf16.mxu1 %v8279_v21  ;;  %v8283_v24 = vld [vmem:[%s9916_s28 + $0x54] ss:$20 sps:$4 sm:$0xff]   ;;  %v8287_v27 = vld [vmem:[%s9916_s28 + $0x50] ss:$20 sps:$4 sm:$0xff]   ;;  %v8288_v28 = vld [vmem:[%s9916_s28 + $0x58] ss:$20 sps:$4 sm:$0xff]  }
 0x225   : > { %v8289_v29 = vld [vmem:[%s9916_s28 + $0x7c] ss:$20 sps:$4 sm:$0xff]   ;;  %v8291_v30 = vld [vmem:[%s9916_s28 + $0x84] ss:$20 sps:$4 sm:$0xff]   ;;  %v8294_v32 = vld [vmem:[%s9916_s28 + $0x80] ss:$20 sps:$4 sm:$0xff]  }
 0x226   : > { %v8293_v31 = vld [vmem:[%s9916_s28 + $0x78] ss:$20 sps:$4 sm:$0xff]   ;;  %v8299_v38 = vld [vmem:[%s9916_s28 + $0xa0] ss:$20 sps:$4 sm:$0xff]   ;;  %v8300_v39 = vld [vmem:[%s9916_s28 + $0xa8] ss:$20 sps:$4 sm:$0xff]  }
 0x227   : > { %5357 = vmatpush1.bf16.msra.mxu0 %v8281_v22  ;;  %5685 = vmatpush1.bf16.msra.mxu1 %v8282_v23  ;;  %v8295_v33 = vld [vmem:[%s9916_s28 + $0xa4] ss:$20 sps:$4 sm:$0xff]   ;;  %v8297_v35 = vld [vmem:[%s9916_s28 + $0xac] ss:$20 sps:$4 sm:$0xff]   ;;  %v8303_v26 = vld [vmem:[%s9916_s28 + $0xd4] ss:$20 sps:$4 sm:$0xff]  }
 0x228   : > { %5358 = vmatprep.subr.bf16.mxu0 %v8283_v24  ;;  %5686 = vmatprep.subr.bf16.mxu1 %v8285_v25  ;;  %v8301_v40 = vld [vmem:[%s9916_s28 + $0xcc] ss:$20 sps:$4 sm:$0xff]   ;;  %v8305_v41 = vld [vmem:[%s9916_s28 + $0xc8] ss:$20 sps:$4 sm:$0xff]   ;;  %v8306_v42 = vld [vmem:[%s9916_s28 + $0xd0] ss:$20 sps:$4 sm:$0xff]  }
 0x229   : > { %v8307_v43 = vld [vmem:[%s9916_s28 + $0xf4] ss:$20 sps:$4 sm:$0xff]   ;;  %v8309_v44 = vld [vmem:[%s9916_s28 + $0xfc] ss:$20 sps:$4 sm:$0xff]   ;;  %v8312_v46 = vld [vmem:[%s9916_s28 + $0xf8] ss:$20 sps:$4 sm:$0xff]  }
 0x22a   : > { %v8311_v45 = vld [vmem:[%s9916_s28 + $0xf0] ss:$20 sps:$4 sm:$0xff]   ;;  %v8317_v49 = vld [vmem:[%s9916_s28 + $0x118] ss:$20 sps:$4 sm:$0xff]   ;;  %v8318_v51 = vld [vmem:[%s9916_s28 + $0x120] ss:$20 sps:$4 sm:$0xff]  }
 0x22b   : > { %5359 = vmatpush1.bf16.msra.mxu0 %v8287_v27  ;;  %5687 = vmatpush1.bf16.msra.mxu1 %v8288_v28  ;;  %v8313_v47 = vld [vmem:[%s9916_s28 + $0x11c] ss:$20 sps:$4 sm:$0xff]   ;;  %v8315_v48 = vld [vmem:[%s9916_s28 + $0x124] ss:$20 sps:$4 sm:$0xff]   ;;  %v8321_v52 = vld [vmem:[%s9916_s28 + $0x14c] ss:$20 sps:$4 sm:$0xff]  }
 0x22c   : > { %5360 = vmatprep.subr.bf16.mxu0 %v8289_v29  ;;  %5688 = vmatprep.subr.bf16.mxu1 %v8291_v30  ;;  %v8319_v34 = vld [vmem:[%s9916_s28 + $0x144] ss:$20 sps:$4 sm:$0xff]   ;;  %v8323_v53 = vld [vmem:[%s9916_s28 + $0x140] ss:$20 sps:$4 sm:$0xff]   ;;  %v8324_v56 = vld [vmem:[%s9916_s28 + $0x148] ss:$20 sps:$4 sm:$0xff]  }
 0x22d   : > { %v8325_v57 = vld [vmem:[%s9916_s28 + $0x16c] ss:$20 sps:$4 sm:$0xff]   ;;  %v8327_v58 = vld [vmem:[%s9916_s28 + $0x174] ss:$20 sps:$4 sm:$0xff]   ;;  %v8330_v37 = vld [vmem:[%s9916_s28 + $0x170] ss:$20 sps:$4 sm:$0xff]  }
 0x22e   : > { %v8329_v36 = vld [vmem:[%s9916_s28 + $0x168] ss:$20 sps:$4 sm:$0xff]   ;;  %v8335_v61 = vld [vmem:[%s9916_s28 + $0x190] ss:$20 sps:$4 sm:$0xff]   ;;  %v8336_v7 = vld [vmem:[%s9916_s28 + $0x198] ss:$20 sps:$4 sm:$0xff]  }
 0x22f   : > { %5361 = vmatpush1.bf16.msra.mxu0 %v8293_v31  ;;  %5689 = vmatpush1.bf16.msra.mxu1 %v8294_v32  ;;  %v8331_v59 = vld [vmem:[%s9916_s28 + $0x194] ss:$20 sps:$4 sm:$0xff]   ;;  %v8333_v60 = vld [vmem:[%s9916_s28 + $0x19c] ss:$20 sps:$4 sm:$0xff]   ;;  %v8339_v63 = vld [vmem:[%s9916_s28 + $0x1c4] ss:$20 sps:$4 sm:$0xff]  }
 0x230   : > { %5362 = vmatprep.subr.bf16.mxu0 %v8295_v33  ;;  %5690 = vmatprep.subr.bf16.mxu1 %v8297_v35  ;;  %v8337_v62 = vld [vmem:[%s9916_s28 + $0x1bc] ss:$20 sps:$4 sm:$0xff]   ;;  %v8341_v1 = vld [vmem:[%s9916_s28 + $0x1b8] ss:$20 sps:$4 sm:$0xff]   ;;  %v8342_v3 = vld [vmem:[%s9916_s28 + $0x1c0] ss:$20 sps:$4 sm:$0xff]  }
 0x231   : > { %v1453_v0 = vld [vmem:[#allocation2] sm:$0xff]  ;;  %v8343_v4 = vld [vmem:[%s9916_s28 + $0x1e4] ss:$20 sps:$4 sm:$0xff]   ;;  %v8351_v10 = vld [vmem:[%s9916_s28 + $0x214] ss:$20 sps:$4 sm:$0xff]   ;;  %vm9545_vm2 = vmmov 0  }
 0x232   : > { %v10048_v2 = vcombine.high %v1453_v0, %v1453_v0  ;;  %v8345_v5 = vld [vmem:[%s9916_s28 + $0x1ec] ss:$20 sps:$4 sm:$0xff]   ;;  %v8348_v8 = vld [vmem:[%s9916_s28 + $0x1e8] ss:$20 sps:$4 sm:$0xff]   ;;  %v8354_v12 = vld [vmem:[%s9916_s28 + $0x210] ss:$20 sps:$4 sm:$0xff]   ;;  %v10072_v21 = vcombine.low %v1453_v0, %v1453_v0 }
 0x233   : > { %5363 = vmatpush1.bf16.msra.mxu0 %v8299_v38  ;;  %5691 = vmatpush1.bf16.msra.mxu1 %v8300_v39  ;;  %v8347_v6 = vld [vmem:[%s9916_s28 + $0x1e0] ss:$20 sps:$4 sm:$0xff]   ;;  %v8353_v11 = vld [vmem:[%s9916_s28 + $0x208] ss:$20 sps:$4 sm:$0xff]   ;;  %v8359_v50 = vld [vmem:[%s9916_s28 + $0x230] ss:$20 sps:$4 sm:$0xff]  }
 0x234   : > { %5364 = vmatprep.subr.bf16.mxu0 %v8301_v40  ;;  %5692 = vmatprep.subr.bf16.mxu1 %v8303_v26  ;;  %v8349_v9 = vld [vmem:[%s9916_s28 + $0x20c] ss:$20 sps:$4 sm:$0xff]   ;;  %v8355_v13 = vld [vmem:[%s9916_s28 + $0x234] ss:$20 sps:$4 sm:$0xff]   ;;  %v8357_v14 = vld [vmem:[%s9916_s28 + $0x23c] ss:$20 sps:$4 sm:$0xff]  }
 0x235   : > { %5386 = vmatprep.mubr.bf16.mxu0 %v10048_v2  ;;  %5714 = vmatprep.mubr.bf16.mxu1 %v10048_v2  ;;  %v8360_v15 = vld [vmem:[%s9916_s28 + $0x238] ss:$20 sps:$4 sm:$0xff]   ;;  %v8361_v16 = vld [vmem:[%s9916_s28 + $0x25c] ss:$20 sps:$4 sm:$0xff]   ;;  %v8366_v55 = vld [vmem:[%s9916_s28 + $0x260] ss:$20 sps:$4 sm:$0xff]  }
 0x236   : > { %v8363_v17 = vld [vmem:[%s9916_s28 + $0x264] ss:$20 sps:$4 sm:$0xff]   ;;  %v8373_v19 = vld [vmem:[%s9916_s28 + $0x28c] ss:$20 sps:$4 sm:$0xff]   ;;  %v8371_v22 = vld [vmem:[%s9916_s28 + $0x288] ss:$20 sps:$4 sm:$0xff]  }
 0x237   : > { %5365 = vmatpush1.bf16.msra.mxu0 %v8305_v41  ;;  %5693 = vmatpush1.bf16.msra.mxu1 %v8306_v42  ;;  %v8365_v54 = vld [vmem:[%s9916_s28 + $0x258] ss:$20 sps:$4 sm:$0xff]   ;;  %v8368_v20 = vld [vmem:[%s9916_s28 + $0x280] ss:$20 sps:$4 sm:$0xff]   ;;  %v8375_v25 = vld [vmem:[%s9916_s28 + $0x2a8] ss:$20 sps:$4 sm:$0xff]  }
 0x238   : > { %5366 = vmatprep.subr.bf16.mxu0 %v8307_v43  ;;  %5694 = vmatprep.subr.bf16.mxu1 %v8309_v44  ;;  %v8370_v18 = vld [vmem:[%s9916_s28 + $0x284] ss:$20 sps:$4 sm:$0xff]   ;;  %v8377_v23 = vld [vmem:[%s9916_s28 + $0x2ac] ss:$20 sps:$4 sm:$0xff]   ;;  %v8380_v24 = vld [vmem:[%s9916_s28 + $0x2b4] ss:$20 sps:$4 sm:$0xff]  }
 0x239   : > { %v8378_v27 = vld [vmem:[%s9916_s28 + $0x2b0] ss:$20 sps:$4 sm:$0xff]   ;;  %v8383_v28 = vld [vmem:[%s9916_s28 + $0x2d4] ss:$20 sps:$4 sm:$0xff]   ;;  %v8384_v31 = vld [vmem:[%s9916_s28 + $0x2d8] ss:$20 sps:$4 sm:$0xff]  }
 0x23a   : > { %v8386_v29 = vld [vmem:[%s9916_s28 + $0x2dc] ss:$20 sps:$4 sm:$0xff]   ;;  %v8392_v33 = vld [vmem:[%s9916_s28 + $0x304] ss:$20 sps:$4 sm:$0xff]   ;;  %v8390_v38 = vld [vmem:[%s9916_s28 + $0x300] ss:$20 sps:$4 sm:$0xff]  }
 0x23b   : > { %5367 = vmatpush1.bf16.msra.mxu0 %v8311_v45  ;;  %5695 = vmatpush1.bf16.msra.mxu1 %v8312_v46  ;;  %v8381_v30 = vld [vmem:[%s9916_s28 + $0x2d0] ss:$20 sps:$4 sm:$0xff]   ;;  %v8387_v35 = vld [vmem:[%s9916_s28 + $0x2f8] ss:$20 sps:$4 sm:$0xff]   ;;  %v8393_v26 = vld [vmem:[%s9916_s28 + $0x320] ss:$20 sps:$4 sm:$0xff]  }
 0x23c   : > { %5368 = vmatprep.subr.bf16.mxu0 %v8313_v47  ;;  %5696 = vmatprep.subr.bf16.mxu1 %v8315_v48  ;;  %v8389_v32 = vld [vmem:[%s9916_s28 + $0x2fc] ss:$20 sps:$4 sm:$0xff]   ;;  %v8395_v39 = vld [vmem:[%s9916_s28 + $0x324] ss:$20 sps:$4 sm:$0xff]   ;;  %v8398_v40 = vld [vmem:[%s9916_s28 + $0x32c] ss:$20 sps:$4 sm:$0xff]  }
 0x23d   : > { %v8396_v41 = vld [vmem:[%s9916_s28 + $0x328] ss:$20 sps:$4 sm:$0xff]   ;;  %v8401_v42 = vld [vmem:[%s9916_s28 + $0x34c] ss:$20 sps:$4 sm:$0xff]   ;;  %v8402_v45 = vld [vmem:[%s9916_s28 + $0x350] ss:$20 sps:$4 sm:$0xff]  }
 0x23e   : > { %v8404_v43 = vld [vmem:[%s9916_s28 + $0x354] ss:$20 sps:$4 sm:$0xff]   ;;  %v8410_v47 = vld [vmem:[%s9916_s28 + $0x37c] ss:$20 sps:$4 sm:$0xff]   ;;  %s9546_s18 = smov [#allocation16]   ;;  %p8202_p9 = scmp.eq.s32.totalorder %s9626_s15, 2 }
 0x23f   : > { %5369 = vmatpush1.bf16.msra.mxu0 %v8317_v49  ;;  %5697 = vmatpush1.bf16.msra.mxu1 %v8318_v51  ;;  %v8399_v44 = vld [vmem:[%s9916_s28 + $0x348] ss:$20 sps:$4 sm:$0xff]   ;;  %v8405_v51 = vld [vmem:[%s9916_s28 + $0x370] ss:$20 sps:$4 sm:$0xff]   ;;  %s6856_s23 = sshll.u32 %s9546_s18, 4  ;;  %s6857_s23 = int_to_ptr.vmem [resolvable:$true] %s6856_s23 }
 0x240   : > { %5370 = vmatprep.subr.bf16.mxu0 %v8319_v34  ;;  %5698 = vmatprep.subr.bf16.mxu1 %v8321_v52  ;;  %v8407_v46 = vld [vmem:[%s9916_s28 + $0x374] ss:$20 sps:$4 sm:$0xff]   ;;  %v8408_v34 = vld [vmem:[%s9916_s28 + $0x378] ss:$20 sps:$4 sm:$0xff]   ;;  %v8413_v52 = vld [vmem:[%s9916_s28 + $0x39c] ss:$20 sps:$4 sm:$0xff]   ;;  %p9433_p6 = scmp.lt.s32.totalorder %s6857_s23, %s6857_s23 }
 0x241   : > { %v10099_v48 = vld [vmem:[#allocation2 + $0x8] sm:$0xff]  ;;  %v8434_v0 = vld [vmem:[%s9916_s28 + $0x41c] ss:$20 sps:$4 sm:$0xff]   ;;  %s9426_s0 = scalar_lea.vmem %s6857_s23, 128 }
 0x242   : > { %v10103_v49 = vcombine.high %v10099_v48, %v10099_v48  ;;  %p9427_p2 = scmp.ne.s32.totalorder %s6857_s23, %s9426_s0  ;;  %p9434_p1 = scmp.lt.s32.totalorder %s9426_s0, %s9426_s0 }
 0x243   : > { %5371 = vmatpush1.bf16.msra.mxu0 %v8323_v53  ;;  %5699 = vmatpush1.bf16.msra.mxu1 %v8324_v56  ;;  %v8416_v53 = vld [vmem:[%s9916_s28 + $0x3a4] ss:$20 sps:$4 sm:$0xff]  }
 0x244   : > { %5372 = vmatprep.subr.bf16.mxu0 %v8325_v57  ;;  %5700 = vmatprep.subr.bf16.mxu1 %v8327_v58  ;;  %v8411_v56 = vld [vmem:[%s9916_s28 + $0x398] ss:$20 sps:$4 sm:$0xff]   ;;  %v8414_v57 = vld [vmem:[%s9916_s28 + $0x3a0] ss:$20 sps:$4 sm:$0xff]   ;;  %p9428_p10 = pnand %p9427_p2, %p8202_p9  ;;  %p9435_p12 = por %p9434_p1, %p9433_p6 }
 0x245   : > { %v8419_v58 = vld [vmem:[%s9916_s28 + $0x3c4] ss:$20 sps:$4 sm:$0xff]  }
 0x246   : > { %p9429_p7 = pneg %p9428_p10 }
 0x247   : > { %5373 = vmatpush1.bf16.msra.mxu0 %v8329_v36  ;;  %5701 = vmatpush1.bf16.msra.mxu1 %v8330_v37  ;;  %v8422_v36 = vld [vmem:[%s9916_s28 + $0x3cc] ss:$20 sps:$4 sm:$0xff]  }
 0x248   : > { %5374 = vmatprep.subr.bf16.mxu0 %v8331_v59  ;;  %5702 = vmatprep.subr.bf16.mxu1 %v8333_v60  ;;  %v8417_v37 = vld [vmem:[%s9916_s28 + $0x3c0] ss:$20 sps:$4 sm:$0xff]   ;;  %v8420_v59 = vld [vmem:[%s9916_s28 + $0x3c8] ss:$20 sps:$4 sm:$0xff]   ;;  %p9436_p3 = pnand %p9435_p12, %p9429_p7 }
 0x249   : > { %v8425_v60 = vld [vmem:[%s9916_s28 + $0x3ec] ss:$20 sps:$4 sm:$0xff]  }
 0x24b   : > { %5375 = vmatpush1.bf16.msra.mxu0 %v8335_v61  ;;  %5703 = vmatpush1.bf16.msra.mxu1 %v8336_v7  ;;  %v8428_v61 = vld [vmem:[%s9916_s28 + $0x3f4] ss:$20 sps:$4 sm:$0xff]  }
 0x24c   : > { %5376 = vmatprep.subr.bf16.mxu0 %v8337_v62  ;;  %5704 = vmatprep.subr.bf16.mxu1 %v8339_v63  ;;  %v8423_v7 = vld [vmem:[%s9916_s28 + $0x3e8] ss:$20 sps:$4 sm:$0xff]   ;;  %v8426_v62 = vld [vmem:[%s9916_s28 + $0x3f0] ss:$20 sps:$4 sm:$0xff]  }
 0x24d   : > { %v8431_v63 = vld [vmem:[%s9916_s28 + $0x414] ss:$20 sps:$4 sm:$0xff]  }
 0x24f   : > { %5377 = vmatpush1.bf16.msra.mxu0 %v8341_v1  ;;  %5705 = vmatpush1.bf16.msra.mxu1 %v8342_v3  ;;  %v8429_v1 = vld [vmem:[%s9916_s28 + $0x410] ss:$20 sps:$4 sm:$0xff]   ;;  %v8432_v3 = vld [vmem:[%s9916_s28 + $0x418] ss:$20 sps:$4 sm:$0xff]  }
 0x250   : > { %5378 = vmatprep.subr.bf16.mxu0 %v8343_v4  ;;  %5706 = vmatprep.subr.bf16.mxu1 %v8345_v5  ;;  %v8437_v4 = vld [vmem:[%s9916_s28 + $0x43c] ss:$20 sps:$4 sm:$0xff]   ;;  %v8440_v5 = vld [vmem:[%s9916_s28 + $0x444] ss:$20 sps:$4 sm:$0xff]  }
 0x253   : > { %5379 = vmatpush1.bf16.msra.mxu0 %v8347_v6  ;;  %5707 = vmatpush1.bf16.msra.mxu1 %v8348_v8  ;;  %v8435_v6 = vld [vmem:[%s9916_s28 + $0x438] ss:$20 sps:$4 sm:$0xff]   ;;  %v8438_v8 = vld [vmem:[%s9916_s28 + $0x440] ss:$20 sps:$4 sm:$0xff]  }
 0x254   : > { %5380 = vmatprep.subr.bf16.mxu0 %v8349_v9  ;;  %5708 = vmatprep.subr.bf16.mxu1 %v8351_v10  ;;  %v8443_v9 = vld [vmem:[%s9916_s28 + $0x464] ss:$20 sps:$4 sm:$0xff]   ;;  %v8446_v10 = vld [vmem:[%s9916_s28 + $0x46c] ss:$20 sps:$4 sm:$0xff]  }
 0x257   : > { %5381 = vmatpush1.bf16.msra.mxu0 %v8353_v11  ;;  %5709 = vmatpush1.bf16.msra.mxu1 %v8354_v12  ;;  %v8441_v11 = vld [vmem:[%s9916_s28 + $0x460] ss:$20 sps:$4 sm:$0xff]   ;;  %v8444_v12 = vld [vmem:[%s9916_s28 + $0x468] ss:$20 sps:$4 sm:$0xff]  }
 0x258   : > { %5382 = vmatprep.subr.bf16.mxu0 %v8355_v13  ;;  %5710 = vmatprep.subr.bf16.mxu1 %v8357_v14  ;;  %v8449_v13 = vld [vmem:[%s9916_s28 + $0x48c] ss:$20 sps:$4 sm:$0xff]   ;;  %v8452_v14 = vld [vmem:[%s9916_s28 + $0x494] ss:$20 sps:$4 sm:$0xff]  }
 0x25b   : > { %5383 = vmatpush1.bf16.msra.mxu0 %v8359_v50  ;;  %5711 = vmatpush1.bf16.msra.mxu1 %v8360_v15  ;;  %v8447_v50 = vld [vmem:[%s9916_s28 + $0x488] ss:$20 sps:$4 sm:$0xff]   ;;  %v8450_v15 = vld [vmem:[%s9916_s28 + $0x490] ss:$20 sps:$4 sm:$0xff]  }
 0x25c   : > { %5384 = vmatprep.subr.bf16.mxu0 %v8361_v16  ;;  %5712 = vmatprep.subr.bf16.mxu1 %v8363_v17  ;;  %v8455_v16 = vld [vmem:[%s9916_s28 + $0x4b4] ss:$20 sps:$4 sm:$0xff]   ;;  %v8458_v17 = vld [vmem:[%s9916_s28 + $0x4bc] ss:$20 sps:$4 sm:$0xff]  }
 0x25f   : > { %5385 = vmatpush1.bf16.msra.mxu0 %v8365_v54  ;;  %5713 = vmatpush1.bf16.msra.mxu1 %v8366_v55  ;;  %v8453_v54 = vld [vmem:[%s9916_s28 + $0x4b0] ss:$20 sps:$4 sm:$0xff]   ;;  %v8456_v55 = vld [vmem:[%s9916_s28 + $0x4b8] ss:$20 sps:$4 sm:$0xff]  }
 0x260   : > { %5395 = vmatprep.subr.bf16.mxu0 %v8370_v18  ;;  %5723 = vmatprep.subr.bf16.mxu1 %v8373_v19  ;;  %v8461_v18 = vld [vmem:[%s9916_s28 + $0x4dc] ss:$20 sps:$4 sm:$0xff]   ;;  %v8464_v19 = vld [vmem:[%s9916_s28 + $0x4e4] ss:$20 sps:$4 sm:$0xff]  }
 0x262   : > { %5387 = vmatmul.mubr.bf16.vlgmr.msra.gmra.mrb[0].mxu0 %v10072_v21  ;;  %5715 = vmatmul.mubr.bf16.vlgmr.msra.gmra.mrb[0].mxu1 %v10072_v21 }
 0x263   : > { %5396 = vmatpush1.bf16.msra.mxu0 %v8368_v20  ;;  %5724 = vmatpush1.bf16.msra.mxu1 %v8371_v22  ;;  %v8459_v20 = vld [vmem:[%s9916_s28 + $0x4d8] ss:$20 sps:$4 sm:$0xff]   ;;  %v8462_v22 = vld [vmem:[%s9916_s28 + $0x4e0] ss:$20 sps:$4 sm:$0xff]  }
 0x264   : > { %5397 = vmatprep.subr.bf16.mxu0 %v8377_v23  ;;  %5725 = vmatprep.subr.bf16.mxu1 %v8380_v24  ;;  %v8469_v23 = vld [vmem:[%s9916_s28 + $0x504] ss:$20 sps:$4 sm:$0xff]   ;;  %v8472_v24 = vld [vmem:[%s9916_s28 + $0x50c] ss:$20 sps:$4 sm:$0xff]  }
 0x265   : > { %5427 = vmatprep.mubr.bf16.mxu0 %v10103_v49  ;;  %5755 = vmatprep.mubr.bf16.mxu1 %v10103_v49 }
 0x267   : > { %5398 = vmatpush1.bf16.msra.mxu0 %v8375_v25  ;;  %5726 = vmatpush1.bf16.msra.mxu1 %v8378_v27  ;;  %v10149_v25 = vcombine.low %v10099_v48, %v10099_v48  ;;  %v8467_v27 = vld [vmem:[%s9916_s28 + $0x500] ss:$20 sps:$4 sm:$0xff]   ;;  %v8494_v48 = vld [vmem:[%s9916_s28 + $0x5a8] ss:$20 sps:$4 sm:$0xff]  }
 0x268   : > { %5399 = vmatprep.subr.bf16.mxu0 %v8383_v28  ;;  %5727 = vmatprep.subr.bf16.mxu1 %v8386_v29  ;;  %v8470_v28 = vld [vmem:[%s9916_s28 + $0x508] ss:$20 sps:$4 sm:$0xff]   ;;  %v8475_v29 = vld [vmem:[%s9916_s28 + $0x52c] ss:$20 sps:$4 sm:$0xff]  }
 0x26b   : > { %5400 = vmatpush1.bf16.msra.mxu0 %v8381_v30  ;;  %5728 = vmatpush1.bf16.msra.mxu1 %v8384_v31  ;;  %v10154_v30 = vld [vmem:[#allocation2 + $0x10] sm:$0xff]  ;;  %v8478_v31 = vld [vmem:[%s9916_s28 + $0x534] ss:$20 sps:$4 sm:$0xff]  }
 0x26c   : > { %5401 = vmatprep.subr.bf16.mxu0 %v8389_v32  ;;  %5729 = vmatprep.subr.bf16.mxu1 %v8392_v33  ;;  %v10159_v32 = vcombine.high %v10154_v30, %v10154_v30  ;;  %v8473_v33 = vld [vmem:[%s9916_s28 + $0x528] ss:$20 sps:$4 sm:$0xff]  }
 0x26f   : > { %5402 = vmatpush1.bf16.msra.mxu0 %v8387_v35  ;;  %5730 = vmatpush1.bf16.msra.mxu1 %v8390_v38  ;;  %v8476_v35 = vld [vmem:[%s9916_s28 + $0x530] ss:$20 sps:$4 sm:$0xff]   ;;  %v8481_v38 = vld [vmem:[%s9916_s28 + $0x554] ss:$20 sps:$4 sm:$0xff]  }
 0x270   : > { %5403 = vmatprep.subr.bf16.mxu0 %v8395_v39  ;;  %5731 = vmatprep.subr.bf16.mxu1 %v8398_v40  ;;  %v8484_v39 = vld [vmem:[%s9916_s28 + $0x55c] ss:$20 sps:$4 sm:$0xff]  }
 0x271   : > { %v8479_v40 = vld [vmem:[%s9916_s28 + $0x550] ss:$20 sps:$4 sm:$0xff]  }
 0x273   : > { %5404 = vmatpush1.bf16.msra.mxu0 %v8393_v26  ;;  %5732 = vmatpush1.bf16.msra.mxu1 %v8396_v41  ;;  %v8482_v26 = vld [vmem:[%s9916_s28 + $0x558] ss:$20 sps:$4 sm:$0xff]   ;;  %v8487_v41 = vld [vmem:[%s9916_s28 + $0x57c] ss:$20 sps:$4 sm:$0xff]  }
 0x274   : > { %5405 = vmatprep.subr.bf16.mxu0 %v8401_v42  ;;  %5733 = vmatprep.subr.bf16.mxu1 %v8404_v43  ;;  %v8490_v42 = vld [vmem:[%s9916_s28 + $0x584] ss:$20 sps:$4 sm:$0xff]  }
 0x275   : > { %v8485_v43 = vld [vmem:[%s9916_s28 + $0x578] ss:$20 sps:$4 sm:$0xff]  }
 0x277   : > { %5406 = vmatpush1.bf16.msra.mxu0 %v8399_v44  ;;  %5734 = vmatpush1.bf16.msra.mxu1 %v8402_v45  ;;  %v8488_v44 = vld [vmem:[%s9916_s28 + $0x580] ss:$20 sps:$4 sm:$0xff]   ;;  %v8493_v45 = vld [vmem:[%s9916_s28 + $0x5a4] ss:$20 sps:$4 sm:$0xff]  }
 0x278   : > { %5407 = vmatprep.subr.bf16.mxu0 %v8407_v46  ;;  %5735 = vmatprep.subr.bf16.mxu1 %v8410_v47  ;;  %v8496_v46 = vld [vmem:[%s9916_s28 + $0x5ac] ss:$20 sps:$4 sm:$0xff]  }
 0x279   : > { %v8491_v47 = vld [vmem:[%s9916_s28 + $0x5a0] ss:$20 sps:$4 sm:$0xff]  }
 0x27b   : > { %5408 = vmatpush1.bf16.msra.mxu0 %v8405_v51  ;;  %5736 = vmatpush1.bf16.msra.mxu1 %v8408_v34  ;;  %v8499_v51 = vld [vmem:[%s9916_s28 + $0x5cc] ss:$20 sps:$4 sm:$0xff]   ;;  %v8502_v34 = vld [vmem:[%s9916_s28 + $0x5d4] ss:$20 sps:$4 sm:$0xff]  }
 0x27c   : > { %5409 = vmatprep.subr.bf16.mxu0 %v8413_v52  ;;  %5737 = vmatprep.subr.bf16.mxu1 %v8416_v53  ;;  %v8497_v52 = vld [vmem:[%s9916_s28 + $0x5c8] ss:$20 sps:$4 sm:$0xff]   ;;  %v8500_v53 = vld [vmem:[%s9916_s28 + $0x5d0] ss:$20 sps:$4 sm:$0xff]  }
 0x27f   : > { %5410 = vmatpush1.bf16.msra.mxu0 %v8411_v56  ;;  %5738 = vmatpush1.bf16.msra.mxu1 %v8414_v57  ;;  %v8505_v56 = vld [vmem:[%s9916_s28 + $0x5f4] ss:$20 sps:$4 sm:$0xff]   ;;  %v8508_v57 = vld [vmem:[%s9916_s28 + $0x5fc] ss:$20 sps:$4 sm:$0xff]  }
 0x280   : > { %5411 = vmatprep.subr.bf16.mxu0 %v8419_v58  ;;  %5739 = vmatprep.subr.bf16.mxu1 %v8422_v36  ;;  %v8503_v58 = vld [vmem:[%s9916_s28 + $0x5f0] ss:$20 sps:$4 sm:$0xff]   ;;  %v8506_v36 = vld [vmem:[%s9916_s28 + $0x5f8] ss:$20 sps:$4 sm:$0xff]  }
 0x283   : > { %5412 = vmatpush1.bf16.msra.mxu0 %v8417_v37  ;;  %5740 = vmatpush1.bf16.msra.mxu1 %v8420_v59  ;;  %v8511_v37 = vld [vmem:[%s9916_s28 + $0x61c] ss:$20 sps:$4 sm:$0xff]   ;;  %v8514_v59 = vld [vmem:[%s9916_s28 + $0x624] ss:$20 sps:$4 sm:$0xff]  }
 0x284   : > { %5413 = vmatprep.subr.bf16.mxu0 %v8425_v60  ;;  %5741 = vmatprep.subr.bf16.mxu1 %v8428_v61  ;;  %v8509_v60 = vld [vmem:[%s9916_s28 + $0x618] ss:$20 sps:$4 sm:$0xff]   ;;  %v8512_v61 = vld [vmem:[%s9916_s28 + $0x620] ss:$20 sps:$4 sm:$0xff]  }
 0x287   : > { %5414 = vmatpush1.bf16.msra.mxu0 %v8423_v7  ;;  %5742 = vmatpush1.bf16.msra.mxu1 %v8426_v62  ;;  %v8517_v7 = vld [vmem:[%s9916_s28 + $0x644] ss:$20 sps:$4 sm:$0xff]   ;;  %v8520_v62 = vld [vmem:[%s9916_s28 + $0x64c] ss:$20 sps:$4 sm:$0xff]  }
 0x288   : > { %5415 = vmatprep.subr.bf16.mxu0 %v8431_v63  ;;  %5743 = vmatprep.subr.bf16.mxu1 %v8434_v0  ;;  %v8515_v63 = vld [vmem:[%s9916_s28 + $0x640] ss:$20 sps:$4 sm:$0xff]   ;;  %v8518_v0 = vld [vmem:[%s9916_s28 + $0x648] ss:$20 sps:$4 sm:$0xff]  }
 0x28b   : > { %5416 = vmatpush1.bf16.msra.mxu0 %v8429_v1  ;;  %5744 = vmatpush1.bf16.msra.mxu1 %v8432_v3  ;;  %v8523_v1 = vld [vmem:[%s9916_s28 + $0x66c] ss:$20 sps:$4 sm:$0xff]   ;;  %v8526_v3 = vld [vmem:[%s9916_s28 + $0x674] ss:$20 sps:$4 sm:$0xff]  }
 0x28c   : > { %5417 = vmatprep.subr.bf16.mxu0 %v8437_v4  ;;  %5745 = vmatprep.subr.bf16.mxu1 %v8440_v5  ;;  %v8521_v4 = vld [vmem:[%s9916_s28 + $0x668] ss:$20 sps:$4 sm:$0xff]   ;;  %v8524_v5 = vld [vmem:[%s9916_s28 + $0x670] ss:$20 sps:$4 sm:$0xff]  }
 0x28f   : > { %5418 = vmatpush1.bf16.msra.mxu0 %v8435_v6  ;;  %5746 = vmatpush1.bf16.msra.mxu1 %v8438_v8  ;;  %v8529_v6 = vld [vmem:[%s9916_s28 + $0x694] ss:$20 sps:$4 sm:$0xff]   ;;  %v8532_v8 = vld [vmem:[%s9916_s28 + $0x69c] ss:$20 sps:$4 sm:$0xff]  }
 0x290   : > { %5419 = vmatprep.subr.bf16.mxu0 %v8443_v9  ;;  %5747 = vmatprep.subr.bf16.mxu1 %v8446_v10  ;;  %v8527_v9 = vld [vmem:[%s9916_s28 + $0x690] ss:$20 sps:$4 sm:$0xff]   ;;  %v8530_v10 = vld [vmem:[%s9916_s28 + $0x698] ss:$20 sps:$4 sm:$0xff]  }
 0x293   : > { %5420 = vmatpush1.bf16.msra.mxu0 %v8441_v11  ;;  %5748 = vmatpush1.bf16.msra.mxu1 %v8444_v12  ;;  %v8535_v11 = vld [vmem:[%s9916_s28 + $0x6bc] ss:$20 sps:$4 sm:$0xff]   ;;  %v8538_v12 = vld [vmem:[%s9916_s28 + $0x6c4] ss:$20 sps:$4 sm:$0xff]  }
 0x294   : > { %5421 = vmatprep.subr.bf16.mxu0 %v8449_v13  ;;  %5749 = vmatprep.subr.bf16.mxu1 %v8452_v14  ;;  %v8533_v13 = vld [vmem:[%s9916_s28 + $0x6b8] ss:$20 sps:$4 sm:$0xff]   ;;  %v8536_v14 = vld [vmem:[%s9916_s28 + $0x6c0] ss:$20 sps:$4 sm:$0xff]  }
 0x297   : > { %5422 = vmatpush1.bf16.msra.mxu0 %v8447_v50  ;;  %5750 = vmatpush1.bf16.msra.mxu1 %v8450_v15  ;;  %v8541_v50 = vld [vmem:[%s9916_s28 + $0x6e4] ss:$20 sps:$4 sm:$0xff]   ;;  %v8544_v15 = vld [vmem:[%s9916_s28 + $0x6ec] ss:$20 sps:$4 sm:$0xff]  }
 0x298   : > { %5423 = vmatprep.subr.bf16.mxu0 %v8455_v16  ;;  %5751 = vmatprep.subr.bf16.mxu1 %v8458_v17  ;;  %v8539_v16 = vld [vmem:[%s9916_s28 + $0x6e0] ss:$20 sps:$4 sm:$0xff]   ;;  %v8542_v17 = vld [vmem:[%s9916_s28 + $0x6e8] ss:$20 sps:$4 sm:$0xff]  }
 0x29b   : > { %5424 = vmatpush1.bf16.msra.mxu0 %v8453_v54  ;;  %5752 = vmatpush1.bf16.msra.mxu1 %v8456_v55  ;;  %v8547_v54 = vld [vmem:[%s9916_s28 + $0x70c] ss:$20 sps:$4 sm:$0xff]   ;;  %v8550_v55 = vld [vmem:[%s9916_s28 + $0x714] ss:$20 sps:$4 sm:$0xff]  }
 0x29c   : > { %5425 = vmatprep.subr.bf16.mxu0 %v8461_v18  ;;  %5753 = vmatprep.subr.bf16.mxu1 %v8464_v19  ;;  %v8545_v18 = vld [vmem:[%s9916_s28 + $0x708] ss:$20 sps:$4 sm:$0xff]   ;;  %v8548_v19 = vld [vmem:[%s9916_s28 + $0x710] ss:$20 sps:$4 sm:$0xff]  }
 0x29f   : > { %5426 = vmatpush1.bf16.msra.mxu0 %v8459_v20  ;;  %5754 = vmatpush1.bf16.msra.mxu1 %v8462_v22  ;;  %v8553_v20 = vld [vmem:[%s9916_s28 + $0x734] ss:$20 sps:$4 sm:$0xff]   ;;  %v8556_v22 = vld [vmem:[%s9916_s28 + $0x73c] ss:$20 sps:$4 sm:$0xff]  }
 0x2a0   : > { %5436 = vmatprep.subr.bf16.mxu0 %v8469_v23  ;;  %5764 = vmatprep.subr.bf16.mxu1 %v8472_v24  ;;  %v8551_v23 = vld [vmem:[%s9916_s28 + $0x730] ss:$20 sps:$4 sm:$0xff]   ;;  %v8554_v24 = vld [vmem:[%s9916_s28 + $0x738] ss:$20 sps:$4 sm:$0xff]  }
 0x2a2   : > { %5428 = vmatmul.mubr.bf16.vlgmr.msra.gmra.mrb[0].mxu0 %v10149_v25  ;;  %5756 = vmatmul.mubr.bf16.vlgmr.msra.gmra.mrb[0].mxu1 %v10149_v25 }
 0x2a3   : > { %5437 = vmatpush1.bf16.msra.mxu0 %v8467_v27  ;;  %5765 = vmatpush1.bf16.msra.mxu1 %v8470_v28  ;;  %v8559_v27 = vld [vmem:[%s9916_s28 + $0x75c] ss:$20 sps:$4 sm:$0xff]   ;;  %v8562_v28 = vld [vmem:[%s9916_s28 + $0x764] ss:$20 sps:$4 sm:$0xff]  }
 0x2a4   : > { %5438 = vmatprep.subr.bf16.mxu0 %v8475_v29  ;;  %5766 = vmatprep.subr.bf16.mxu1 %v8478_v31  ;;  %v8557_v29 = vld [vmem:[%s9916_s28 + $0x758] ss:$20 sps:$4 sm:$0xff]   ;;  %v8560_v31 = vld [vmem:[%s9916_s28 + $0x760] ss:$20 sps:$4 sm:$0xff]  }
 0x2a5   : > { %5468 = vmatprep.mubr.bf16.mxu0 %v10159_v32  ;;  %5796 = vmatprep.mubr.bf16.mxu1 %v10159_v32 }
 0x2a7   : > { %5439 = vmatpush1.bf16.msra.mxu0 %v8473_v33  ;;  %5767 = vmatpush1.bf16.msra.mxu1 %v8476_v35  ;;  %v8567_v33 = vld [vmem:[%s9916_s28 + $0x784] ss:$20 sps:$4 sm:$0xff]   ;;  %v8570_v35 = vld [vmem:[%s9916_s28 + $0x78c] ss:$20 sps:$4 sm:$0xff]  }
 0x2a8   : > { %5440 = vmatprep.subr.bf16.mxu0 %v8481_v38  ;;  %5768 = vmatprep.subr.bf16.mxu1 %v8484_v39  ;;  %v8565_v38 = vld [vmem:[%s9916_s28 + $0x780] ss:$20 sps:$4 sm:$0xff]   ;;  %v10228_v39 = vcombine.low %v10154_v30, %v10154_v30  ;;  %v8571_v30 = vld [vmem:[%s9916_s28 + $0x7a8] ss:$20 sps:$4 sm:$0xff]  }
 0x2ab   : > { %5441 = vmatpush1.bf16.msra.mxu0 %v8479_v40  ;;  %5769 = vmatpush1.bf16.msra.mxu1 %v8482_v26  ;;  %v8568_v40 = vld [vmem:[%s9916_s28 + $0x788] ss:$20 sps:$4 sm:$0xff]   ;;  %v10231_v26 = vld [vmem:[#allocation2 + $0x18] sm:$0xff] }
 0x2ac   : > { %5442 = vmatprep.subr.bf16.mxu0 %v8487_v41  ;;  %5770 = vmatprep.subr.bf16.mxu1 %v8490_v42  ;;  %v8573_v41 = vld [vmem:[%s9916_s28 + $0x7ac] ss:$20 sps:$4 sm:$0xff]   ;;  %v8576_v42 = vld [vmem:[%s9916_s28 + $0x7b4] ss:$20 sps:$4 sm:$0xff]  }
 0x2af   : > { %5443 = vmatpush1.bf16.msra.mxu0 %v8485_v43  ;;  %5771 = vmatpush1.bf16.msra.mxu1 %v8488_v44  ;;  %v10237_v43 = vcombine.high %v10231_v26, %v10231_v26  ;;  %v8574_v44 = vld [vmem:[%s9916_s28 + $0x7b0] ss:$20 sps:$4 sm:$0xff]  }
 0x2b0   : > { %5444 = vmatprep.subr.bf16.mxu0 %v8493_v45  ;;  %5772 = vmatprep.subr.bf16.mxu1 %v8496_v46  ;;  %v8579_v45 = vld [vmem:[%s9916_s28 + $0x7d4] ss:$20 sps:$4 sm:$0xff]   ;;  %v8582_v46 = vld [vmem:[%s9916_s28 + $0x7dc] ss:$20 sps:$4 sm:$0xff]  }
 0x2b3   : > { %5445 = vmatpush1.bf16.msra.mxu0 %v8491_v47  ;;  %5773 = vmatpush1.bf16.msra.mxu1 %v8494_v48  ;;  %v8577_v47 = vld [vmem:[%s9916_s28 + $0x7d0] ss:$20 sps:$4 sm:$0xff]   ;;  %v8580_v48 = vld [vmem:[%s9916_s28 + $0x7d8] ss:$20 sps:$4 sm:$0xff]  }
 0x2b4   : > { %5446 = vmatprep.subr.bf16.mxu0 %v8499_v51  ;;  %5774 = vmatprep.subr.bf16.mxu1 %v8502_v34  ;;  %v8585_v51 = vld [vmem:[%s9916_s28 + $0x7fc] ss:$20 sps:$4 sm:$0xff]   ;;  %v8588_v34 = vld [vmem:[%s9916_s28 + $0x804] ss:$20 sps:$4 sm:$0xff]  }
 0x2b7   : > { %5447 = vmatpush1.bf16.msra.mxu0 %v8497_v52  ;;  %5775 = vmatpush1.bf16.msra.mxu1 %v8500_v53  ;;  %v8583_v52 = vld [vmem:[%s9916_s28 + $0x7f8] ss:$20 sps:$4 sm:$0xff]   ;;  %v8586_v53 = vld [vmem:[%s9916_s28 + $0x800] ss:$20 sps:$4 sm:$0xff]  }
 0x2b8   : > { %5448 = vmatprep.subr.bf16.mxu0 %v8505_v56  ;;  %5776 = vmatprep.subr.bf16.mxu1 %v8508_v57  ;;  %v8591_v56 = vld [vmem:[%s9916_s28 + $0x824] ss:$20 sps:$4 sm:$0xff]   ;;  %v8594_v57 = vld [vmem:[%s9916_s28 + $0x82c] ss:$20 sps:$4 sm:$0xff]  }
 0x2bb   : > { %5449 = vmatpush1.bf16.msra.mxu0 %v8503_v58  ;;  %5777 = vmatpush1.bf16.msra.mxu1 %v8506_v36  ;;  %v8589_v58 = vld [vmem:[%s9916_s28 + $0x820] ss:$20 sps:$4 sm:$0xff]   ;;  %v8592_v36 = vld [vmem:[%s9916_s28 + $0x828] ss:$20 sps:$4 sm:$0xff]  }
 0x2bc   : > { %5450 = vmatprep.subr.bf16.mxu0 %v8511_v37  ;;  %5778 = vmatprep.subr.bf16.mxu1 %v8514_v59  ;;  %v8597_v37 = vld [vmem:[%s9916_s28 + $0x84c] ss:$20 sps:$4 sm:$0xff]   ;;  %v8600_v59 = vld [vmem:[%s9916_s28 + $0x854] ss:$20 sps:$4 sm:$0xff]  }
 0x2bf   : > { %5451 = vmatpush1.bf16.msra.mxu0 %v8509_v60  ;;  %5779 = vmatpush1.bf16.msra.mxu1 %v8512_v61  ;;  %v8595_v60 = vld [vmem:[%s9916_s28 + $0x848] ss:$20 sps:$4 sm:$0xff]   ;;  %v8598_v61 = vld [vmem:[%s9916_s28 + $0x850] ss:$20 sps:$4 sm:$0xff]  }
 0x2c0   : > { %5452 = vmatprep.subr.bf16.mxu0 %v8517_v7  ;;  %5780 = vmatprep.subr.bf16.mxu1 %v8520_v62  ;;  %v8603_v7 = vld [vmem:[%s9916_s28 + $0x874] ss:$20 sps:$4 sm:$0xff]   ;;  %v8606_v62 = vld [vmem:[%s9916_s28 + $0x87c] ss:$20 sps:$4 sm:$0xff]  }
 0x2c3   : > { %5453 = vmatpush1.bf16.msra.mxu0 %v8515_v63  ;;  %5781 = vmatpush1.bf16.msra.mxu1 %v8518_v0  ;;  %v8601_v63 = vld [vmem:[%s9916_s28 + $0x870] ss:$20 sps:$4 sm:$0xff]   ;;  %v8604_v0 = vld [vmem:[%s9916_s28 + $0x878] ss:$20 sps:$4 sm:$0xff]  }
 0x2c4   : > { %5454 = vmatprep.subr.bf16.mxu0 %v8523_v1  ;;  %5782 = vmatprep.subr.bf16.mxu1 %v8526_v3  ;;  %v8609_v1 = vld [vmem:[%s9916_s28 + $0x89c] ss:$20 sps:$4 sm:$0xff]   ;;  %v8612_v3 = vld [vmem:[%s9916_s28 + $0x8a4] ss:$20 sps:$4 sm:$0xff]  }
 0x2c7   : > { %5455 = vmatpush1.bf16.msra.mxu0 %v8521_v4  ;;  %5783 = vmatpush1.bf16.msra.mxu1 %v8524_v5  ;;  %v8607_v4 = vld [vmem:[%s9916_s28 + $0x898] ss:$20 sps:$4 sm:$0xff]   ;;  %v8610_v5 = vld [vmem:[%s9916_s28 + $0x8a0] ss:$20 sps:$4 sm:$0xff]  }
 0x2c8   : > { %5456 = vmatprep.subr.bf16.mxu0 %v8529_v6  ;;  %5784 = vmatprep.subr.bf16.mxu1 %v8532_v8  ;;  %v8615_v6 = vld [vmem:[%s9916_s28 + $0x8c4] ss:$20 sps:$4 sm:$0xff]   ;;  %v8618_v8 = vld [vmem:[%s9916_s28 + $0x8cc] ss:$20 sps:$4 sm:$0xff]  }
 0x2cb   : > { %5457 = vmatpush1.bf16.msra.mxu0 %v8527_v9  ;;  %5785 = vmatpush1.bf16.msra.mxu1 %v8530_v10  ;;  %v8613_v9 = vld [vmem:[%s9916_s28 + $0x8c0] ss:$20 sps:$4 sm:$0xff]   ;;  %v8616_v10 = vld [vmem:[%s9916_s28 + $0x8c8] ss:$20 sps:$4 sm:$0xff]  }
 0x2cc   : > { %5458 = vmatprep.subr.bf16.mxu0 %v8535_v11  ;;  %5786 = vmatprep.subr.bf16.mxu1 %v8538_v12  ;;  %v8621_v11 = vld [vmem:[%s9916_s28 + $0x8ec] ss:$20 sps:$4 sm:$0xff]   ;;  %v8624_v12 = vld [vmem:[%s9916_s28 + $0x8f4] ss:$20 sps:$4 sm:$0xff]  }
 0x2cf   : > { %5459 = vmatpush1.bf16.msra.mxu0 %v8533_v13  ;;  %5787 = vmatpush1.bf16.msra.mxu1 %v8536_v14  ;;  %v8619_v13 = vld [vmem:[%s9916_s28 + $0x8e8] ss:$20 sps:$4 sm:$0xff]   ;;  %v8622_v14 = vld [vmem:[%s9916_s28 + $0x8f0] ss:$20 sps:$4 sm:$0xff]  }
 0x2d0   : > { %5460 = vmatprep.subr.bf16.mxu0 %v8541_v50  ;;  %5788 = vmatprep.subr.bf16.mxu1 %v8544_v15  ;;  %v8627_v50 = vld [vmem:[%s9916_s28 + $0x914] ss:$20 sps:$4 sm:$0xff]   ;;  %v8630_v15 = vld [vmem:[%s9916_s28 + $0x91c] ss:$20 sps:$4 sm:$0xff]  }
 0x2d3   : > { %5461 = vmatpush1.bf16.msra.mxu0 %v8539_v16  ;;  %5789 = vmatpush1.bf16.msra.mxu1 %v8542_v17  ;;  %v8625_v16 = vld [vmem:[%s9916_s28 + $0x910] ss:$20 sps:$4 sm:$0xff]   ;;  %v8628_v17 = vld [vmem:[%s9916_s28 + $0x918] ss:$20 sps:$4 sm:$0xff]  }
 0x2d4   : > { %5462 = vmatprep.subr.bf16.mxu0 %v8547_v54  ;;  %5790 = vmatprep.subr.bf16.mxu1 %v8550_v55  ;;  %v8633_v54 = vld [vmem:[%s9916_s28 + $0x93c] ss:$20 sps:$4 sm:$0xff]   ;;  %v8636_v55 = vld [vmem:[%s9916_s28 + $0x944] ss:$20 sps:$4 sm:$0xff]  }
 0x2d7   : > { %5463 = vmatpush1.bf16.msra.mxu0 %v8545_v18  ;;  %5791 = vmatpush1.bf16.msra.mxu1 %v8548_v19  ;;  %v8631_v18 = vld [vmem:[%s9916_s28 + $0x938] ss:$20 sps:$4 sm:$0xff]   ;;  %v8634_v19 = vld [vmem:[%s9916_s28 + $0x940] ss:$20 sps:$4 sm:$0xff]  }
 0x2d8   : > { %5464 = vmatprep.subr.bf16.mxu0 %v8553_v20  ;;  %5792 = vmatprep.subr.bf16.mxu1 %v8556_v22  ;;  %v8639_v20 = vld [vmem:[%s9916_s28 + $0x964] ss:$20 sps:$4 sm:$0xff]   ;;  %v8642_v22 = vld [vmem:[%s9916_s28 + $0x96c] ss:$20 sps:$4 sm:$0xff]  }
 0x2db   : > { %5465 = vmatpush1.bf16.msra.mxu0 %v8551_v23  ;;  %5793 = vmatpush1.bf16.msra.mxu1 %v8554_v24  ;;  %v8637_v23 = vld [vmem:[%s9916_s28 + $0x960] ss:$20 sps:$4 sm:$0xff]   ;;  %v8640_v24 = vld [vmem:[%s9916_s28 + $0x968] ss:$20 sps:$4 sm:$0xff]  }
 0x2dc   : > { %5466 = vmatprep.subr.bf16.mxu0 %v8559_v27  ;;  %5794 = vmatprep.subr.bf16.mxu1 %v8562_v28  ;;  %v8645_v27 = vld [vmem:[%s9916_s28 + $0x98c] ss:$20 sps:$4 sm:$0xff]   ;;  %v8648_v28 = vld [vmem:[%s9916_s28 + $0x994] ss:$20 sps:$4 sm:$0xff]  }
 0x2df   : > { %5467 = vmatpush1.bf16.msra.mxu0 %v8557_v29  ;;  %5795 = vmatpush1.bf16.msra.mxu1 %v8560_v31  ;;  %v8643_v29 = vld [vmem:[%s9916_s28 + $0x988] ss:$20 sps:$4 sm:$0xff]   ;;  %v8646_v31 = vld [vmem:[%s9916_s28 + $0x990] ss:$20 sps:$4 sm:$0xff]  }
 0x2e0   : > { %5477 = vmatprep.subr.bf16.mxu0 %v8567_v33  ;;  %5805 = vmatprep.subr.bf16.mxu1 %v8570_v35  ;;  %v8651_v33 = vld [vmem:[%s9916_s28 + $0x9b4] ss:$20 sps:$4 sm:$0xff]   ;;  %v8654_v35 = vld [vmem:[%s9916_s28 + $0x9bc] ss:$20 sps:$4 sm:$0xff]  }
 0x2e2   : > { %5469 = vmatmul.mubr.bf16.vlgmr.msra.gmra.mrb[0].mxu0 %v10228_v39  ;;  %5797 = vmatmul.mubr.bf16.vlgmr.msra.gmra.mrb[0].mxu1 %v10228_v39 }
 0x2e3   : > { %5478 = vmatpush1.bf16.msra.mxu0 %v8565_v38  ;;  %5806 = vmatpush1.bf16.msra.mxu1 %v8568_v40  ;;  %v8649_v38 = vld [vmem:[%s9916_s28 + $0x9b0] ss:$20 sps:$4 sm:$0xff]   ;;  %v8652_v40 = vld [vmem:[%s9916_s28 + $0x9b8] ss:$20 sps:$4 sm:$0xff]  }
 0x2e4   : > { %5479 = vmatprep.subr.bf16.mxu0 %v8573_v41  ;;  %5807 = vmatprep.subr.bf16.mxu1 %v8576_v42  ;;  %v8657_v41 = vld [vmem:[%s9916_s28 + $0x9dc] ss:$20 sps:$4 sm:$0xff]   ;;  %v8660_v42 = vld [vmem:[%s9916_s28 + $0x9e4] ss:$20 sps:$4 sm:$0xff]  }
 0x2e5   : > { %5509 = vmatprep.mubr.bf16.mxu0 %v10237_v43  ;;  %5837 = vmatprep.mubr.bf16.mxu1 %v10237_v43 }
 0x2e7   : > { %5480 = vmatpush1.bf16.msra.mxu0 %v8571_v30  ;;  %5808 = vmatpush1.bf16.msra.mxu1 %v8574_v44  ;;  %v8655_v30 = vld [vmem:[%s9916_s28 + $0x9d8] ss:$20 sps:$4 sm:$0xff]   ;;  %v8658_v44 = vld [vmem:[%s9916_s28 + $0x9e0] ss:$20 sps:$4 sm:$0xff]  }
 0x2e8   : > { %5481 = vmatprep.subr.bf16.mxu0 %v8579_v45  ;;  %5809 = vmatprep.subr.bf16.mxu1 %v8582_v46  ;;  %v8665_v45 = vld [vmem:[%s9916_s28 + $0xa04] ss:$20 sps:$4 sm:$0xff]   ;;  %v8668_v46 = vld [vmem:[%s9916_s28 + $0xa0c] ss:$20 sps:$4 sm:$0xff]  }
 0x2eb   : > { %5482 = vmatpush1.bf16.msra.mxu0 %v8577_v47  ;;  %5810 = vmatpush1.bf16.msra.mxu1 %v8580_v48  ;;  %v8663_v47 = vld [vmem:[%s9916_s28 + $0xa00] ss:$20 sps:$4 sm:$0xff]   ;;  %v10306_v48 = vcombine.low %v10231_v26, %v10231_v26  ;;  %v8669_v26 = vld [vmem:[%s9916_s28 + $0xa28] ss:$20 sps:$4 sm:$0xff]  }
 0x2ec   : > { %5483 = vmatprep.subr.bf16.mxu0 %v8585_v51  ;;  %5811 = vmatprep.subr.bf16.mxu1 %v8588_v34  ;;  %v10308_v51 = vld [vmem:[#allocation2 + $0x20] sm:$0xff] }
 0x2ed   : > { %v8666_v34 = vld [vmem:[%s9916_s28 + $0xa08] ss:$20 sps:$4 sm:$0xff]  }
 0x2ef   : > { %5484 = vmatpush1.bf16.msra.mxu0 %v8583_v52  ;;  %5812 = vmatpush1.bf16.msra.mxu1 %v8586_v53  ;;  %v8671_v52 = vld [vmem:[%s9916_s28 + $0xa2c] ss:$20 sps:$4 sm:$0xff]   ;;  %v8674_v53 = vld [vmem:[%s9916_s28 + $0xa34] ss:$20 sps:$4 sm:$0xff]  }
 0x2f0   : > { %5485 = vmatprep.subr.bf16.mxu0 %v8591_v56  ;;  %5813 = vmatprep.subr.bf16.mxu1 %v8594_v57  ;;  %v10315_v56 = vcombine.high %v10308_v51, %v10308_v51  ;;  %v8672_v57 = vld [vmem:[%s9916_s28 + $0xa30] ss:$20 sps:$4 sm:$0xff]  }
 0x2f3   : > { %5486 = vmatpush1.bf16.msra.mxu0 %v8589_v58  ;;  %5814 = vmatpush1.bf16.msra.mxu1 %v8592_v36  ;;  %v8677_v58 = vld [vmem:[%s9916_s28 + $0xa54] ss:$20 sps:$4 sm:$0xff]   ;;  %v8680_v36 = vld [vmem:[%s9916_s28 + $0xa5c] ss:$20 sps:$4 sm:$0xff]  }
 0x2f4   : > { %5487 = vmatprep.subr.bf16.mxu0 %v8597_v37  ;;  %5815 = vmatprep.subr.bf16.mxu1 %v8600_v59  ;;  %v8675_v37 = vld [vmem:[%s9916_s28 + $0xa50] ss:$20 sps:$4 sm:$0xff]   ;;  %v8678_v59 = vld [vmem:[%s9916_s28 + $0xa58] ss:$20 sps:$4 sm:$0xff]  }
 0x2f7   : > { %5488 = vmatpush1.bf16.msra.mxu0 %v8595_v60  ;;  %5816 = vmatpush1.bf16.msra.mxu1 %v8598_v61  ;;  %v8683_v60 = vld [vmem:[%s9916_s28 + $0xa7c] ss:$20 sps:$4 sm:$0xff]   ;;  %v8686_v61 = vld [vmem:[%s9916_s28 + $0xa84] ss:$20 sps:$4 sm:$0xff]  }
 0x2f8   : > { %5489 = vmatprep.subr.bf16.mxu0 %v8603_v7  ;;  %5817 = vmatprep.subr.bf16.mxu1 %v8606_v62  ;;  %v8681_v7 = vld [vmem:[%s9916_s28 + $0xa78] ss:$20 sps:$4 sm:$0xff]   ;;  %v8684_v62 = vld [vmem:[%s9916_s28 + $0xa80] ss:$20 sps:$4 sm:$0xff]  }
 0x2fb   : > { %5490 = vmatpush1.bf16.msra.mxu0 %v8601_v63  ;;  %5818 = vmatpush1.bf16.msra.mxu1 %v8604_v0  ;;  %v8689_v63 = vld [vmem:[%s9916_s28 + $0xaa4] ss:$20 sps:$4 sm:$0xff]   ;;  %v8692_v0 = vld [vmem:[%s9916_s28 + $0xaac] ss:$20 sps:$4 sm:$0xff]  }
 0x2fc   : > { %5491 = vmatprep.subr.bf16.mxu0 %v8609_v1  ;;  %5819 = vmatprep.subr.bf16.mxu1 %v8612_v3  ;;  %v8687_v1 = vld [vmem:[%s9916_s28 + $0xaa0] ss:$20 sps:$4 sm:$0xff]   ;;  %v8690_v3 = vld [vmem:[%s9916_s28 + $0xaa8] ss:$20 sps:$4 sm:$0xff]  }
 0x2ff   : > { %5492 = vmatpush1.bf16.msra.mxu0 %v8607_v4  ;;  %5820 = vmatpush1.bf16.msra.mxu1 %v8610_v5  ;;  %v8695_v4 = vld [vmem:[%s9916_s28 + $0xacc] ss:$20 sps:$4 sm:$0xff]   ;;  %v8698_v5 = vld [vmem:[%s9916_s28 + $0xad4] ss:$20 sps:$4 sm:$0xff]  }
 0x300   : > { %5493 = vmatprep.subr.bf16.mxu0 %v8615_v6  ;;  %5821 = vmatprep.subr.bf16.mxu1 %v8618_v8  ;;  %v8693_v6 = vld [vmem:[%s9916_s28 + $0xac8] ss:$20 sps:$4 sm:$0xff]   ;;  %v8696_v8 = vld [vmem:[%s9916_s28 + $0xad0] ss:$20 sps:$4 sm:$0xff]  }
 0x303   : > { %5494 = vmatpush1.bf16.msra.mxu0 %v8613_v9  ;;  %5822 = vmatpush1.bf16.msra.mxu1 %v8616_v10  ;;  %v8701_v9 = vld [vmem:[%s9916_s28 + $0xaf4] ss:$20 sps:$4 sm:$0xff]   ;;  %v8704_v10 = vld [vmem:[%s9916_s28 + $0xafc] ss:$20 sps:$4 sm:$0xff]  }
 0x304   : > { %5495 = vmatprep.subr.bf16.mxu0 %v8621_v11  ;;  %5823 = vmatprep.subr.bf16.mxu1 %v8624_v12  ;;  %v8699_v11 = vld [vmem:[%s9916_s28 + $0xaf0] ss:$20 sps:$4 sm:$0xff]   ;;  %v8702_v12 = vld [vmem:[%s9916_s28 + $0xaf8] ss:$20 sps:$4 sm:$0xff]  }
 0x307   : > { %5496 = vmatpush1.bf16.msra.mxu0 %v8619_v13  ;;  %5824 = vmatpush1.bf16.msra.mxu1 %v8622_v14  ;;  %v8707_v13 = vld [vmem:[%s9916_s28 + $0xb1c] ss:$20 sps:$4 sm:$0xff]   ;;  %v8710_v14 = vld [vmem:[%s9916_s28 + $0xb24] ss:$20 sps:$4 sm:$0xff]  }
 0x308   : > { %5497 = vmatprep.subr.bf16.mxu0 %v8627_v50  ;;  %5825 = vmatprep.subr.bf16.mxu1 %v8630_v15  ;;  %v8705_v50 = vld [vmem:[%s9916_s28 + $0xb18] ss:$20 sps:$4 sm:$0xff]   ;;  %v8708_v15 = vld [vmem:[%s9916_s28 + $0xb20] ss:$20 sps:$4 sm:$0xff]  }
 0x30b   : > { %5498 = vmatpush1.bf16.msra.mxu0 %v8625_v16  ;;  %5826 = vmatpush1.bf16.msra.mxu1 %v8628_v17  ;;  %v8713_v16 = vld [vmem:[%s9916_s28 + $0xb44] ss:$20 sps:$4 sm:$0xff]   ;;  %v8716_v17 = vld [vmem:[%s9916_s28 + $0xb4c] ss:$20 sps:$4 sm:$0xff]  }
 0x30c   : > { %5499 = vmatprep.subr.bf16.mxu0 %v8633_v54  ;;  %5827 = vmatprep.subr.bf16.mxu1 %v8636_v55  ;;  %v8711_v54 = vld [vmem:[%s9916_s28 + $0xb40] ss:$20 sps:$4 sm:$0xff]   ;;  %v8714_v55 = vld [vmem:[%s9916_s28 + $0xb48] ss:$20 sps:$4 sm:$0xff]  }
 0x30f   : > { %5500 = vmatpush1.bf16.msra.mxu0 %v8631_v18  ;;  %5828 = vmatpush1.bf16.msra.mxu1 %v8634_v19  ;;  %v8719_v18 = vld [vmem:[%s9916_s28 + $0xb6c] ss:$20 sps:$4 sm:$0xff]   ;;  %v8722_v19 = vld [vmem:[%s9916_s28 + $0xb74] ss:$20 sps:$4 sm:$0xff]  }
 0x310   : > { %5501 = vmatprep.subr.bf16.mxu0 %v8639_v20  ;;  %5829 = vmatprep.subr.bf16.mxu1 %v8642_v22  ;;  %v8717_v20 = vld [vmem:[%s9916_s28 + $0xb68] ss:$20 sps:$4 sm:$0xff]   ;;  %v8720_v22 = vld [vmem:[%s9916_s28 + $0xb70] ss:$20 sps:$4 sm:$0xff]  }
 0x313   : > { %5502 = vmatpush1.bf16.msra.mxu0 %v8637_v23  ;;  %5830 = vmatpush1.bf16.msra.mxu1 %v8640_v24  ;;  %v8725_v23 = vld [vmem:[%s9916_s28 + $0xb94] ss:$20 sps:$4 sm:$0xff]   ;;  %v8728_v24 = vld [vmem:[%s9916_s28 + $0xb9c] ss:$20 sps:$4 sm:$0xff]  }
 0x314   : > { %5503 = vmatprep.subr.bf16.mxu0 %v8645_v27  ;;  %5831 = vmatprep.subr.bf16.mxu1 %v8648_v28  ;;  %v8723_v27 = vld [vmem:[%s9916_s28 + $0xb90] ss:$20 sps:$4 sm:$0xff]   ;;  %v8726_v28 = vld [vmem:[%s9916_s28 + $0xb98] ss:$20 sps:$4 sm:$0xff]  }
 0x317   : > { %5504 = vmatpush1.bf16.msra.mxu0 %v8643_v29  ;;  %5832 = vmatpush1.bf16.msra.mxu1 %v8646_v31  ;;  %v8731_v29 = vld [vmem:[%s9916_s28 + $0xbbc] ss:$20 sps:$4 sm:$0xff]   ;;  %v8734_v31 = vld [vmem:[%s9916_s28 + $0xbc4] ss:$20 sps:$4 sm:$0xff]  }
 0x318   : > { %5505 = vmatprep.subr.bf16.mxu0 %v8651_v33  ;;  %5833 = vmatprep.subr.bf16.mxu1 %v8654_v35  ;;  %v8729_v33 = vld [vmem:[%s9916_s28 + $0xbb8] ss:$20 sps:$4 sm:$0xff]   ;;  %v8732_v35 = vld [vmem:[%s9916_s28 + $0xbc0] ss:$20 sps:$4 sm:$0xff]  }
 0x31b   : > { %5506 = vmatpush1.bf16.msra.mxu0 %v8649_v38  ;;  %5834 = vmatpush1.bf16.msra.mxu1 %v8652_v40  ;;  %v8737_v38 = vld [vmem:[%s9916_s28 + $0xbe4] ss:$20 sps:$4 sm:$0xff]   ;;  %v8740_v40 = vld [vmem:[%s9916_s28 + $0xbec] ss:$20 sps:$4 sm:$0xff]  }
 0x31c   : > { %5507 = vmatprep.subr.bf16.mxu0 %v8657_v41  ;;  %5835 = vmatprep.subr.bf16.mxu1 %v8660_v42  ;;  %v8735_v41 = vld [vmem:[%s9916_s28 + $0xbe0] ss:$20 sps:$4 sm:$0xff]   ;;  %v8738_v42 = vld [vmem:[%s9916_s28 + $0xbe8] ss:$20 sps:$4 sm:$0xff]  }
 0x31f   : > { %5508 = vmatpush1.bf16.msra.mxu0 %v8655_v30  ;;  %5836 = vmatpush1.bf16.msra.mxu1 %v8658_v44  ;;  %v8743_v30 = vld [vmem:[%s9916_s28 + $0xc0c] ss:$20 sps:$4 sm:$0xff]   ;;  %v8746_v44 = vld [vmem:[%s9916_s28 + $0xc14] ss:$20 sps:$4 sm:$0xff]  }
 0x320   : > { %5518 = vmatprep.subr.bf16.mxu0 %v8665_v45  ;;  %5846 = vmatprep.subr.bf16.mxu1 %v8668_v46  ;;  %v8741_v45 = vld [vmem:[%s9916_s28 + $0xc08] ss:$20 sps:$4 sm:$0xff]   ;;  %v8744_v46 = vld [vmem:[%s9916_s28 + $0xc10] ss:$20 sps:$4 sm:$0xff]  }
 0x322   : > { %5510 = vmatmul.mubr.bf16.vlgmr.msra.gmra.mrb[0].mxu0 %v10306_v48  ;;  %5838 = vmatmul.mubr.bf16.vlgmr.msra.gmra.mrb[0].mxu1 %v10306_v48 }
 0x323   : > { %5519 = vmatpush1.bf16.msra.mxu0 %v8663_v47  ;;  %5847 = vmatpush1.bf16.msra.mxu1 %v8666_v34  ;;  %v8749_v47 = vld [vmem:[%s9916_s28 + $0xc34] ss:$20 sps:$4 sm:$0xff]   ;;  %v8752_v34 = vld [vmem:[%s9916_s28 + $0xc3c] ss:$20 sps:$4 sm:$0xff]  }
 0x324   : > { %5520 = vmatprep.subr.bf16.mxu0 %v8671_v52  ;;  %5848 = vmatprep.subr.bf16.mxu1 %v8674_v53  ;;  %v8747_v52 = vld [vmem:[%s9916_s28 + $0xc30] ss:$20 sps:$4 sm:$0xff]   ;;  %v8750_v53 = vld [vmem:[%s9916_s28 + $0xc38] ss:$20 sps:$4 sm:$0xff]  }
 0x325   : > { %5550 = vmatprep.mubr.bf16.mxu0 %v10315_v56  ;;  %5878 = vmatprep.mubr.bf16.mxu1 %v10315_v56 }
 0x327   : > { %5521 = vmatpush1.bf16.msra.mxu0 %v8669_v26  ;;  %5849 = vmatpush1.bf16.msra.mxu1 %v8672_v57  ;;  %v8755_v26 = vld [vmem:[%s9916_s28 + $0xc5c] ss:$20 sps:$4 sm:$0xff]   ;;  %v8758_v57 = vld [vmem:[%s9916_s28 + $0xc64] ss:$20 sps:$4 sm:$0xff]  }
 0x328   : > { %5522 = vmatprep.subr.bf16.mxu0 %v8677_v58  ;;  %5850 = vmatprep.subr.bf16.mxu1 %v8680_v36  ;;  %v8753_v58 = vld [vmem:[%s9916_s28 + $0xc58] ss:$20 sps:$4 sm:$0xff]   ;;  %v8756_v36 = vld [vmem:[%s9916_s28 + $0xc60] ss:$20 sps:$4 sm:$0xff]  }
 0x32b   : > { %5523 = vmatpush1.bf16.msra.mxu0 %v8675_v37  ;;  %5851 = vmatpush1.bf16.msra.mxu1 %v8678_v59  ;;  %v8763_v37 = vld [vmem:[%s9916_s28 + $0xc84] ss:$20 sps:$4 sm:$0xff]   ;;  %v8766_v59 = vld [vmem:[%s9916_s28 + $0xc8c] ss:$20 sps:$4 sm:$0xff]  }
 0x32c   : > { %5524 = vmatprep.subr.bf16.mxu0 %v8683_v60  ;;  %5852 = vmatprep.subr.bf16.mxu1 %v8686_v61  ;;  %v10381_v60 = vld [vmem:[#allocation2 + $0x28] sm:$0xff]  ;;  %v10385_v61 = vcombine.low %v10308_v51, %v10308_v51 }
 0x32d   : > { %v8767_v51 = vld [vmem:[%s9916_s28 + $0xca8] ss:$20 sps:$4 sm:$0xff]  }
 0x32f   : > { %5525 = vmatpush1.bf16.msra.mxu0 %v8681_v7  ;;  %5853 = vmatpush1.bf16.msra.mxu1 %v8684_v62  ;;  %v8761_v7 = vld [vmem:[%s9916_s28 + $0xc80] ss:$20 sps:$4 sm:$0xff]   ;;  %v8764_v62 = vld [vmem:[%s9916_s28 + $0xc88] ss:$20 sps:$4 sm:$0xff]  }
 0x330   : > { %5526 = vmatprep.subr.bf16.mxu0 %v8689_v63  ;;  %5854 = vmatprep.subr.bf16.mxu1 %v8692_v0  ;;  %v8769_v63 = vld [vmem:[%s9916_s28 + $0xcac] ss:$20 sps:$4 sm:$0xff]   ;;  %v8772_v0 = vld [vmem:[%s9916_s28 + $0xcb4] ss:$20 sps:$4 sm:$0xff]  }
 0x333   : > { %5527 = vmatpush1.bf16.msra.mxu0 %v8687_v1  ;;  %5855 = vmatpush1.bf16.msra.mxu1 %v8690_v3  ;;  %v10393_v1 = vcombine.high %v10381_v60, %v10381_v60  ;;  %v8770_v3 = vld [vmem:[%s9916_s28 + $0xcb0] ss:$20 sps:$4 sm:$0xff]  }
 0x334   : > { %5528 = vmatprep.subr.bf16.mxu0 %v8695_v4  ;;  %5856 = vmatprep.subr.bf16.mxu1 %v8698_v5  ;;  %v8775_v4 = vld [vmem:[%s9916_s28 + $0xcd4] ss:$20 sps:$4 sm:$0xff]   ;;  %v8778_v5 = vld [vmem:[%s9916_s28 + $0xcdc] ss:$20 sps:$4 sm:$0xff]  }
 0x337   : > { %5529 = vmatpush1.bf16.msra.mxu0 %v8693_v6  ;;  %5857 = vmatpush1.bf16.msra.mxu1 %v8696_v8  ;;  %v8773_v6 = vld [vmem:[%s9916_s28 + $0xcd0] ss:$20 sps:$4 sm:$0xff]   ;;  %v8776_v8 = vld [vmem:[%s9916_s28 + $0xcd8] ss:$20 sps:$4 sm:$0xff]  }
 0x338   : > { %5530 = vmatprep.subr.bf16.mxu0 %v8701_v9  ;;  %5858 = vmatprep.subr.bf16.mxu1 %v8704_v10  ;;  %v8781_v9 = vld [vmem:[%s9916_s28 + $0xcfc] ss:$20 sps:$4 sm:$0xff]   ;;  %v8784_v10 = vld [vmem:[%s9916_s28 + $0xd04] ss:$20 sps:$4 sm:$0xff]  }
 0x33b   : > { %5531 = vmatpush1.bf16.msra.mxu0 %v8699_v11  ;;  %5859 = vmatpush1.bf16.msra.mxu1 %v8702_v12  ;;  %v8779_v11 = vld [vmem:[%s9916_s28 + $0xcf8] ss:$20 sps:$4 sm:$0xff]   ;;  %v8782_v12 = vld [vmem:[%s9916_s28 + $0xd00] ss:$20 sps:$4 sm:$0xff]  }
 0x33c   : > { %5532 = vmatprep.subr.bf16.mxu0 %v8707_v13  ;;  %5860 = vmatprep.subr.bf16.mxu1 %v8710_v14  ;;  %v8787_v13 = vld [vmem:[%s9916_s28 + $0xd24] ss:$20 sps:$4 sm:$0xff]   ;;  %v8790_v14 = vld [vmem:[%s9916_s28 + $0xd2c] ss:$20 sps:$4 sm:$0xff]  }
 0x33f   : > { %5533 = vmatpush1.bf16.msra.mxu0 %v8705_v50  ;;  %5861 = vmatpush1.bf16.msra.mxu1 %v8708_v15  ;;  %v8785_v50 = vld [vmem:[%s9916_s28 + $0xd20] ss:$20 sps:$4 sm:$0xff]   ;;  %v8788_v15 = vld [vmem:[%s9916_s28 + $0xd28] ss:$20 sps:$4 sm:$0xff]  }
 0x340   : > { %5534 = vmatprep.subr.bf16.mxu0 %v8713_v16  ;;  %5862 = vmatprep.subr.bf16.mxu1 %v8716_v17  ;;  %v8793_v16 = vld [vmem:[%s9916_s28 + $0xd4c] ss:$20 sps:$4 sm:$0xff]   ;;  %v8796_v17 = vld [vmem:[%s9916_s28 + $0xd54] ss:$20 sps:$4 sm:$0xff]  }
 0x343   : > { %5535 = vmatpush1.bf16.msra.mxu0 %v8711_v54  ;;  %5863 = vmatpush1.bf16.msra.mxu1 %v8714_v55  ;;  %v8791_v54 = vld [vmem:[%s9916_s28 + $0xd48] ss:$20 sps:$4 sm:$0xff]   ;;  %v8794_v55 = vld [vmem:[%s9916_s28 + $0xd50] ss:$20 sps:$4 sm:$0xff]  }
 0x344   : > { %5536 = vmatprep.subr.bf16.mxu0 %v8719_v18  ;;  %5864 = vmatprep.subr.bf16.mxu1 %v8722_v19  ;;  %v8799_v18 = vld [vmem:[%s9916_s28 + $0xd74] ss:$20 sps:$4 sm:$0xff]   ;;  %v8802_v19 = vld [vmem:[%s9916_s28 + $0xd7c] ss:$20 sps:$4 sm:$0xff]  }
 0x347   : > { %5537 = vmatpush1.bf16.msra.mxu0 %v8717_v20  ;;  %5865 = vmatpush1.bf16.msra.mxu1 %v8720_v22  ;;  %v8797_v20 = vld [vmem:[%s9916_s28 + $0xd70] ss:$20 sps:$4 sm:$0xff]   ;;  %v8800_v22 = vld [vmem:[%s9916_s28 + $0xd78] ss:$20 sps:$4 sm:$0xff]  }
 0x348   : > { %5538 = vmatprep.subr.bf16.mxu0 %v8725_v23  ;;  %5866 = vmatprep.subr.bf16.mxu1 %v8728_v24  ;;  %v8805_v23 = vld [vmem:[%s9916_s28 + $0xd9c] ss:$20 sps:$4 sm:$0xff]   ;;  %v8808_v24 = vld [vmem:[%s9916_s28 + $0xda4] ss:$20 sps:$4 sm:$0xff]  }
 0x34b   : > { %5539 = vmatpush1.bf16.msra.mxu0 %v8723_v27  ;;  %5867 = vmatpush1.bf16.msra.mxu1 %v8726_v28  ;;  %v8803_v27 = vld [vmem:[%s9916_s28 + $0xd98] ss:$20 sps:$4 sm:$0xff]   ;;  %v8806_v28 = vld [vmem:[%s9916_s28 + $0xda0] ss:$20 sps:$4 sm:$0xff]  }
 0x34c   : > { %5540 = vmatprep.subr.bf16.mxu0 %v8731_v29  ;;  %5868 = vmatprep.subr.bf16.mxu1 %v8734_v31  ;;  %v8811_v29 = vld [vmem:[%s9916_s28 + $0xdc4] ss:$20 sps:$4 sm:$0xff]   ;;  %v8814_v31 = vld [vmem:[%s9916_s28 + $0xdcc] ss:$20 sps:$4 sm:$0xff]  }
 0x34f   : > { %5541 = vmatpush1.bf16.msra.mxu0 %v8729_v33  ;;  %5869 = vmatpush1.bf16.msra.mxu1 %v8732_v35  ;;  %v8809_v33 = vld [vmem:[%s9916_s28 + $0xdc0] ss:$20 sps:$4 sm:$0xff]   ;;  %v8812_v35 = vld [vmem:[%s9916_s28 + $0xdc8] ss:$20 sps:$4 sm:$0xff]  }
 0x350   : > { %5542 = vmatprep.subr.bf16.mxu0 %v8737_v38  ;;  %5870 = vmatprep.subr.bf16.mxu1 %v8740_v40  ;;  %v8817_v38 = vld [vmem:[%s9916_s28 + $0xdec] ss:$20 sps:$4 sm:$0xff]   ;;  %v8820_v40 = vld [vmem:[%s9916_s28 + $0xdf4] ss:$20 sps:$4 sm:$0xff]  }
 0x353   : > { %5543 = vmatpush1.bf16.msra.mxu0 %v8735_v41  ;;  %5871 = vmatpush1.bf16.msra.mxu1 %v8738_v42  ;;  %v8815_v41 = vld [vmem:[%s9916_s28 + $0xde8] ss:$20 sps:$4 sm:$0xff]   ;;  %v8818_v42 = vld [vmem:[%s9916_s28 + $0xdf0] ss:$20 sps:$4 sm:$0xff]  }
 0x354   : > { %5544 = vmatprep.subr.bf16.mxu0 %v8743_v30  ;;  %5872 = vmatprep.subr.bf16.mxu1 %v8746_v44  ;;  %v8823_v30 = vld [vmem:[%s9916_s28 + $0xe14] ss:$20 sps:$4 sm:$0xff]   ;;  %v8826_v44 = vld [vmem:[%s9916_s28 + $0xe1c] ss:$20 sps:$4 sm:$0xff]  }
 0x357   : > { %5545 = vmatpush1.bf16.msra.mxu0 %v8741_v45  ;;  %5873 = vmatpush1.bf16.msra.mxu1 %v8744_v46  ;;  %v8821_v45 = vld [vmem:[%s9916_s28 + $0xe10] ss:$20 sps:$4 sm:$0xff]   ;;  %v8824_v46 = vld [vmem:[%s9916_s28 + $0xe18] ss:$20 sps:$4 sm:$0xff]  }
 0x358   : > { %5546 = vmatprep.subr.bf16.mxu0 %v8749_v47  ;;  %5874 = vmatprep.subr.bf16.mxu1 %v8752_v34  ;;  %v8829_v47 = vld [vmem:[%s9916_s28 + $0xe3c] ss:$20 sps:$4 sm:$0xff]   ;;  %v8832_v34 = vld [vmem:[%s9916_s28 + $0xe44] ss:$20 sps:$4 sm:$0xff]  }
 0x35b   : > { %5547 = vmatpush1.bf16.msra.mxu0 %v8747_v52  ;;  %5875 = vmatpush1.bf16.msra.mxu1 %v8750_v53  ;;  %v8827_v52 = vld [vmem:[%s9916_s28 + $0xe38] ss:$20 sps:$4 sm:$0xff]   ;;  %v8830_v53 = vld [vmem:[%s9916_s28 + $0xe40] ss:$20 sps:$4 sm:$0xff]  }
 0x35c   : > { %5548 = vmatprep.subr.bf16.mxu0 %v8755_v26  ;;  %5876 = vmatprep.subr.bf16.mxu1 %v8758_v57  ;;  %v8835_v26 = vld [vmem:[%s9916_s28 + $0xe64] ss:$20 sps:$4 sm:$0xff]   ;;  %v8838_v57 = vld [vmem:[%s9916_s28 + $0xe6c] ss:$20 sps:$4 sm:$0xff]  }
 0x35f   : > { %5549 = vmatpush1.bf16.msra.mxu0 %v8753_v58  ;;  %5877 = vmatpush1.bf16.msra.mxu1 %v8756_v36  ;;  %v8833_v58 = vld [vmem:[%s9916_s28 + $0xe60] ss:$20 sps:$4 sm:$0xff]   ;;  %v8836_v36 = vld [vmem:[%s9916_s28 + $0xe68] ss:$20 sps:$4 sm:$0xff]  }
 0x360   : > { %5559 = vmatprep.subr.bf16.mxu0 %v8763_v37  ;;  %5887 = vmatprep.subr.bf16.mxu1 %v8766_v59  ;;  %v8841_v37 = vld [vmem:[%s9916_s28 + $0xe8c] ss:$20 sps:$4 sm:$0xff]   ;;  %v8844_v59 = vld [vmem:[%s9916_s28 + $0xe94] ss:$20 sps:$4 sm:$0xff]  }
 0x362   : > { %5551 = vmatmul.mubr.bf16.vlgmr.msra.gmra.mrb[0].mxu0 %v10385_v61  ;;  %5879 = vmatmul.mubr.bf16.vlgmr.msra.gmra.mrb[0].mxu1 %v10385_v61 }
 0x363   : > { %5560 = vmatpush1.bf16.msra.mxu0 %v8761_v7  ;;  %5888 = vmatpush1.bf16.msra.mxu1 %v8764_v62  ;;  %v8839_v7 = vld [vmem:[%s9916_s28 + $0xe88] ss:$20 sps:$4 sm:$0xff]   ;;  %v8842_v62 = vld [vmem:[%s9916_s28 + $0xe90] ss:$20 sps:$4 sm:$0xff]  }
 0x364   : > { %5561 = vmatprep.subr.bf16.mxu0 %v8769_v63  ;;  %5889 = vmatprep.subr.bf16.mxu1 %v8772_v0  ;;  %v8847_v63 = vld [vmem:[%s9916_s28 + $0xeb4] ss:$20 sps:$4 sm:$0xff]   ;;  %v8850_v0 = vld [vmem:[%s9916_s28 + $0xebc] ss:$20 sps:$4 sm:$0xff]  }
 0x365   : > { %5591 = vmatprep.mubr.bf16.mxu0 %v10393_v1  ;;  %5919 = vmatprep.mubr.bf16.mxu1 %v10393_v1 }
 0x367   : > { %5562 = vmatpush1.bf16.msra.mxu0 %v8767_v51  ;;  %5890 = vmatpush1.bf16.msra.mxu1 %v8770_v3  ;;  %v8845_v51 = vld [vmem:[%s9916_s28 + $0xeb0] ss:$20 sps:$4 sm:$0xff]   ;;  %v8848_v3 = vld [vmem:[%s9916_s28 + $0xeb8] ss:$20 sps:$4 sm:$0xff]  }
 0x368   : > { %5563 = vmatprep.subr.bf16.mxu0 %v8775_v4  ;;  %5891 = vmatprep.subr.bf16.mxu1 %v8778_v5  ;;  %v8853_v4 = vld [vmem:[%s9916_s28 + $0xedc] ss:$20 sps:$4 sm:$0xff]   ;;  %v8856_v5 = vld [vmem:[%s9916_s28 + $0xee4] ss:$20 sps:$4 sm:$0xff]  }
 0x36b   : > { %5564 = vmatpush1.bf16.msra.mxu0 %v8773_v6  ;;  %5892 = vmatpush1.bf16.msra.mxu1 %v8776_v8  ;;  %v8851_v6 = vld [vmem:[%s9916_s28 + $0xed8] ss:$20 sps:$4 sm:$0xff]   ;;  %v8854_v8 = vld [vmem:[%s9916_s28 + $0xee0] ss:$20 sps:$4 sm:$0xff]  }
 0x36c   : > { %5565 = vmatprep.subr.bf16.mxu0 %v8781_v9  ;;  %5893 = vmatprep.subr.bf16.mxu1 %v8784_v10  ;;  %v8861_v9 = vld [vmem:[%s9916_s28 + $0xf04] ss:$20 sps:$4 sm:$0xff]   ;;  %v8864_v10 = vld [vmem:[%s9916_s28 + $0xf0c] ss:$20 sps:$4 sm:$0xff]  }
 0x36f   : > { %5566 = vmatpush1.bf16.msra.mxu0 %v8779_v11  ;;  %5894 = vmatpush1.bf16.msra.mxu1 %v8782_v12  ;;  %v8859_v11 = vld [vmem:[%s9916_s28 + $0xf00] ss:$20 sps:$4 sm:$0xff]   ;;  %v8862_v12 = vld [vmem:[%s9916_s28 + $0xf08] ss:$20 sps:$4 sm:$0xff]  }
 0x370   : > { %5567 = vmatprep.subr.bf16.mxu0 %v8787_v13  ;;  %5895 = vmatprep.subr.bf16.mxu1 %v8790_v14  ;;  %v10461_v13 = vld [vmem:[#allocation2 + $0x30] sm:$0xff]  ;;  %v10465_v14 = vcombine.low %v10381_v60, %v10381_v60  ;;  %v8865_v60 = vld [vmem:[%s9916_s28 + $0xf28] ss:$20 sps:$4 sm:$0xff]  }
 0x373   : > { %5568 = vmatpush1.bf16.msra.mxu0 %v8785_v50  ;;  %5896 = vmatpush1.bf16.msra.mxu1 %v8788_v15  ;;  %v8867_v50 = vld [vmem:[%s9916_s28 + $0xf2c] ss:$20 sps:$4 sm:$0xff]   ;;  %v8870_v15 = vld [vmem:[%s9916_s28 + $0xf34] ss:$20 sps:$4 sm:$0xff]  }
 0x374   : > { %5569 = vmatprep.subr.bf16.mxu0 %v8793_v16  ;;  %5897 = vmatprep.subr.bf16.mxu1 %v8796_v17  ;;  %v10471_v16 = vcombine.high %v10461_v13, %v10461_v13  ;;  %v8868_v17 = vld [vmem:[%s9916_s28 + $0xf30] ss:$20 sps:$4 sm:$0xff]  }
 0x377   : > { %5570 = vmatpush1.bf16.msra.mxu0 %v8791_v54  ;;  %5898 = vmatpush1.bf16.msra.mxu1 %v8794_v55  ;;  %v8873_v54 = vld [vmem:[%s9916_s28 + $0xf54] ss:$20 sps:$4 sm:$0xff]   ;;  %v8876_v55 = vld [vmem:[%s9916_s28 + $0xf5c] ss:$20 sps:$4 sm:$0xff]  }
 0x378   : > { %5571 = vmatprep.subr.bf16.mxu0 %v8799_v18  ;;  %5899 = vmatprep.subr.bf16.mxu1 %v8802_v19  ;;  %v8871_v18 = vld [vmem:[%s9916_s28 + $0xf50] ss:$20 sps:$4 sm:$0xff]   ;;  %v8874_v19 = vld [vmem:[%s9916_s28 + $0xf58] ss:$20 sps:$4 sm:$0xff]  }
 0x37b   : > { %5572 = vmatpush1.bf16.msra.mxu0 %v8797_v20  ;;  %5900 = vmatpush1.bf16.msra.mxu1 %v8800_v22  ;;  %v8879_v20 = vld [vmem:[%s9916_s28 + $0xf7c] ss:$20 sps:$4 sm:$0xff]   ;;  %v8882_v22 = vld [vmem:[%s9916_s28 + $0xf84] ss:$20 sps:$4 sm:$0xff]  }
 0x37c   : > { %5573 = vmatprep.subr.bf16.mxu0 %v8805_v23  ;;  %5901 = vmatprep.subr.bf16.mxu1 %v8808_v24  ;;  %v8877_v23 = vld [vmem:[%s9916_s28 + $0xf78] ss:$20 sps:$4 sm:$0xff]   ;;  %v8880_v24 = vld [vmem:[%s9916_s28 + $0xf80] ss:$20 sps:$4 sm:$0xff]  }
 0x37f   : > { %5574 = vmatpush1.bf16.msra.mxu0 %v8803_v27  ;;  %5902 = vmatpush1.bf16.msra.mxu1 %v8806_v28  ;;  %v8885_v27 = vld [vmem:[%s9916_s28 + $0xfa4] ss:$20 sps:$4 sm:$0xff]   ;;  %v8888_v28 = vld [vmem:[%s9916_s28 + $0xfac] ss:$20 sps:$4 sm:$0xff]  }
 0x380   : > { %5575 = vmatprep.subr.bf16.mxu0 %v8811_v29  ;;  %5903 = vmatprep.subr.bf16.mxu1 %v8814_v31  ;;  %v8883_v29 = vld [vmem:[%s9916_s28 + $0xfa0] ss:$20 sps:$4 sm:$0xff]   ;;  %v8886_v31 = vld [vmem:[%s9916_s28 + $0xfa8] ss:$20 sps:$4 sm:$0xff]  }
 0x383   : > { %5576 = vmatpush1.bf16.msra.mxu0 %v8809_v33  ;;  %5904 = vmatpush1.bf16.msra.mxu1 %v8812_v35  ;;  %v8891_v33 = vld [vmem:[%s9916_s28 + $0xfcc] ss:$20 sps:$4 sm:$0xff]   ;;  %v8894_v35 = vld [vmem:[%s9916_s28 + $0xfd4] ss:$20 sps:$4 sm:$0xff]  }
 0x384   : > { %5577 = vmatprep.subr.bf16.mxu0 %v8817_v38  ;;  %5905 = vmatprep.subr.bf16.mxu1 %v8820_v40  ;;  %v8889_v38 = vld [vmem:[%s9916_s28 + $0xfc8] ss:$20 sps:$4 sm:$0xff]   ;;  %v8892_v40 = vld [vmem:[%s9916_s28 + $0xfd0] ss:$20 sps:$4 sm:$0xff]  }
 0x387   : > { %5578 = vmatpush1.bf16.msra.mxu0 %v8815_v41  ;;  %5906 = vmatpush1.bf16.msra.mxu1 %v8818_v42  ;;  %v8897_v41 = vld [vmem:[%s9916_s28 + $0xff4] ss:$20 sps:$4 sm:$0xff]   ;;  %v8900_v42 = vld [vmem:[%s9916_s28 + $0xffc] ss:$20 sps:$4 sm:$0xff]  }
 0x388   : > { %5579 = vmatprep.subr.bf16.mxu0 %v8823_v30  ;;  %5907 = vmatprep.subr.bf16.mxu1 %v8826_v44  ;;  %v8895_v30 = vld [vmem:[%s9916_s28 + $0xff0] ss:$20 sps:$4 sm:$0xff]   ;;  %v8898_v44 = vld [vmem:[%s9916_s28 + $0xff8] ss:$20 sps:$4 sm:$0xff]  }
 0x38b   : > { %5580 = vmatpush1.bf16.msra.mxu0 %v8821_v45  ;;  %5908 = vmatpush1.bf16.msra.mxu1 %v8824_v46  ;;  %v8903_v45 = vld [vmem:[%s9916_s28 + $0x101c] ss:$20 sps:$4 sm:$0xff]   ;;  %v8906_v46 = vld [vmem:[%s9916_s28 + $0x1024] ss:$20 sps:$4 sm:$0xff]  }
 0x38c   : > { %5581 = vmatprep.subr.bf16.mxu0 %v8829_v47  ;;  %5909 = vmatprep.subr.bf16.mxu1 %v8832_v34  ;;  %v8901_v47 = vld [vmem:[%s9916_s28 + $0x1018] ss:$20 sps:$4 sm:$0xff]   ;;  %v8904_v34 = vld [vmem:[%s9916_s28 + $0x1020] ss:$20 sps:$4 sm:$0xff]  }
 0x38f   : > { %5582 = vmatpush1.bf16.msra.mxu0 %v8827_v52  ;;  %5910 = vmatpush1.bf16.msra.mxu1 %v8830_v53  ;;  %v8909_v52 = vld [vmem:[%s9916_s28 + $0x1044] ss:$20 sps:$4 sm:$0xff]   ;;  %v8912_v53 = vld [vmem:[%s9916_s28 + $0x104c] ss:$20 sps:$4 sm:$0xff]  }
 0x390   : > { %5583 = vmatprep.subr.bf16.mxu0 %v8835_v26  ;;  %5911 = vmatprep.subr.bf16.mxu1 %v8838_v57  ;;  %v8907_v26 = vld [vmem:[%s9916_s28 + $0x1040] ss:$20 sps:$4 sm:$0xff]   ;;  %v8910_v57 = vld [vmem:[%s9916_s28 + $0x1048] ss:$20 sps:$4 sm:$0xff]  }
 0x393   : > { %5584 = vmatpush1.bf16.msra.mxu0 %v8833_v58  ;;  %5912 = vmatpush1.bf16.msra.mxu1 %v8836_v36  ;;  %v8915_v58 = vld [vmem:[%s9916_s28 + $0x106c] ss:$20 sps:$4 sm:$0xff]   ;;  %v8918_v36 = vld [vmem:[%s9916_s28 + $0x1074] ss:$20 sps:$4 sm:$0xff]  }
 0x394   : > { %5585 = vmatprep.subr.bf16.mxu0 %v8841_v37  ;;  %5913 = vmatprep.subr.bf16.mxu1 %v8844_v59  ;;  %v8913_v37 = vld [vmem:[%s9916_s28 + $0x1068] ss:$20 sps:$4 sm:$0xff]   ;;  %v8916_v59 = vld [vmem:[%s9916_s28 + $0x1070] ss:$20 sps:$4 sm:$0xff]  }
 0x397   : > { %5586 = vmatpush1.bf16.msra.mxu0 %v8839_v7  ;;  %5914 = vmatpush1.bf16.msra.mxu1 %v8842_v62  ;;  %v8921_v7 = vld [vmem:[%s9916_s28 + $0x1094] ss:$20 sps:$4 sm:$0xff]   ;;  %v8924_v62 = vld [vmem:[%s9916_s28 + $0x109c] ss:$20 sps:$4 sm:$0xff]  }
 0x398   : > { %5587 = vmatprep.subr.bf16.mxu0 %v8847_v63  ;;  %5915 = vmatprep.subr.bf16.mxu1 %v8850_v0  ;;  %v8919_v63 = vld [vmem:[%s9916_s28 + $0x1090] ss:$20 sps:$4 sm:$0xff]   ;;  %v8922_v0 = vld [vmem:[%s9916_s28 + $0x1098] ss:$20 sps:$4 sm:$0xff]  }
 0x39b   : > { %5588 = vmatpush1.bf16.msra.mxu0 %v8845_v51  ;;  %5916 = vmatpush1.bf16.msra.mxu1 %v8848_v3  ;;  %v8927_v51 = vld [vmem:[%s9916_s28 + $0x10bc] ss:$20 sps:$4 sm:$0xff]   ;;  %v8930_v3 = vld [vmem:[%s9916_s28 + $0x10c4] ss:$20 sps:$4 sm:$0xff]  }
 0x39c   : > { %5589 = vmatprep.subr.bf16.mxu0 %v8853_v4  ;;  %5917 = vmatprep.subr.bf16.mxu1 %v8856_v5  ;;  %v8925_v4 = vld [vmem:[%s9916_s28 + $0x10b8] ss:$20 sps:$4 sm:$0xff]   ;;  %v8928_v5 = vld [vmem:[%s9916_s28 + $0x10c0] ss:$20 sps:$4 sm:$0xff]  }
 0x39f   : > { %5590 = vmatpush1.bf16.msra.mxu0 %v8851_v6  ;;  %5918 = vmatpush1.bf16.msra.mxu1 %v8854_v8  ;;  %v8933_v6 = vld [vmem:[%s9916_s28 + $0x10e4] ss:$20 sps:$4 sm:$0xff]   ;;  %v8936_v8 = vld [vmem:[%s9916_s28 + $0x10ec] ss:$20 sps:$4 sm:$0xff]  }
 0x3a0   : > { %5600 = vmatprep.subr.bf16.mxu0 %v8861_v9  ;;  %5928 = vmatprep.subr.bf16.mxu1 %v8864_v10  ;;  %v8931_v9 = vld [vmem:[%s9916_s28 + $0x10e0] ss:$20 sps:$4 sm:$0xff]   ;;  %v8934_v10 = vld [vmem:[%s9916_s28 + $0x10e8] ss:$20 sps:$4 sm:$0xff]  }
 0x3a2   : > { %5592 = vmatmul.mubr.bf16.vlgmr.msra.gmra.mrb[0].mxu0 %v10465_v14  ;;  %5920 = vmatmul.mubr.bf16.vlgmr.msra.gmra.mrb[0].mxu1 %v10465_v14 }
 0x3a3   : > { %5601 = vmatpush1.bf16.msra.mxu0 %v8859_v11  ;;  %5929 = vmatpush1.bf16.msra.mxu1 %v8862_v12  ;;  %v8939_v11 = vld [vmem:[%s9916_s28 + $0x110c] ss:$20 sps:$4 sm:$0xff]   ;;  %v8942_v12 = vld [vmem:[%s9916_s28 + $0x1114] ss:$20 sps:$4 sm:$0xff]  }
 0x3a4   : > { %5602 = vmatprep.subr.bf16.mxu0 %v8867_v50  ;;  %5930 = vmatprep.subr.bf16.mxu1 %v8870_v15  ;;  %v8937_v50 = vld [vmem:[%s9916_s28 + $0x1108] ss:$20 sps:$4 sm:$0xff]   ;;  %v8940_v15 = vld [vmem:[%s9916_s28 + $0x1110] ss:$20 sps:$4 sm:$0xff]  }
 0x3a5   : > { %5632 = vmatprep.mubr.bf16.mxu0 %v10471_v16  ;;  %5960 = vmatprep.mubr.bf16.mxu1 %v10471_v16 }
 0x3a7   : > { %5603 = vmatpush1.bf16.msra.mxu0 %v8865_v60  ;;  %5931 = vmatpush1.bf16.msra.mxu1 %v8868_v17  ;;  %v8945_v60 = vld [vmem:[%s9916_s28 + $0x1134] ss:$20 sps:$4 sm:$0xff]   ;;  %v8948_v17 = vld [vmem:[%s9916_s28 + $0x113c] ss:$20 sps:$4 sm:$0xff]  }
 0x3a8   : > { %5604 = vmatprep.subr.bf16.mxu0 %v8873_v54  ;;  %5932 = vmatprep.subr.bf16.mxu1 %v8876_v55  ;;  %v8943_v54 = vld [vmem:[%s9916_s28 + $0x1130] ss:$20 sps:$4 sm:$0xff]   ;;  %v8946_v55 = vld [vmem:[%s9916_s28 + $0x1138] ss:$20 sps:$4 sm:$0xff]  }
 0x3ab   : > { %5605 = vmatpush1.bf16.msra.mxu0 %v8871_v18  ;;  %5933 = vmatpush1.bf16.msra.mxu1 %v8874_v19  ;;  %v8951_v18 = vld [vmem:[%s9916_s28 + $0x115c] ss:$20 sps:$4 sm:$0xff]   ;;  %v8954_v19 = vld [vmem:[%s9916_s28 + $0x1164] ss:$20 sps:$4 sm:$0xff]  }
 0x3ac   : > { %5606 = vmatprep.subr.bf16.mxu0 %v8879_v20  ;;  %5934 = vmatprep.subr.bf16.mxu1 %v8882_v22  ;;  %v8949_v20 = vld [vmem:[%s9916_s28 + $0x1158] ss:$20 sps:$4 sm:$0xff]   ;;  %v8952_v22 = vld [vmem:[%s9916_s28 + $0x1160] ss:$20 sps:$4 sm:$0xff]  }
 0x3af   : > { %5607 = vmatpush1.bf16.msra.mxu0 %v8877_v23  ;;  %5935 = vmatpush1.bf16.msra.mxu1 %v8880_v24  ;;  %v8959_v23 = vld [vmem:[%s9916_s28 + $0x1184] ss:$20 sps:$4 sm:$0xff]   ;;  %v8962_v24 = vld [vmem:[%s9916_s28 + $0x118c] ss:$20 sps:$4 sm:$0xff]  }
 0x3b0   : > { %5608 = vmatprep.subr.bf16.mxu0 %v8885_v27  ;;  %5936 = vmatprep.subr.bf16.mxu1 %v8888_v28  ;;  %v8957_v27 = vld [vmem:[%s9916_s28 + $0x1180] ss:$20 sps:$4 sm:$0xff]   ;;  %v10540_v28 = vcombine.low %v10461_v13, %v10461_v13  ;;  %v8966_v13 = vld [vmem:[%s9916_s28 + $0x11b0] ss:$20 sps:$4 sm:$0xff]  }
 0x3b3   : > { %5609 = vmatpush1.bf16.msra.mxu0 %v8883_v29  ;;  %5937 = vmatpush1.bf16.msra.mxu1 %v8886_v31  ;;  %v8960_v29 = vld [vmem:[%s9916_s28 + $0x1188] ss:$20 sps:$4 sm:$0xff]   ;;  %v8965_v31 = vld [vmem:[%s9916_s28 + $0x11ac] ss:$20 sps:$4 sm:$0xff]  }
 0x3b4   : > { %5610 = vmatprep.subr.bf16.mxu0 %v8891_v33  ;;  %5938 = vmatprep.subr.bf16.mxu1 %v8894_v35  ;;  %v8968_v33 = vld [vmem:[%s9916_s28 + $0x11b4] ss:$20 sps:$4 sm:$0xff]  }
 0x3b5   : > { %v8963_v35 = vld [vmem:[%s9916_s28 + $0x11a8] ss:$20 sps:$4 sm:$0xff]  }
 0x3b7   : > { %5611 = vmatpush1.bf16.msra.mxu0 %v8889_v38  ;;  %5939 = vmatpush1.bf16.msra.mxu1 %v8892_v40  ;;  %v8971_v38 = vld [vmem:[%s9916_s28 + $0x11d4] ss:$20 sps:$4 sm:$0xff]   ;;  %v8974_v40 = vld [vmem:[%s9916_s28 + $0x11dc] ss:$20 sps:$4 sm:$0xff]  }
 0x3b8   : > { %5612 = vmatprep.subr.bf16.mxu0 %v8897_v41  ;;  %5940 = vmatprep.subr.bf16.mxu1 %v8900_v42  ;;  %v8969_v41 = vld [vmem:[%s9916_s28 + $0x11d0] ss:$20 sps:$4 sm:$0xff]   ;;  %v9543_v42 = vmov 0  }
 0x3bb   : > { %5613 = vmatpush1.bf16.msra.mxu0 %v8895_v30  ;;  %5941 = vmatpush1.bf16.msra.mxu1 %v8898_v44  ;;  %v8972_v30 = vld [vmem:[%s9916_s28 + $0x11d8] ss:$20 sps:$4 sm:$0xff]   ;;  %v8977_v44 = vld [vmem:[%s9916_s28 + $0x11fc] ss:$20 sps:$4 sm:$0xff]  }
 0x3bc   : > { %5614 = vmatprep.subr.bf16.mxu0 %v8903_v45  ;;  %5942 = vmatprep.subr.bf16.mxu1 %v8906_v46  ;;  %v8980_v45 = vld [vmem:[%s9916_s28 + $0x1204] ss:$20 sps:$4 sm:$0xff]  }
 0x3bd   : > { %v8975_v46 = vld [vmem:[%s9916_s28 + $0x11f8] ss:$20 sps:$4 sm:$0xff]  }
 0x3bf   : > { %5615 = vmatpush1.bf16.msra.mxu0 %v8901_v47  ;;  %5943 = vmatpush1.bf16.msra.mxu1 %v8904_v34  ;;  %v8978_v47 = vld [vmem:[%s9916_s28 + $0x1200] ss:$20 sps:$4 sm:$0xff]   ;;  %v8983_v34 = vld [vmem:[%s9916_s28 + $0x1224] ss:$20 sps:$4 sm:$0xff]  }
 0x3c0   : > { %5616 = vmatprep.subr.bf16.mxu0 %v8909_v52  ;;  %5944 = vmatprep.subr.bf16.mxu1 %v8912_v53  ;;  %v8986_v52 = vld [vmem:[%s9916_s28 + $0x122c] ss:$20 sps:$4 sm:$0xff]  }
 0x3c1   : > { %v8981_v53 = vld [vmem:[%s9916_s28 + $0x1220] ss:$20 sps:$4 sm:$0xff]  }
 0x3c3   : > { %5617 = vmatpush1.bf16.msra.mxu0 %v8907_v26  ;;  %5945 = vmatpush1.bf16.msra.mxu1 %v8910_v57  ;;  %v8984_v26 = vld [vmem:[%s9916_s28 + $0x1228] ss:$20 sps:$4 sm:$0xff]   ;;  %v8989_v57 = vld [vmem:[%s9916_s28 + $0x124c] ss:$20 sps:$4 sm:$0xff]  }
 0x3c4   : > { %5618 = vmatprep.subr.bf16.mxu0 %v8915_v58  ;;  %5946 = vmatprep.subr.bf16.mxu1 %v8918_v36  ;;  %v8992_v58 = vld [vmem:[%s9916_s28 + $0x1254] ss:$20 sps:$4 sm:$0xff]  }
 0x3c5   : > { %v8987_v36 = vld [vmem:[%s9916_s28 + $0x1248] ss:$20 sps:$4 sm:$0xff]  }
 0x3c7   : > { %5619 = vmatpush1.bf16.msra.mxu0 %v8913_v37  ;;  %5947 = vmatpush1.bf16.msra.mxu1 %v8916_v59  ;;  %v8990_v37 = vld [vmem:[%s9916_s28 + $0x1250] ss:$20 sps:$4 sm:$0xff]   ;;  %v8995_v59 = vld [vmem:[%s9916_s28 + $0x1274] ss:$20 sps:$4 sm:$0xff]  }
 0x3c8   : > { %5620 = vmatprep.subr.bf16.mxu0 %v8921_v7  ;;  %5948 = vmatprep.subr.bf16.mxu1 %v8924_v62  ;;  %v8998_v7 = vld [vmem:[%s9916_s28 + $0x127c] ss:$20 sps:$4 sm:$0xff]  }
 0x3c9   : > { %v8993_v62 = vld [vmem:[%s9916_s28 + $0x1270] ss:$20 sps:$4 sm:$0xff]  }
 0x3cb   : > { %5621 = vmatpush1.bf16.msra.mxu0 %v8919_v63  ;;  %5949 = vmatpush1.bf16.msra.mxu1 %v8922_v0  ;;  %v8996_v63 = vld [vmem:[%s9916_s28 + $0x1278] ss:$20 sps:$4 sm:$0xff]   ;;  %v9001_v0 = vld [vmem:[%s9916_s28 + $0x129c] ss:$20 sps:$4 sm:$0xff]  }
 0x3cc   : > { %5622 = vmatprep.subr.bf16.mxu0 %v8927_v51  ;;  %5950 = vmatprep.subr.bf16.mxu1 %v8930_v3  ;;  %v9004_v51 = vld [vmem:[%s9916_s28 + $0x12a4] ss:$20 sps:$4 sm:$0xff]  }
 0x3cd   : > { %v8999_v3 = vld [vmem:[%s9916_s28 + $0x1298] ss:$20 sps:$4 sm:$0xff]  }
 0x3cf   : > { %5623 = vmatpush1.bf16.msra.mxu0 %v8925_v4  ;;  %5951 = vmatpush1.bf16.msra.mxu1 %v8928_v5  ;;  %v9002_v4 = vld [vmem:[%s9916_s28 + $0x12a0] ss:$20 sps:$4 sm:$0xff]   ;;  %v9006_v5 = vld [vmem:[%s9916_s28 + $0x150] ss:$20 sps:$4 sm:$0xff]  }
 0x3d0   : > { %5624 = vmatprep.subr.bf16.mxu0 %v8933_v6  ;;  %5952 = vmatprep.subr.bf16.mxu1 %v8936_v8  ;;  %v9007_v6 = vld [vmem:[%s9916_s28 + $0x3d0] ss:$20 sps:$4 sm:$0xff]   ;;  %v10575_v8 = vld [vmem:[#allocation2 + $0x38] ss:$0 sps:$4 sm:$0xff]  }
 0x3d3   : > { %5625 = vmatpush1.bf16.msra.mxu0 %v8931_v9  ;;  %5953 = vmatpush1.bf16.msra.mxu1 %v8934_v10  ;;  %v9008_v9 = vld [vmem:[%s9916_s28 + $0x10] ss:$20 sps:$4 sm:$0xff]  }
 0x3d4   : > { %5626 = vmatprep.subr.bf16.mxu0 %v8939_v11  ;;  %5954 = vmatprep.subr.bf16.mxu1 %v8942_v12  ;;  %v9009_v10 = vld [vmem:[%s9916_s28 + $0x290] ss:$20 sps:$4 sm:$0xff]   ;;  %v9010_v11 = vld [vmem:[%s9916_s28 + $0x178] ss:$20 sps:$4 sm:$0xff]  }
 0x3d5   : > { %v9011_v12 = vld [vmem:[%s9916_s28 + $0x3f8] ss:$20 sps:$4 sm:$0xff]  }
 0x3d7   : > { %5627 = vmatpush1.bf16.msra.mxu0 %v8937_v50  ;;  %5955 = vmatpush1.bf16.msra.mxu1 %v8940_v15  ;;  %v9012_v50 = vld [vmem:[%s9916_s28 + $0x38] ss:$20 sps:$4 sm:$0xff]  }
 0x3d8   : > { %5628 = vmatprep.subr.bf16.mxu0 %v8945_v60  ;;  %5956 = vmatprep.subr.bf16.mxu1 %v8948_v17  ;;  %v9013_v15 = vld [vmem:[%s9916_s28 + $0x2b8] ss:$20 sps:$4 sm:$0xff]   ;;  %v9014_v60 = vld [vmem:[%s9916_s28 + $0x1a0] ss:$20 sps:$4 sm:$0xff]  }
 0x3d9   : > { %v9015_v17 = vld [vmem:[%s9916_s28 + $0x420] ss:$20 sps:$4 sm:$0xff]  }
 0x3db   : > { %5629 = vmatpush1.bf16.msra.mxu0 %v8943_v54  ;;  %5957 = vmatpush1.bf16.msra.mxu1 %v8946_v55  ;;  %v9016_v54 = vld [vmem:[%s9916_s28 + $0x60] ss:$20 sps:$4 sm:$0xff]  }
 0x3dc   : > { %5630 = vmatprep.subr.bf16.mxu0 %v8951_v18  ;;  %5958 = vmatprep.subr.bf16.mxu1 %v8954_v19  ;;  %v9017_v55 = vld [vmem:[%s9916_s28 + $0x2e0] ss:$20 sps:$4 sm:$0xff]   ;;  %v9018_v18 = vld [vmem:[%s9916_s28 + $0x1c8] ss:$20 sps:$4 sm:$0xff]  }
 0x3dd   : > { %v9019_v19 = vld [vmem:[%s9916_s28 + $0x448] ss:$20 sps:$4 sm:$0xff]  }
 0x3df   : > { %5631 = vmatpush1.bf16.msra.mxu0 %v8949_v20  ;;  %5959 = vmatpush1.bf16.msra.mxu1 %v8952_v22  ;;  %v9020_v20 = vld [vmem:[%s9916_s28 + $0x88] ss:$20 sps:$4 sm:$0xff]   ;;  %v9023_v22 = vld [vmem:[%s9916_s28 + $0x470] ss:$20 sps:$4 sm:$0xff]  }
 0x3e0   : > { %5641 = vmatprep.subr.bf16.mxu0 %v8959_v23  ;;  %5969 = vmatprep.subr.bf16.mxu1 %v8962_v24  ;;  %v9024_v23 = vld [vmem:[%s9916_s28 + $0xb0] ss:$20 sps:$4 sm:$0xff]  }
 0x3e1   : > { %v9025_v24 = vld [vmem:[%s9916_s28 + $0x330] ss:$20 sps:$4 sm:$0xff]  }
 0x3e2   : > { %5633 = vmatmul.mubr.bf16.vlgmr.msra.gmra.mrb[0].mxu0 %v10540_v28  ;;  %5961 = vmatmul.mubr.bf16.vlgmr.msra.gmra.mrb[0].mxu1 %v10540_v28 }
 0x3e3   : > { %5642 = vmatpush1.bf16.msra.mxu0 %v8957_v27  ;;  %5970 = vmatpush1.bf16.msra.mxu1 %v8960_v29  ;;  %v9026_v27 = vld [vmem:[%s9916_s28 + $0x218] ss:$20 sps:$4 sm:$0xff]  }
 0x3e4   : > { %5643 = vmatprep.subr.bf16.mxu0 %v8965_v31  ;;  %5971 = vmatprep.subr.bf16.mxu1 %v8968_v33  ;;  %v9027_v29 = vld [vmem:[%s9916_s28 + $0x498] ss:$20 sps:$4 sm:$0xff]  }
 0x3e5   : > { %5673 = vmatprep.mubr.bf16.mxu0 %v9543_v42  ;;  %6001 = vmatprep.mubr.bf16.mxu1 %v9543_v42  ;;  %v9028_v31 = vld [vmem:[%s9916_s28 + $0xd8] ss:$20 sps:$4 sm:$0xff]   ;;  %v9035_v42 = vld [vmem:[%s9916_s28 + $0x4e8] ss:$20 sps:$4 sm:$0xff]  }
 0x3e6   : > { %v9029_v33 = vld [vmem:[%s9916_s28 + $0x358] ss:$20 sps:$4 sm:$0xff]  }
 0x3e7   : > { %5644 = vmatpush1.bf16.msra.mxu0 %v8963_v35  ;;  %5972 = vmatpush1.bf16.msra.mxu1 %v8966_v13  ;;  %v9030_v35 = vld [vmem:[%s9916_s28 + $0x240] ss:$20 sps:$4 sm:$0xff]  }
 0x3e8   : > { %5645 = vmatprep.subr.bf16.mxu0 %v8971_v38  ;;  %5973 = vmatprep.subr.bf16.mxu1 %v8974_v40  ;;  %v9031_v13 = vld [vmem:[%s9916_s28 + $0x4c0] ss:$20 sps:$4 sm:$0xff]  }
 0x3e9   : > { %v9032_v38 = vld [vmem:[%s9916_s28 + $0x100] ss:$20 sps:$4 sm:$0xff]  }
 0x3ea   : > { %v9033_v40 = vld [vmem:[%s9916_s28 + $0x380] ss:$20 sps:$4 sm:$0xff]  }
 0x3eb   : > { %5646 = vmatpush1.bf16.msra.mxu0 %v8969_v41  ;;  %5974 = vmatpush1.bf16.msra.mxu1 %v8972_v30  ;;  %v9034_v41 = vld [vmem:[%s9916_s28 + $0x268] ss:$20 sps:$4 sm:$0xff]  }
 0x3ec   : > { %5647 = vmatprep.subr.bf16.mxu0 %v8977_v44  ;;  %5975 = vmatprep.subr.bf16.mxu1 %v8980_v45  ;;  %v9036_v30 = vld [vmem:[%s9916_s28 + $0x128] ss:$20 sps:$4 sm:$0xff]   ;;  %v9038_v45 = vld [vmem:[%s9916_s28 + $0x650] ss:$20 sps:$4 sm:$0xff]  }
 0x3ed   : > { %v9037_v44 = vld [vmem:[%s9916_s28 + $0x3a8] ss:$20 sps:$4 sm:$0xff]  }
 0x3ef   : > { %5648 = vmatpush1.bf16.msra.mxu0 %v8975_v46  ;;  %5976 = vmatpush1.bf16.msra.mxu1 %v8978_v47  ;;  %v9040_v46 = vld [vmem:[%s9916_s28 + $0x8d0] ss:$20 sps:$4 sm:$0xff]  }
 0x3f0   : > { %5649 = vmatprep.subr.bf16.mxu0 %v8983_v34  ;;  %5977 = vmatprep.subr.bf16.mxu1 %v8986_v52  ;;  %v9039_v47 = vld [vmem:[%s9916_s28 + $0x510] ss:$20 sps:$4 sm:$0xff]   ;;  %v9042_v52 = vld [vmem:[%s9916_s28 + $0x678] ss:$20 sps:$4 sm:$0xff]  }
 0x3f1   : > { %v9041_v34 = vld [vmem:[%s9916_s28 + $0x790] ss:$20 sps:$4 sm:$0xff]  }
 0x3f3   : > { %5650 = vmatpush1.bf16.msra.mxu0 %v8981_v53  ;;  %5978 = vmatpush1.bf16.msra.mxu1 %v8984_v26  ;;  %v9044_v53 = vld [vmem:[%s9916_s28 + $0x8f8] ss:$20 sps:$4 sm:$0xff]  }
 0x3f4   : > { %5651 = vmatprep.subr.bf16.mxu0 %v8989_v57  ;;  %5979 = vmatprep.subr.bf16.mxu1 %v8992_v58  ;;  %v9043_v26 = vld [vmem:[%s9916_s28 + $0x538] ss:$20 sps:$4 sm:$0xff]   ;;  %v9046_v58 = vld [vmem:[%s9916_s28 + $0x6a0] ss:$20 sps:$4 sm:$0xff]  }
 0x3f5   : > { %v9045_v57 = vld [vmem:[%s9916_s28 + $0x7b8] ss:$20 sps:$4 sm:$0xff]  }
 0x3f7   : > { %5652 = vmatpush1.bf16.msra.mxu0 %v8987_v36  ;;  %5980 = vmatpush1.bf16.msra.mxu1 %v8990_v37  ;;  %v9048_v36 = vld [vmem:[%s9916_s28 + $0x920] ss:$20 sps:$4 sm:$0xff]   ;;  %v9050_v37 = vld [vmem:[%s9916_s28 + $0x6c8] ss:$20 sps:$4 sm:$0xff]  }
 0x3f8   : > { %5653 = vmatprep.subr.bf16.mxu0 %v8995_v59  ;;  %5981 = vmatprep.subr.bf16.mxu1 %v8998_v7  ;;  %v9052_v59 = vld [vmem:[%s9916_s28 + $0x948] ss:$20 sps:$4 sm:$0xff]  }
 0x3f9   : > { %v9051_v7 = vld [vmem:[%s9916_s28 + $0x588] ss:$20 sps:$4 sm:$0xff]  }
 0x3fb   : > { %5654 = vmatpush1.bf16.msra.mxu0 %v8993_v62  ;;  %5982 = vmatpush1.bf16.msra.mxu1 %v8996_v63  ;;  %v9056_v62 = vld [vmem:[%s9916_s28 + $0x970] ss:$20 sps:$4 sm:$0xff]  }
 0x3fc   : > { %5655 = vmatprep.subr.bf16.mxu0 %v9001_v0  ;;  %5983 = vmatprep.subr.bf16.mxu1 %v9004_v51  ;;  %v9055_v63 = vld [vmem:[%s9916_s28 + $0x5b0] ss:$20 sps:$4 sm:$0xff]   ;;  %v9058_v51 = vld [vmem:[%s9916_s28 + $0x718] ss:$20 sps:$4 sm:$0xff]  }
 0x3fd   : > { %v9057_v0 = vld [vmem:[%s9916_s28 + $0x830] ss:$20 sps:$4 sm:$0xff]  }
 0x3ff   : > { %5656 = vmatpush1.bf16.msra.mxu0 %v8999_v3  ;;  %5984 = vmatpush1.bf16.msra.mxu1 %v9002_v4  ;;  %v9060_v3 = vld [vmem:[%s9916_s28 + $0x998] ss:$20 sps:$4 sm:$0xff]  }
 0x400   : > { %7738 = vmatprep.subr.bf16.mxu0 %v9006_v5  ;;  %7760 = vmatprep.subr.bf16.mxu1 %v9007_v6  ;;  %v9059_v4 = vld [vmem:[%s9916_s28 + $0x5d8] ss:$20 sps:$4 sm:$0xff]   ;;  %v9062_v6 = vld [vmem:[%s9916_s28 + $0x740] ss:$20 sps:$4 sm:$0xff]  }
 0x401   : > { %v9061_v5 = vld [vmem:[%s9916_s28 + $0x858] ss:$20 sps:$4 sm:$0xff]  }
 0x402   : > { %5674 = vmatmul.mubr.bf16.vlgmr.msra.gmra.mrb[0].mxu0 %v10575_v8  ;;  %6002 = vmatmul.mubr.bf16.vlgmr.msra.gmra.mrb[0].mxu1 %v10575_v8 }
 0x403   : > { %7739 = vmatpush3.bf16.msra.mxu0 %v9008_v9  ;;  %7761 = vmatpush3.bf16.msra.mxu1 %v9009_v10  ;;  %v9064_v9 = vld [vmem:[%s9916_s28 + $0x9c0] ss:$20 sps:$4 sm:$0xff]  }
 0x404   : > { %7740 = vmatprep.subr.bf16.mxu0 %v9010_v11  ;;  %7762 = vmatprep.subr.bf16.mxu1 %v9011_v12  ;;  %v9063_v10 = vld [vmem:[%s9916_s28 + $0x600] ss:$20 sps:$4 sm:$0xff]   ;;  %v9066_v12 = vld [vmem:[%s9916_s28 + $0x768] ss:$20 sps:$4 sm:$0xff]  }
 0x405   : > { %6042 = vmatprep.mubr.bf16.mxu0 %v10048_v2  ;;  %6082 = vmatprep.mubr.bf16.mxu1 %v10103_v49  ;;  %v9021_v2 = vld [vmem:[%s9916_s28 + $0x308] ss:$20 sps:$4 sm:$0xff]   ;;  %v9022_v49 = vld [vmem:[%s9916_s28 + $0x1f0] ss:$20 sps:$4 sm:$0xff]   ;;  %v9065_v11 = vld [vmem:[%s9916_s28 + $0x880] ss:$20 sps:$4 sm:$0xff]  }
 0x407   : > { %7741 = vmatpush3.bf16.msra.mxu0 %v9012_v50  ;;  %7763 = vmatpush3.bf16.msra.mxu1 %v9013_v15  ;;  %v9068_v50 = vld [vmem:[%s9916_s28 + $0x9e8] ss:$20 sps:$4 sm:$0xff]  }
 0x408   : > { %7742 = vmatprep.subr.bf16.mxu0 %v9014_v60  ;;  %7764 = vmatprep.subr.bf16.mxu1 %v9015_v17  ;;  %v9067_v15 = vld [vmem:[%s9916_s28 + $0x628] ss:$20 sps:$4 sm:$0xff]   ;;  %v9070_v17 = vld [vmem:[%s9916_s28 + $0xb50] ss:$20 sps:$4 sm:$0xff]  }
 0x409   : > { %v9069_v60 = vld [vmem:[%s9916_s28 + $0x8a8] ss:$20 sps:$4 sm:$0xff]  }
 0x40b   : > { %7743 = vmatpush3.bf16.msra.mxu0 %v9016_v54  ;;  %7765 = vmatpush3.bf16.msra.mxu1 %v9017_v55  ;;  %v9072_v54 = vld [vmem:[%s9916_s28 + $0xdd0] ss:$20 sps:$4 sm:$0xff]  }
 0x40c   : > { %7744 = vmatprep.subr.bf16.mxu0 %v9018_v18  ;;  %7766 = vmatprep.subr.bf16.mxu1 %v9019_v19  ;;  %v9071_v55 = vld [vmem:[%s9916_s28 + $0xa10] ss:$20 sps:$4 sm:$0xff]   ;;  %v9074_v19 = vld [vmem:[%s9916_s28 + $0xb78] ss:$20 sps:$4 sm:$0xff]  }
 0x40d   : > { %v9073_v18 = vld [vmem:[%s9916_s28 + $0xc90] ss:$20 sps:$4 sm:$0xff]  }
 0x40f   : > { %7745 = vmatpush3.bf16.msra.mxu0 %v9020_v20  ;;  %7767 = vmatpush3.bf16.msra.mxu1 %v9021_v2  ;;  %v9076_v20 = vld [vmem:[%s9916_s28 + $0xdf8] ss:$20 sps:$4 sm:$0xff]  }
 0x410   : > { %7746 = vmatprep.subr.bf16.mxu0 %v9022_v49  ;;  %7768 = vmatprep.subr.bf16.mxu1 %v9023_v22  ;;  %v9075_v2 = vld [vmem:[%s9916_s28 + $0xa38] ss:$20 sps:$4 sm:$0xff]   ;;  %v9078_v22 = vld [vmem:[%s9916_s28 + $0xba0] ss:$20 sps:$4 sm:$0xff]  }
 0x411   : > { %v9077_v49 = vld [vmem:[%s9916_s28 + $0xcb8] ss:$20 sps:$4 sm:$0xff]  }
 0x413   : > { %7747 = vmatpush3.bf16.msra.mxu0 %v9024_v23  ;;  %7769 = vmatpush3.bf16.msra.mxu1 %v9025_v24  ;;  %v9080_v23 = vld [vmem:[%s9916_s28 + $0xe20] ss:$20 sps:$4 sm:$0xff]   ;;  %v9082_v24 = vld [vmem:[%s9916_s28 + $0xbc8] ss:$20 sps:$4 sm:$0xff]  }
 0x414   : > { %7748 = vmatprep.subr.bf16.mxu0 %v9026_v27  ;;  %7770 = vmatprep.subr.bf16.mxu1 %v9027_v29  ;;  %v9084_v27 = vld [vmem:[%s9916_s28 + $0xe48] ss:$20 sps:$4 sm:$0xff]  }
 0x415   : > { %v9083_v29 = vld [vmem:[%s9916_s28 + $0xa88] ss:$20 sps:$4 sm:$0xff]  }
 0x417   : > { %7749 = vmatpush3.bf16.msra.mxu0 %v9028_v31  ;;  %7771 = vmatpush3.bf16.msra.mxu1 %v9029_v33  ;;  %v9088_v31 = vld [vmem:[%s9916_s28 + $0xe70] ss:$20 sps:$4 sm:$0xff]  }
 0x418   : > { %7750 = vmatprep.subr.bf16.mxu0 %v9030_v35  ;;  %7772 = vmatprep.subr.bf16.mxu1 %v9031_v13  ;;  %v9087_v33 = vld [vmem:[%s9916_s28 + $0xab0] ss:$20 sps:$4 sm:$0xff]   ;;  %v9090_v13 = vld [vmem:[%s9916_s28 + $0xc18] ss:$20 sps:$4 sm:$0xff]  }
 0x419   : > { %v9089_v35 = vld [vmem:[%s9916_s28 + $0xd30] ss:$20 sps:$4 sm:$0xff]  }
 0x41b   : > { %7751 = vmatpush3.bf16.msra.mxu0 %v9032_v38  ;;  %7773 = vmatpush3.bf16.msra.mxu1 %v9033_v40  ;;  %v9092_v38 = vld [vmem:[%s9916_s28 + $0xe98] ss:$20 sps:$4 sm:$0xff]  }
 0x41c   : > { %7752 = vmatprep.subr.bf16.mxu0 %v9034_v41  ;;  %7774 = vmatprep.subr.bf16.mxu1 %v9035_v42  ;;  %v9091_v40 = vld [vmem:[%s9916_s28 + $0xad8] ss:$20 sps:$4 sm:$0xff]   ;;  %v9094_v42 = vld [vmem:[%s9916_s28 + $0xc40] ss:$20 sps:$4 sm:$0xff]  }
 0x41d   : > { %v9093_v41 = vld [vmem:[%s9916_s28 + $0xd58] ss:$20 sps:$4 sm:$0xff]  }
 0x41f   : > { %7753 = vmatpush3.bf16.msra.mxu0 %v9036_v30  ;;  %7775 = vmatpush3.bf16.msra.mxu1 %v9037_v44  ;;  %v9096_v30 = vld [vmem:[%s9916_s28 + $0xec0] ss:$20 sps:$4 sm:$0xff]  }
 0x420   : > { %7782 = vmatprep.subr.bf16.mxu0 %v9038_v45  ;;  %7804 = vmatprep.subr.bf16.mxu1 %v9040_v46  ;;  %v9095_v44 = vld [vmem:[%s9916_s28 + $0xb00] ss:$20 sps:$4 sm:$0xff]   ;;  %v9098_v46 = vld [vmem:[%s9916_s28 + $0xc68] ss:$20 sps:$4 sm:$0xff]  }
 0x421   : > { %v9097_v45 = vld [vmem:[%s9916_s28 + $0xd80] ss:$20 sps:$4 sm:$0xff]  }
 0x422   : > { %6043 = vmatmul.mubr.bf16.vlgmr.msra.gmra.mrb[4].mxu0 %v10072_v21  ;;  %6083 = vmatmul.mubr.bf16.vlgmr.msra.gmra.mrb[4].mxu1 %v10149_v25  ;;  %v9047_v21 = vld [vmem:[%s9916_s28 + $0x560] ss:$20 sps:$4 sm:$0xff]  }
 0x423   : > { %7783 = vmatpush3.bf16.msra.mxu0 %v9039_v47  ;;  %7805 = vmatpush3.bf16.msra.mxu1 %v9041_v34  ;;  %v9049_v25 = vld [vmem:[%s9916_s28 + $0x7e0] ss:$20 sps:$4 sm:$0xff]   ;;  %v9100_v47 = vld [vmem:[%s9916_s28 + $0xee8] ss:$20 sps:$4 sm:$0xff]  }
 0x424   : > { %7784 = vmatprep.subr.bf16.mxu0 %v9042_v52  ;;  %7806 = vmatprep.subr.bf16.mxu1 %v9044_v53  ;;  %v9099_v34 = vld [vmem:[%s9916_s28 + $0xb28] ss:$20 sps:$4 sm:$0xff]   ;;  %v9102_v53 = vld [vmem:[%s9916_s28 + $0x1050] ss:$20 sps:$4 sm:$0xff]  }
 0x425   : > { %6122 = vmatprep.mubr.bf16.mxu0 %v10159_v32  ;;  %6162 = vmatprep.mubr.bf16.mxu1 %v10237_v43  ;;  %v9053_v32 = vld [vmem:[%s9916_s28 + $0x808] ss:$20 sps:$4 sm:$0xff]   ;;  %v9054_v43 = vld [vmem:[%s9916_s28 + $0x6f0] ss:$20 sps:$4 sm:$0xff]  }
 0x426   : > { %v9101_v52 = vld [vmem:[%s9916_s28 + $0xda8] ss:$20 sps:$4 sm:$0xff]  }
 0x427   : > { %7785 = vmatpush3.bf16.msra.mxu0 %v9043_v26  ;;  %7807 = vmatpush3.bf16.msra.mxu1 %v9045_v57  ;;  %v9103_v26 = vld [vmem:[%s9916_s28 + $0xf10] ss:$20 sps:$4 sm:$0xff]  }
 0x428   : > { %7786 = vmatprep.subr.bf16.mxu0 %v9046_v58  ;;  %7808 = vmatprep.subr.bf16.mxu1 %v9048_v36  ;;  %v9104_v57 = vld [vmem:[%s9916_s28 + $0x1190] ss:$20 sps:$4 sm:$0xff]   ;;  %v9544_v58 = vmov 0.0   ;;  %v9105_v36 = vld [vmem:[%s9916_s28 + $0x1078] ss:$20 sps:$4 sm:$0xff]  }
 0x42b   : > { %7787 = vmatpush3.bf16.msra.mxu0 %v9047_v21  ;;  %7809 = vmatpush3.bf16.msra.mxu1 %v9049_v25  ;;  %v9106_v21 = vld [vmem:[%s9916_s28 + $0xf38] ss:$20 sps:$4 sm:$0xff]  }
 0x42c   : > { %7788 = vmatprep.subr.bf16.mxu0 %v9050_v37  ;;  %7810 = vmatprep.subr.bf16.mxu1 %v9052_v59  ;;  %v9107_v25 = vld [vmem:[%s9916_s28 + $0x11b8] ss:$20 sps:$4 sm:$0xff]   ;;  %v9108_v37 = vld [vmem:[%s9916_s28 + $0x10a0] ss:$20 sps:$4 sm:$0xff]   ;;  %v9111_v59 = vld [vmem:[%s9916_s28 + $0x10c8] ss:$20 sps:$4 sm:$0xff]  }
 0x42f   : > { %7789 = vmatpush3.bf16.msra.mxu0 %v9051_v7  ;;  %7811 = vmatpush3.bf16.msra.mxu1 %v9053_v32  ;;  %v9113_v7 = vld [vmem:[%s9916_s28 + $0x1208] ss:$20 sps:$4 sm:$0xff]   ;;  %v9114_v32 = vld [vmem:[%s9916_s28 + $0x10f0] ss:$20 sps:$4 sm:$0xff]  }
 0x430   : > { %7790 = vmatprep.subr.bf16.mxu0 %v9054_v43  ;;  %7812 = vmatprep.subr.bf16.mxu1 %v9056_v62  ;;  %v9115_v43 = vld [vmem:[%s9916_s28 + $0xfb0] ss:$20 sps:$4 sm:$0xff]  }
 0x431   : > { %v9116_v62 = vld [vmem:[%s9916_s28 + $0x1230] ss:$20 sps:$4 sm:$0xff]  }
 0x433   : > { %7791 = vmatpush3.bf16.msra.mxu0 %v9055_v63  ;;  %7813 = vmatpush3.bf16.msra.mxu1 %v9057_v0  ;;  %v9117_v63 = vld [vmem:[%s9916_s28 + $0x1118] ss:$20 sps:$4 sm:$0xff]  }
 0x434   : > { %7792 = vmatprep.subr.bf16.mxu0 %v9058_v51  ;;  %7814 = vmatprep.subr.bf16.mxu1 %v9060_v3  ;;  %v9118_v0 = vld [vmem:[%s9916_s28 + $0xfd8] ss:$20 sps:$4 sm:$0xff]   ;;  %v9120_v3 = vld [vmem:[%s9916_s28 + $0x1140] ss:$20 sps:$4 sm:$0xff]  }
 0x435   : > { %v9119_v51 = vld [vmem:[%s9916_s28 + $0x1258] ss:$20 sps:$4 sm:$0xff]  }
 0x437   : > { %7793 = vmatpush3.bf16.msra.mxu0 %v9059_v4  ;;  %7815 = vmatpush3.bf16.msra.mxu1 %v9061_v5  ;;  %v9121_v4 = vld [vmem:[%s9916_s28 + $0x1000] ss:$20 sps:$4 sm:$0xff]  }
 0x438   : > { %7794 = vmatprep.subr.bf16.mxu0 %v9062_v6  ;;  %7816 = vmatprep.subr.bf16.mxu1 %v9064_v9  ;;  %v9122_v5 = vld [vmem:[%s9916_s28 + $0x1280] ss:$20 sps:$4 sm:$0xff]   ;;  %v9123_v6 = vld [vmem:[%s9916_s28 + $0x1168] ss:$20 sps:$4 sm:$0xff]  }
 0x439   : > { %v9124_v9 = vld [vmem:[%s9916_s28 + $0x1028] ss:$20 sps:$4 sm:$0xff]  }
 0x43b   : > { %7795 = vmatpush3.bf16.msra.mxu0 %v9063_v10  ;;  %7817 = vmatpush3.bf16.msra.mxu1 %v9065_v11  ;;  %v9125_v10 = vld [vmem:[%s9916_s28 + $0x12a8] ss:$20 sps:$4 sm:$0xff]   ;;  %v9126_v11 = vld [vmem:[%s9926_s20 + $0x40] sm:$0xff]  }
 0x43c   : > { %7796 = vmatprep.subr.bf16.mxu0 %v9066_v12  ;;  %7818 = vmatprep.subr.bf16.mxu1 %v9068_v50  ;;  %v9127_v12 = vld [vmem:[%s9926_s20 + $0xc0] sm:$0xff]  }
 0x43d   : > { %v9128_v50 = vld [vmem:[%s9926_s20] sm:$0xff]  }
 0x43f   : > { %7797 = vmatpush3.bf16.msra.mxu0 %v9067_v15  ;;  %7819 = vmatpush3.bf16.msra.mxu1 %v9069_v60  ;;  %v9129_v15 = vld [vmem:[%s9926_s20 + $0x80] sm:$0xff]   ;;  %v9130_v60 = vld [vmem:[%s9926_s20 + $0x48] sm:$0xff]  }
 0x440   : > { %7826 = vmatprep.subr.bf16.mxu0 %v9070_v17  ;;  %7848 = vmatprep.subr.bf16.mxu1 %v9072_v54  ;;  %v9131_v17 = vld [vmem:[%s9926_s20 + $0xc8] sm:$0xff]  }
 0x441   : > { %v9132_v54 = vld [vmem:[%s9926_s20 + $0x8] sm:$0xff]  }
 0x442   : > { %6123 = vmatmul.mubr.bf16.vlgmr.msra.gmra.mrb[8].mxu0 %v10228_v39  ;;  %6163 = vmatmul.mubr.bf16.vlgmr.msra.gmra.mrb[8].mxu1 %v10306_v48  ;;  %v9079_v39 = vld [vmem:[%s9916_s28 + $0xa60] ss:$20 sps:$4 sm:$0xff]  }
 0x443   : > { %7827 = vmatpush3.bf16.msra.mxu0 %v9071_v55  ;;  %7849 = vmatpush3.bf16.msra.mxu1 %v9073_v18  ;;  %v9081_v48 = vld [vmem:[%s9916_s28 + $0xce0] ss:$20 sps:$4 sm:$0xff]   ;;  %v9134_v18 = vld [vmem:[%s9926_s20 + $0x50] sm:$0xff]  }
 0x444   : > { %7828 = vmatprep.subr.bf16.mxu0 %v9074_v19  ;;  %7850 = vmatprep.subr.bf16.mxu1 %v9076_v20  ;;  %v9133_v55 = vld [vmem:[%s9926_s20 + $0x88] sm:$0xff]   ;;  %v9135_v19 = vld [vmem:[%s9926_s20 + $0xd0] sm:$0xff]  }
 0x445   : > { %6202 = vmatprep.mubr.bf16.mxu0 %v10315_v56  ;;  %6242 = vmatprep.mubr.bf16.mxu1 %v10393_v1  ;;  %v9085_v56 = vld [vmem:[%s9916_s28 + $0xd08] ss:$20 sps:$4 sm:$0xff]   ;;  %v9086_v1 = vld [vmem:[%s9916_s28 + $0xbf0] ss:$20 sps:$4 sm:$0xff]  }
 0x446   : > { %v9136_v20 = vld [vmem:[%s9926_s20 + $0x10] sm:$0xff]  }
 0x447   : > { %7829 = vmatpush3.bf16.msra.mxu0 %v9075_v2  ;;  %7851 = vmatpush3.bf16.msra.mxu1 %v9077_v49  ;;  %v9139_v2 = vld [vmem:[%s9926_s20 + $0xd8] sm:$0xff]  }
 0x448   : > { %7830 = vmatprep.subr.bf16.mxu0 %v9078_v22  ;;  %7852 = vmatprep.subr.bf16.mxu1 %v9080_v23  ;;  %v9140_v49 = vld [vmem:[%s9926_s20 + $0x18] sm:$0xff]   ;;  %v9142_v23 = vld [vmem:[%s9926_s20 + $0x60] sm:$0xff]  }
 0x449   : > { %v9141_v22 = vld [vmem:[%s9926_s20 + $0x98] sm:$0xff]  }
 0x44b   : > { %7831 = vmatpush3.bf16.msra.mxu0 %v9079_v39  ;;  %7853 = vmatpush3.bf16.msra.mxu1 %v9081_v48  ;;  %v9143_v39 = vld [vmem:[%s9926_s20 + $0xe0] sm:$0xff]  }
 0x44c   : > { %7832 = vmatprep.subr.bf16.mxu0 %v9082_v24  ;;  %7854 = vmatprep.subr.bf16.mxu1 %v9084_v27  ;;  %v9144_v48 = vld [vmem:[%s9926_s20 + $0x20] sm:$0xff]   ;;  %v9146_v27 = vld [vmem:[%s9926_s20 + $0x68] sm:$0xff]  }
 0x44d   : > { %v9145_v24 = vld [vmem:[%s9926_s20 + $0xa0] sm:$0xff]  }
 0x44f   : > { %7833 = vmatpush3.bf16.msra.mxu0 %v9083_v29  ;;  %7855 = vmatpush3.bf16.msra.mxu1 %v9085_v56  ;;  %v9147_v29 = vld [vmem:[%s9926_s20 + $0xe8] sm:$0xff]  }
 0x450   : > { %7834 = vmatprep.subr.bf16.mxu0 %v9086_v1  ;;  %7856 = vmatprep.subr.bf16.mxu1 %v9088_v31  ;;  %v9148_v56 = vld [vmem:[%s9926_s20 + $0x28] sm:$0xff]   ;;  %v9150_v31 = vld [vmem:[%s9926_s20 + $0x70] sm:$0xff]  }
 0x451   : > { %v9149_v1 = vld [vmem:[%s9926_s20 + $0xa8] sm:$0xff]  }
 0x453   : > { %7835 = vmatpush3.bf16.msra.mxu0 %v9087_v33  ;;  %7857 = vmatpush3.bf16.msra.mxu1 %v9089_v35  ;;  %v9151_v33 = vld [vmem:[%s9926_s20 + $0xf0] sm:$0xff]  }
 0x454   : > { %7836 = vmatprep.subr.bf16.mxu0 %v9090_v13  ;;  %7858 = vmatprep.subr.bf16.mxu1 %v9092_v38  ;;  %v9152_v35 = vld [vmem:[%s9926_s20 + $0x30] sm:$0xff]   ;;  %v9154_v38 = vld [vmem:[%s9926_s20 + $0x78] sm:$0xff]  }
 0x455   : > { %v9153_v13 = vld [vmem:[%s9926_s20 + $0xb0] sm:$0xff]  }
 0x457   : > { %7837 = vmatpush3.bf16.msra.mxu0 %v9091_v40  ;;  %7859 = vmatpush3.bf16.msra.mxu1 %v9093_v41  ;;  %v9155_v40 = vld [vmem:[%s9926_s20 + $0xf8] sm:$0xff]  }
 0x458   : > { %7838 = vmatprep.subr.bf16.mxu0 %v9094_v42  ;;  %7860 = vmatprep.subr.bf16.mxu1 %v9096_v30  ;;  %v9156_v41 = vld [vmem:[%s9926_s20 + $0x38] sm:$0xff]   ;;  %v6332_v30 = vlaneseq }
 0x459   : > { %v9157_v42 = vld [vmem:[%s9926_s20 + $0xb8] sm:$0xff]  }
 0x45b   : > { %7839 = vmatpush3.bf16.msra.mxu0 %v9095_v44  ;;  %7861 = vmatpush3.bf16.msra.mxu1 %v9097_v45  ;;  %v10755_v44 = vshrl.u32 %v6332_v30, 7 }
 0x45c   : > { %7840 = vmatprep.subr.bf16.mxu0 %v9098_v46  ;;  %7862 = vmatprep.subr.bf16.mxu1 %v9100_v47  ;;  %v10760_v47 = vld [vmem:[%s9922_s12] sm:$0x1f] }
 0x45d   : > { %v6334_v45 = vsub.s32 0, %v10755_v44  ;;  %v6342_v46 = vsub.s32 2, %v10755_v44 }
 0x45f   : > { %7841 = vmatpush3.bf16.msra.mxu0 %v9099_v34  ;;  %7863 = vmatpush3.bf16.msra.mxu1 %v9101_v52  ;;  %v6338_v34 = vsub.s32 1, %v10755_v44  ;;  %v6346_v52 = vsub.s32 3, %v10755_v44 }
 0x460   : > { %7870 = vmatprep.subr.bf16.mxu0 %v9102_v53  ;;  %7965 = vmatprep.subr.bf16.mxu1 %v9544_v58  ;;  %v10765_v53 = vld [vmem:[%s9924_s21] sm:$0x1f] }
 0x462   : > { %6203 = vmatmul.mubr.bf16.vlgmr.msra.gmra.mrb[12].mxu0 %v10385_v61  ;;  %6243 = vmatmul.mubr.bf16.vlgmr.msra.gmra.mrb[12].mxu1 %v10465_v14  ;;  %v9109_v61 = vld [vmem:[%s9916_s28 + $0xf60] ss:$20 sps:$4 sm:$0xff]  }
 0x463   : > { %7871 = vmatpush3.bf16.msra.mxu0 %v9103_v26  ;;  %7966 = vmatpush3.bf16.msra.mxu1 %v9104_v57  ;;  %v9110_v14 = vld [vmem:[%s9916_s28 + $0x11e0] ss:$20 sps:$4 sm:$0xff]   ;;  %v6335_v26 = vrot.slane %v10760_v47, %v6334_v45  ;;  %v6343_v57 = vrot.slane %v10760_v47, %v6342_v46 }
 0x464   : > { %7872 = vmatprep.subr.bf16.mxu0 %v9105_v36  ;;  %7967 = vmatprep.subr.bf16.mxu1 %v9544_v58  ;;  %v6339_v36 = vrot.slane %v10760_v47, %v6338_v34 }
 0x465   : > { %6282 = vmatprep.mubr.bf16.mxu0 %v10471_v16  ;;  %7981 = vmatprep.mubr.msk.bf16.mxu1 %vm9545_vm2, %v9544_v58  ;;  %v9112_v16 = vld [vmem:[%s9916_s28 + $0xf88] ss:$20 sps:$4 sm:$0xff]  }
 0x467   : > { %7873 = vmatpush3.bf16.msra.mxu0 %v9106_v21  ;;  %7968 = vmatpush3.bf16.msra.mxu1 %v9107_v25  ;;  %v6347_v21 = vrot.slane %v10760_v47, %v6346_v52  ;;  %v6367_v25 = vrot.slane %v10765_v53, %v6334_v45 }
 0x468   : > { %7874 = vmatprep.subr.bf16.mxu0 %v9108_v37  ;;  %7969 = vmatprep.subr.bf16.mxu1 %v9544_v58  ;;  %v6375_v37 = vrot.slane %v10765_v53, %v6342_v46 }
 0x46b   : > { %7875 = vmatpush3.bf16.msra.mxu0 %v9109_v61  ;;  %7970 = vmatpush3.bf16.msra.mxu1 %v9110_v14 }
 0x46c   : > { %7876 = vmatprep.subr.bf16.mxu0 %v9111_v59  ;;  %7971 = vmatprep.subr.bf16.mxu1 %v9544_v58  ;;  %v6371_v59 = vrot.slane %v10765_v53, %v6338_v34 }
 0x46f   : > { %7877 = vmatpush3.bf16.msra.mxu0 %v9112_v16  ;;  %7972 = vmatpush3.bf16.msra.mxu1 %v9113_v7  ;;  %v6379_v16 = vrot.slane %v10765_v53, %v6346_v52 }
 0x470   : > { %7878 = vmatprep.subr.bf16.mxu0 %v9114_v32  ;;  %7973 = vmatprep.subr.bf16.mxu1 %v9544_v58 }
 0x473   : > { %7879 = vmatpush3.bf16.msra.mxu0 %v9115_v43  ;;  %7974 = vmatpush3.bf16.msra.mxu1 %v9116_v62 }
 0x474   : > { %7880 = vmatprep.subr.bf16.mxu0 %v9117_v63  ;;  %7975 = vmatprep.subr.bf16.mxu1 %v9544_v58 }
 0x477   : > { %7881 = vmatpush3.bf16.msra.mxu0 %v9118_v0  ;;  %7976 = vmatpush3.bf16.msra.mxu1 %v9119_v51 }
 0x478   : > { %7882 = vmatprep.subr.bf16.mxu0 %v9120_v3  ;;  %7977 = vmatprep.subr.bf16.mxu1 %v9544_v58 }
 0x47b   : > { %7883 = vmatpush3.bf16.msra.mxu0 %v9121_v4  ;;  %7978 = vmatpush3.bf16.msra.mxu1 %v9122_v5 }
 0x47c   : > { %7884 = vmatprep.subr.bf16.mxu0 %v9123_v6  ;;  %7979 = vmatprep.subr.bf16.mxu1 %v9544_v58 }
 0x47f   : > { %7885 = vmatpush3.bf16.msra.mxu0 %v9124_v9  ;;  %7980 = vmatpush3.bf16.msra.mxu1 %v9125_v10 }
 0x480   : > { %7901 = vmatprep.subr.bf16.mxu0 %v9126_v11  ;;  %7923 = vmatprep.subr.bf16.mxu1 %v9127_v12 }
 0x482   : > { %6283 = vmatmul.mubr.bf16.vlgmr.msra.gmra.mrb[16].mxu0 %v10540_v28  ;;  %7982 = vmatmul.mubr.bf16.vlgmr.msra.gmra.mrb[16].mxu1 %v10575_v8  ;;  %v9137_v28 = vld [vmem:[%s9926_s20 + $0x90] sm:$0xff]   ;;  %v9138_v8 = vld [vmem:[%s9926_s20 + $0x58] sm:$0xff]  }
 0x483   : > { %7902 = vmatpush3.bf16.msra.mxu0 %v9128_v50  ;;  %7924 = vmatpush3.bf16.msra.mxu1 %v9129_v15 }
 0x484   : > { %7903 = vmatprep.subr.bf16.mxu0 %v9130_v60  ;;  %7925 = vmatprep.subr.bf16.mxu1 %v9131_v17 }
 0x487   : > { %7904 = vmatpush3.bf16.msra.mxu0 %v9132_v54  ;;  %7926 = vmatpush3.bf16.msra.mxu1 %v9133_v55  ;;  %v9158_v55 = vld [vmem:[%s9926_s20 + $0x100] sm:$0xff]  }
 0x488   : > { %7905 = vmatprep.subr.bf16.mxu0 %v9134_v18  ;;  %7927 = vmatprep.subr.bf16.mxu1 %v9135_v19 }
 0x48b   : > { %7906 = vmatpush3.bf16.msra.mxu0 %v9136_v20  ;;  %7928 = vmatpush3.bf16.msra.mxu1 %v9137_v28  ;;  %v9159_v20 = vld [vmem:[%s9926_s20 + $0x108] sm:$0xff]   ;;  %v9160_v28 = vld [vmem:[%s9926_s20 + $0x110] sm:$0xff]  }
 0x48c   : > { %7907 = vmatprep.subr.bf16.mxu0 %v9138_v8  ;;  %7929 = vmatprep.subr.bf16.mxu1 %v9139_v2  ;;  %v9161_v8 = vld [vmem:[%s9926_s20 + $0x118] sm:$0xff]   ;;  %v9162_v2 = vld [vmem:[%s9926_s20 + $0x120] sm:$0xff]  }
 0x48f   : > { %7908 = vmatpush3.bf16.msra.mxu0 %v9140_v49  ;;  %7930 = vmatpush3.bf16.msra.mxu1 %v9141_v22  ;;  %v9163_v49 = vld [vmem:[%s9926_s20 + $0x128] sm:$0xff]  }
 0x490   : > { %7909 = vmatprep.subr.bf16.mxu0 %v9142_v23  ;;  %7931 = vmatprep.subr.bf16.mxu1 %v9143_v39  ;;  %v9164_v39 = vld [vmem:[%s9926_s20 + $0x130] sm:$0xff]  }
 0x493   : > { %7910 = vmatpush3.bf16.msra.mxu0 %v9144_v48  ;;  %7932 = vmatpush3.bf16.msra.mxu1 %v9145_v24 }
 0x494   : > { %7911 = vmatprep.subr.bf16.mxu0 %v9146_v27  ;;  %7933 = vmatprep.subr.bf16.mxu1 %v9147_v29 }
 0x497   : > { %7912 = vmatpush3.bf16.msra.mxu0 %v9148_v56  ;;  %7934 = vmatpush3.bf16.msra.mxu1 %v9149_v1 }
 0x498   : > { %7913 = vmatprep.subr.bf16.mxu0 %v9150_v31  ;;  %7935 = vmatprep.subr.bf16.mxu1 %v9151_v33 }
 0x49b   : > { %7914 = vmatpush3.bf16.msra.mxu0 %v9152_v35  ;;  %7936 = vmatpush3.bf16.msra.mxu1 %v9153_v13  ;;  %v9165_v13 = vld [vmem:[%s9926_s20 + $0x138] sm:$0xff]  }
 0x49c   : > { %7915 = vmatprep.subr.bf16.mxu0 %v9154_v38  ;;  %7937 = vmatprep.subr.bf16.mxu1 %v9155_v40 }
 0x49f   : > { %7916 = vmatpush3.bf16.msra.mxu0 %v9156_v41  ;;  %7938 = vmatpush3.bf16.msra.mxu1 %v9157_v42 }
 0x4a0   : > { %7985 = vmatprep.subr.bf16.mxu0 %v9544_v58 }
 0x4d5   : > { %v5675_v61 = vpop.f32.mrb[0].mxu0  ;;  %v6003_v14 = vpop.f32.mrb[0].mxu1 }
 0x4d6   : > { %v6357_v7 = vmul.f32 %v6335_v26, %v5675_v61  ;;  %v6359_v32 = vmul.f32 %v6343_v57, %v6003_v14  ;;  %v5677_v43 = vpop.f32.mrb[1].mxu0  ;;  %v6005_v62 = vpop.f32.mrb[1].mxu1 }
 0x4d7   : > { %v6358_v63 = vmul.f32 %v6339_v36, %v5677_v43  ;;  %v6360_v0 = vmul.f32 %v6347_v21, %v6005_v62  ;;  %v5679_v51 = vpop.f32.mrb[2].mxu0  ;;  %v6007_v3 = vpop.f32.mrb[2].mxu1 }
 0x4d8   : > { %v6389_v4 = vadd.f32 %v6367_v25, %v6357_v7  ;;  %v6391_v5 = vadd.f32 %v6375_v37, %v6359_v32  ;;  %v5680_v6 = vpop.f32.mrb[3].mxu0  ;;  %v6008_v9 = vpop.f32.mrb[3].mxu1  ;;  %v6350_v51 = vsub.s32 4, %v10755_v44 }
 0x4d9   : > { %v6390_v10 = vadd.f32 %v6371_v59, %v6358_v63  ;;  %v6392_v11 = vadd.f32 %v6379_v16, %v6360_v0 }
 0x4da   : > { %v6394_v12 = vmax.f32 %v6389_v4, 0.0  ;;  %v6396_v50 = vmax.f32 %v6391_v5, 0.0 }
 0x4db   : > { %v6395_v15 = vmax.f32 %v6390_v10, 0.0  ;;  %v6397_v60 = vmax.f32 %v6392_v11, 0.0 }
 0x4dc   : > { %v6400_v18 = vpack.c.bf16 %v6394_v12, %v6394_v12  ;;  %v6402_v19 = vpack.c.bf16 %v6396_v50, %v6396_v50  ;;  %v6351_v50 = vrot.slane %v10760_v47, %v6350_v51 }
 0x4dd   : > { %v6401_v17 = vpack.c.bf16 %v6395_v15, %v6395_v15  ;;  %v6403_v54 = vpack.c.bf16 %v6397_v60, %v6397_v60  ;;  %v6383_v60 = vrot.slane %v10765_v53, %v6350_v51 }
 0x4df   : > { %6757 = vmatprep.mubr.bf16.mxu0 %v6401_v17  ;;  %6797 = vmatprep.mubr.bf16.mxu1 %v6403_v54 }
 0x4e0   : > { %6758 = vmatmul.mubr.bf16.vlgmr.msra.gmra.mrb[20].mxu0 %v6400_v18  ;;  %6798 = vmatmul.mubr.bf16.vlgmr.msra.gmra.mrb[20].mxu1 %v6402_v19 }
 0x4e1   : > { %7986 = vmatpush3.bf16.msra.mxu0 %v9158_v55  ;;  %8001 = vmatprep.mubr.msk.bf16.mxu0 %vm9545_vm2, %v9544_v58 }
 0x4e2   : > { %7987 = vmatprep.subr.bf16.mxu0 %v9544_v58 }
 0x4e5   : > { %7988 = vmatpush3.bf16.msra.mxu0 %v9159_v20 }
 0x4e6   : > { %7989 = vmatprep.subr.bf16.mxu0 %v9544_v58 }
 0x4e9   : > { %7990 = vmatpush3.bf16.msra.mxu0 %v9160_v28 }
 0x4ea   : > { %7991 = vmatprep.subr.bf16.mxu0 %v9544_v58 }
 0x4ed   : > { %7992 = vmatpush3.bf16.msra.mxu0 %v9161_v8 }
 0x4ee   : > { %7993 = vmatprep.subr.bf16.mxu0 %v9544_v58 }
 0x4f1   : > { %7994 = vmatpush3.bf16.msra.mxu0 %v9162_v2 }
 0x4f2   : > { %7995 = vmatprep.subr.bf16.mxu0 %v9544_v58 }
 0x4f5   : > { %v7754_v22 = vpop.f32.mrb[4].mxu0  ;;  %v7776_v23 = vpop.f32.mrb[4].mxu1  ;;  %7996 = vmatpush3.bf16.msra.mxu0 %v9163_v49 }
 0x4f6   : > { %v7755_v48 = vpop.f32.mrb[5].mxu0  ;;  %v7777_v24 = vpop.f32.mrb[5].mxu1  ;;  %7997 = vmatprep.subr.bf16.mxu0 %v9544_v58 }
 0x4f7   : > { %v7756_v27 = vadd.f32 %v7755_v48, %v7754_v22  ;;  %v7778_v29 = vadd.f32 %v7777_v24, %v7776_v23  ;;  %v7757_v56 = vpop.f32.mrb[6].mxu0  ;;  %v7779_v1 = vpop.f32.mrb[6].mxu1  ;;  %v6399_v48 = vld [vmem:[#allocation16] sm:$0xff] }
 0x4f8   : > { %v7758_v31 = vpop.f32.mrb[7].mxu0  ;;  %v7780_v33 = vpop.f32.mrb[7].mxu1 }
 0x4f9   : > { %v6085_v35 = vadd.f32 %v7778_v29, %v7756_v27  ;;  %7998 = vmatpush3.bf16.msra.mxu0 %v9164_v39 }
 0x4fa   : > { %7999 = vmatprep.subr.bf16.mxu0 %v9544_v58 }
 0x4fd   : > { %8000 = vmatpush3.bf16.msra.mxu0 %v9165_v13 }
 0x515   : > { %v7798_v38 = vpop.f32.mrb[8].mxu0  ;;  %v7820_v40 = vpop.f32.mrb[8].mxu1 }
 0x516   : > { %v7799_v41 = vpop.f32.mrb[9].mxu0  ;;  %v7821_v42 = vpop.f32.mrb[9].mxu1 }
 0x517   : > { %v7800_v30 = vadd.f32 %v7799_v41, %v7798_v38  ;;  %v7801_v45 = vpop.f32.mrb[10].mxu0  ;;  %v7822_v46 = vadd.f32 %v7821_v42, %v7820_v40  ;;  %v7823_v34 = vpop.f32.mrb[10].mxu1 }
 0x518   : > { %v7802_v52 = vpop.f32.mrb[11].mxu0  ;;  %v7824_v26 = vpop.f32.mrb[11].mxu1 }
 0x519   : > { %v6125_v57 = vadd.f32 %v7800_v30, %v6085_v35 }
 0x51b   : > { %v6165_v36 = vadd.f32 %v7822_v46, %v6125_v57 }
 0x535   : > { %v7842_v21 = vpop.f32.mrb[12].mxu0  ;;  %v7864_v25 = vpop.f32.mrb[12].mxu1 }
 0x536   : > { %v7843_v37 = vpop.f32.mrb[13].mxu0  ;;  %v7865_v61 = vpop.f32.mrb[13].mxu1 }
 0x537   : > { %v7844_v14 = vadd.f32 %v7843_v37, %v7842_v21  ;;  %v7845_v59 = vpop.f32.mrb[14].mxu0  ;;  %v7866_v58 = vadd.f32 %v7865_v61, %v7864_v25  ;;  %v7867_v16 = vpop.f32.mrb[14].mxu1 }
 0x538   : > { %v7846_v7 = vpop.f32.mrb[15].mxu0  ;;  %v7868_v32 = vpop.f32.mrb[15].mxu1 }
 0x539   : > { %v6205_v43 = vadd.f32 %v7844_v14, %v6165_v36 }
 0x53b   : > { %v6245_v62 = vadd.f32 %v7866_v58, %v6205_v43 }
 0x555   : > { %v7886_v63 = vpop.f32.mrb[16].mxu0  ;;  %v6324_v0 = vpop.f32.mrb[16].mxu1 }
 0x556   : > { %v7887_v3 = vpop.f32.mrb[17].mxu0  ;;  %v7983_v4 = vpop.f32.mrb[17].mxu1 }
 0x557   : > { %v7888_v5 = vadd.f32 %v7887_v3, %v7886_v63  ;;  %v7889_v6 = vpop.f32.mrb[18].mxu0  ;;  %v6327_v9 = vpop.f32.mrb[18].mxu1 }
 0x558   : > { %v7890_v10 = vpop.f32.mrb[19].mxu0  ;;  %v7984_v11 = vpop.f32.mrb[19].mxu1 }
 0x559   : > { %v6285_v12 = vadd.f32 %v7888_v5, %v6245_v62 }
 0x55b   : > { %v6325_v15 = vadd.f32 %v6324_v0, %v6285_v12 }
 0x55d   : > { %v6361_v17 = vmul.f32 %v6351_v50, %v6325_v15 }
 0x55f   : > { %v6393_v54 = vadd.f32 %v6383_v60, %v6361_v17 }
 0x561   : > { %v6398_v55 = vmax.f32 %v6393_v54, 0.0 }
 0x563   : > { %v6404_v18 = vpack.c.bf16 %v6398_v55, %v6398_v55 }
 0x565   : > { %8002 = vmatmul.mubr.bf16.vlgmr.msra.gmra.mrb[24].mxu0 %v6404_v18 }
 0x5b3   : > { %v7917_v19 = vpop.f32.mrb[20].mxu0  ;;  %v7939_v44 = vpop.f32.mrb[20].mxu1 }
 0x5b4   : > { %v7918_v20 = vpop.f32.mrb[21].mxu0  ;;  %v7940_v28 = vpop.f32.mrb[21].mxu1 }
 0x5b5   : > { %v7919_v8 = vadd.f32 %v7918_v20, %v7917_v19  ;;  %v7941_v2 = vadd.f32 %v7940_v28, %v7939_v44  ;;  %v7920_v49 = vpop.f32.mrb[22].mxu0  ;;  %v7942_v22 = vpop.f32.mrb[22].mxu1 }
 0x5b6   : > { %v7921_v23 = vpop.f32.mrb[23].mxu0  ;;  %v7943_v39 = vpop.f32.mrb[23].mxu1 }
 0x5b7   : > { %v6800_v47 = vadd.f32 %v7941_v2, %v7919_v8 }
 0x638   : > { %v6839_v53 = vpop.f32.mrb[24].mxu0 }
 0x639   : > { %v6840_v24 = vadd.f32 %v6839_v53, %v6800_v47  ;;  %v8003_v27 = vpop.f32.mrb[25].mxu0 }
 0x63a   : > { %v6842_v29 = vpop.f32.mrb[26].mxu0 }
 0x63b   : > { %v6845_v56 = vadd.f32 %v6840_v24, %v6399_v48  ;;  %v8004_v1 = vpop.f32.mrb[27].mxu0 }
 0x63d   : > { %6846 = vst [vmem:[#allocation16] sm:$0xff] %v6845_v56 }
 0x63e   : > { %9439 = shalt.err (!%p9436_p3)
}
 0x63f   : > { %s10907_s16 = sld [smem:[#allocation32_spill]] }
 0x645   : > { %s9440_s30 = scalar_lea.hbm %s10907_s16, 128 }
 0x646   : > { %p9441_p5 = scmp.ne.s32.totalorder %s10907_s16, %s9440_s30  ;;  %p9446_p11 = scmp.lt.u32.totalorder %s9440_s30, %s10907_s16 }
 0x648   : > { %p9442_p8 = pnand %p9441_p5, %p8202_p9 }
 0x64a   : > { %p9443_p4 = pneg %p9442_p8 }
 0x64c   : > { %p9448_p13 = pnand %p9446_p11, %p9443_p4 }
 0x64e   : > { %9451 = shalt.err (!%p9448_p13)
}
 0x64f   : > { %8159 = dma.vmem_to_hbm [thread:$0]  (%p8202_p9), %s6857_s23, 128, %s10907_s16, [#allocation5]  }
 0x650   : > { %9497 = dma.done.wait (%p8202_p9), [#allocation5], 128  }
 0x651   : > { %9499 = vsyncadd (%p8202_p9), [#allocation5], 4294967168 }
 0x652 PF: > { %s10908_s25 = sld [smem:[#allocation26_spill]]  ;;  %s10909_s30 = sld [smem:[#allocation23_spill]] }
 0x653   : > { %s10910_s10 = sld [smem:[#allocation24_spill]]  ;;  %s10911_s11 = sld [smem:[#allocation29_spill]] }
 0x654   : > { %s10912_s28 = sld [smem:[#allocation28_spill]]  ;;  %s10913_s12 = smov %s9518_s13 }
 0x658   : > { %s23_s14 = sadd.s32 1, %s10908_s25  }
 0x659   : > { %p20_p0 = scmp.ge.s32.totalorder %s23_s14, 5  }
 0x65a   : > { %s10914_s13 = smov %s10912_s28 }
 0x65b   :  { %22 = sbr.rel (!%p20_p0) target bundleno = 10 (0xa), region = 151 }
 0x662   :  { %6869 = vsyncpa [#allocation4], 1 }
 0x663   :  { %6871 = vsyncpa [#allocation4 + $0x1], 1 }
 0x664   :  { %6872 = vsyncpa [#allocation7], 1 }
 0x665   :  { %6873 = vsyncpa [#allocation10], 1 }
 0x666   :  { %6874 = vsyncpa [#allocation5], 1 }
 0x667   :  { %6876 = vsyncpa [#allocation5 + $0x1], 1 }

</bundles_post_ra>
